<compile_context>
chip_gen: v7x
topology: tpu7x:2x2x1
jax: 0.10.0
libtpu: 0.0.40
codegen_flags: <defaults>
</compile_context>

<pallas_src>
import jax
import jax.numpy as jnp
from jax import lax
from jax.experimental import pallas as pl
from jax.experimental.pallas import tpu as pltpu


# ---------------------------------------------------------------------------
# In-kernel GRU helpers (fused r/z/n gates; gate order r, z, n)
# ---------------------------------------------------------------------------
def _gru_gates(gx, gh, h, bhn_b, H):
    r = jax.nn.sigmoid(gx[:, 0:H] + gh[:, 0:H])
    z = jax.nn.sigmoid(gx[:, H:2 * H] + gh[:, H:2 * H])
    n = jnp.tanh(gx[:, 2 * H:] + r * (gh[:, 2 * H:] + bhn_b))
    return (1.0 - z) * n + z * h


def _gru_time_loop(xp_ref, hs_ref, whh, bhn_b, h0, T, B, H):
    """Serial GRU recurrence over a VMEM-resident, time-major flattened (T*B, 3H)
    input projection; per-step hidden states are written to hs_ref (T*B, H)."""

    def step(t, h):
        row = t * B
        if B % 8 == 0:                       # aligned dynamic row-slice hint
            row = pl.multiple_of(row, 8)
        gx = xp_ref[pl.ds(row, B), :]                                   # (B, 3H) f32
        # TODO(synk): hold whh MXU-resident across steps (matmul_push_rhs) instead of
        #             re-pushing it every iteration.
        gh = jnp.dot(h.astype(whh.dtype), whh,
                     preferred_element_type=jnp.float32)                # (B, 3H) f32
        h_new = _gru_gates(gx, gh, h, bhn_b, H)
        hs_ref[pl.ds(row, B), :] = h_new
        return h_new

    return lax.fori_loop(0, T, step, h0, unroll=min(T, 8))


# ---------------------------------------------------------------------------
# Single fused kernel: word encoder + EOS-gather sent encoder + word decoder
# + vocab projection + log_softmax
# ---------------------------------------------------------------------------
def seq2seq_fwd_kernel(
    eos_ref,                                  # (B, S) int32   SMEM
    xw_ref, xt_ref, xk_ref,                   # (T_in*B, E), (T_out*B, E), (T_out*B, E) bf16
    wih_w_ref, bih_w_ref, whh_w_ref, bhn_w_ref,   # word-encoder GRU (fused gates)
    wih_s_ref, bih_s_ref, whh_s_ref, bhn_s_ref,   # sent-encoder GRU
    wih_d_ref, bih_d_ref, whh_d_ref, bhn_d_ref,   # decoder GRU
    wout_ref, bout_ref,                       # (H, V) bf16, (1, V) f32
    logp_ref, dec_state_ref, word_state_ref, sent_state_ref,
    xpw_ref, hsw_ref, xpd_ref, hsd_ref,       # VMEM scratch
):
    B, H = word_state_ref.shape
    S = eos_ref.shape[1]
    E = xw_ref.shape[1]
    T_in = xw_ref.shape[0] // B
    T_out = xt_ref.shape[0] // B
    f32 = jnp.float32

    # ---------------- word-level encoder ----------------
    # Fused input projection for all timesteps in one lane-dense GEMM, kept in VMEM.
    xpw_ref[...] = (jnp.dot(xw_ref[...], wih_w_ref[...], preferred_element_type=f32)
                    + bih_w_ref[...])
    whh_w = whh_w_ref[...]
    bhn_w = jnp.broadcast_to(bhn_w_ref[...], (B, H))          # hoisted out of the loop
    word_state = _gru_time_loop(xpw_ref, hsw_ref, whh_w, bhn_w,
                                jnp.zeros((B, H), f32), T_in, B, H)
    word_state_ref[...] = word_state

    # ---------------- sentence-level encoder over EOS positions ----------------
    # sent_in[s, b, :] = word_out[eos[b, s], b, :], gathered from the VMEM scratch.
    wih_s = wih_s_ref[...]
    bih_s = bih_s_ref[...]
    whh_s = whh_s_ref[...]
    bhn_s = jnp.broadcast_to(bhn_s_ref[...], (B, H))
    row_ids = lax.broadcasted_iota(jnp.int32, (B, H), 0)
    h_s = jnp.zeros((B, H), f32)
    for s in range(S):                                        # S is small & static
        x_s = jnp.zeros((B, H), f32)
        for b in range(B):                                    # B is small & static
            row = eos_ref[b, s] * B
            if B % 8 == 0:
                row = pl.multiple_of(row, 8)
            blk = hsw_ref[pl.ds(row, B), :]                   # all batches at that t
            x_s = jnp.where(row_ids == b, blk, x_s)           # keep only batch row b
        gx = (jnp.dot(x_s.astype(wih_s.dtype), wih_s, preferred_element_type=f32)
              + bih_s)
        gh = jnp.dot(h_s.astype(whh_s.dtype), whh_s, preferred_element_type=f32)
        h_s = _gru_gates(gx, gh, h_s, bhn_s, H)
    # Computed as in the reference encoder; unused for decoder_model == 'word'.
    sent_state_ref[...] = h_s

    # ---------------- word-level decoder (h0 = word_state) ----------------
    # concat(emb(targets), emb(targets_kws)) @ W_ih == xt @ W_ih[:E] + xk @ W_ih[E:]
    xpd_ref[...] = (jnp.dot(xt_ref[...], wih_d_ref[0:E, :], preferred_element_type=f32)
                    + jnp.dot(xk_ref[...], wih_d_ref[E:, :], preferred_element_type=f32)
                    + bih_d_ref[...])
    whh_d = whh_d_ref[...]
    bhn_d = jnp.broadcast_to(bhn_d_ref[...], (B, H))
    dec_state = _gru_time_loop(xpd_ref, hsd_ref, whh_d, bhn_d,
                               word_state, T_out, B, H)
    dec_state_ref[...] = dec_state

    # ---------------- vocab projection fused with log_softmax ----------------
    # TODO(synk): tile over V with an online logsumexp for realistic vocab sizes.
    logits = (jnp.dot(hsd_ref[...].astype(wout_ref.dtype), wout_ref[...],
                      preferred_element_type=f32) + bout_ref[...])
    m = jnp.max(logits, axis=-1, keepdims=True)
    lse = jnp.log(jnp.sum(jnp.exp(logits - m), axis=-1, keepdims=True)) + m
    logp_ref[...] = logits - lse


# ---------------------------------------------------------------------------
# pallas_call wrapper
# ---------------------------------------------------------------------------
def seq2seq_pallas(params, x_word, x_tgt, x_kws, eos_idx):
    TB_in, E = x_word.shape
    TB_out = x_tgt.shape[0]
    B, _ = eos_idx.shape
    H = params["enc_word"]["w_hh"].shape[0]
    V = params["out_w"].shape[-1]
    H3 = 3 * H
    pw, ps, pd = params["enc_word"], params["enc_sent"], params["dec"]

    vmem = pl.BlockSpec(memory_space=pltpu.MemorySpace.VMEM)
    smem = pl.BlockSpec(memory_space=pltpu.MemorySpace.SMEM)

    return pl.pallas_call(
        seq2seq_fwd_kernel,
        out_shape=(
            jax.ShapeDtypeStruct((TB_out, V), jnp.float32),   # log-probs (time-major flat)
            jax.ShapeDtypeStruct((B, H), jnp.float32),        # decoder final state
            jax.ShapeDtypeStruct((B, H), jnp.float32),        # word-encoder final state
            jax.ShapeDtypeStruct((B, H), jnp.float32),        # sent-encoder final state
        ),
        in_specs=[smem] + [vmem] * 17,
        out_specs=(vmem, vmem, vmem, vmem),
        scratch_shapes=[
            pltpu.VMEM((TB_in, H3), jnp.float32),   # word-encoder input projections
            pltpu.VMEM((TB_in, H), jnp.float32),    # word-encoder hidden states
            pltpu.VMEM((TB_out, H3), jnp.float32),  # decoder input projections
            pltpu.VMEM((TB_out, H), jnp.float32),   # decoder hidden states
        ],
    )(eos_idx, x_word, x_tgt, x_kws,
      pw["w_ih"], pw["b_ih"], pw["w_hh"], pw["b_hn"],
      ps["w_ih"], ps["b_ih"], ps["w_hh"], ps["b_hn"],
      pd["w_ih"], pd["b_ih"], pd["w_hh"], pd["b_hn"],
      params["out_w"], params["out_b"])


# ---------------------------------------------------------------------------
# Parameter init (torch-style per-gate params, then fused for the kernel)
# ---------------------------------------------------------------------------
def fuse_gru_params(p):
    """Per-gate (r,z,n) params -> lane-dense fused (., 3H) GEMM params.

    b_hh_r / b_hh_z only ever appear summed with the input gates, so they are folded
    into the input-projection bias; only b_hh_n stays inside the recurrence (exact)."""
    w_ih = jnp.concatenate([p["w_ih"][g] for g in range(3)], axis=-1).astype(jnp.bfloat16)
    w_hh = jnp.concatenate([p["w_hh"][g] for g in range(3)], axis=-1).astype(jnp.bfloat16)
    b_ih = jnp.concatenate(
        [p["b_ih"][0] + p["b_hh"][0],
         p["b_ih"][1] + p["b_hh"][1],
         p["b_ih"][2]], axis=-1)                                      # (1, 3H) f32
    return {"w_ih": w_ih, "b_ih": b_ih, "w_hh": w_hh, "b_hn": p["b_hh"][2]}


def init_gru_params(key, in_dim, hidden):
    k1, k2, k3, k4 = jax.random.split(key, 4)
    s = 1.0 / jnp.sqrt(hidden)
    raw = {
        "w_ih": jax.random.uniform(k1, (3, in_dim, hidden), jnp.float32, -s, s),
        "b_ih": jax.random.uniform(k2, (3, 1, hidden), jnp.float32, -s, s),
        "w_hh": jax.random.uniform(k3, (3, hidden, hidden), jnp.float32, -s, s),
        "b_hh": jax.random.uniform(k4, (3, 1, hidden), jnp.float32, -s, s),
    }
    return fuse_gru_params(raw)


def init_seq2seq_params(key, vocab_size, emb_size, hidden):
    k_emb, k_we, k_se, k_de, k_ow, k_ob = jax.random.split(key, 6)
    s = 1.0 / jnp.sqrt(hidden)
    return {
        # bf16 embedding table: gathers feed the MXU directly, half the DMA bytes.
        "emb": (jax.random.normal(k_emb, (vocab_size, emb_size), jnp.float32) * 0.1
                ).astype(jnp.bfloat16),
        "enc_word": init_gru_params(k_we, emb_size, hidden),
        "enc_sent": init_gru_params(k_se, hidden, hidden),
        "dec": init_gru_params(k_de, 2 * emb_size, hidden),
        "out_w": jax.random.uniform(k_ow, (hidden, vocab_size), jnp.float32, -s, s
                                    ).astype(jnp.bfloat16),
        "out_b": jax.random.uniform(k_ob, (1, vocab_size), jnp.float32, -s, s),
    }


# ---------------------------------------------------------------------------
# Seq2Seq forward (decoder_model == 'word')
# ---------------------------------------------------------------------------
@jax.jit
def seq2seq_forward(params, inputs, targets, inputs_eos_idx, targets_eos_idx,
                    targets_kws, inputs_len, targets_len):
    del targets_eos_idx, inputs_len, targets_len  # TODO(synk): length masking not applied
    emb = params["emb"]                           # (V, E) bf16
    B, T_in = inputs.shape
    _, T_out = targets.shape
    E = emb.shape[-1]
    V = params["out_w"].shape[-1]

    # Time-major flattened (T*B, E) bf16 embedding gathers (only the tiny int32 id
    # arrays are transposed; the flatten is a free metadata reshape).
    x_w = jnp.take(emb, inputs.T, axis=0).reshape(T_in * B, E)
    x_t = jnp.take(emb, targets.T, axis=0).reshape(T_out * B, E)
    x_k = jnp.take(emb, targets_kws.T, axis=0).reshape(T_out * B, E)

    logp_flat, dec_state, word_state, sent_state = seq2seq_pallas(
        params, x_w, x_t, x_k, inputs_eos_idx)

    # Time-major (PyTorch nn.GRU default); batch-major view is a free transpose if needed.
    logp = logp_flat.reshape(T_out, B, V)
    return logp, dec_state, word_state, sent_state


# ---------------------------------------------------------------------------
# Main
# ---------------------------------------------------------------------------
if __name__ == "__main__":
    # Lane-dense small shapes: H=128, E=128 (2E=256), V=256, B=8 sublanes.
    VOCAB, EMB, HID = 256, 128, 128
    B, T_IN, T_OUT, S = 8, 8, 8, 2

    key = jax.random.PRNGKey(0)
    kp, k1, k2, k3 = jax.random.split(key, 4)
    params = init_seq2seq_params(kp, VOCAB, EMB, HID)

    inputs = jax.random.randint(k1, (B, T_IN), 0, VOCAB, dtype=jnp.int32)
    targets = jax.random.randint(k2, (B, T_OUT), 0, VOCAB, dtype=jnp.int32)
    targets_kws = jax.random.randint(k3, (B, T_OUT), 0, VOCAB, dtype=jnp.int32)
    inputs_eos_idx = jnp.tile(jnp.array([[3, T_IN - 1]], dtype=jnp.int32), (B, 1))   # (B, S)
    targets_eos_idx = jnp.tile(jnp.array([[4, T_OUT - 1]], dtype=jnp.int32), (B, 1))
    inputs_len = jnp.full((B,), T_IN, dtype=jnp.int32)
    targets_len = jnp.full((B,), T_OUT, dtype=jnp.int32)

    logp, dec_state, word_state, sent_state = seq2seq_forward(
        params, inputs, targets, inputs_eos_idx, targets_eos_idx,
        targets_kws, inputs_len, targets_len)
    jax.block_until_ready((logp, dec_state, word_state, sent_state))

    assert logp.shape == (T_OUT, B, VOCAB)
    assert dec_state.shape == (B, HID)
    assert word_state.shape == (B, HID)
    assert sent_state.shape == (B, HID)
    # rows of log_softmax should sum (in prob space) to ~1 and be finite
    assert jnp.allclose(jnp.sum(jnp.exp(logp), axis=-1), 1.0, atol=1e-4)
    assert jnp.all(jnp.isfinite(logp))
    assert jnp.all(jnp.isfinite(dec_state))
    print("KERNEL_OK")
</pallas_src>

<mosaic_0001>
module attributes {stable_mosaic.version = 11 : i64} {
  func.func @seq2seq_fwd_kernel(%arg0: memref<8x2xi32, #tpu.memory_space<smem>>, %arg1: memref<64x128xbf16, #tpu.memory_space<vmem>>, %arg2: memref<64x128xbf16, #tpu.memory_space<vmem>>, %arg3: memref<64x128xbf16, #tpu.memory_space<vmem>>, %arg4: memref<128x384xbf16, #tpu.memory_space<vmem>>, %arg5: memref<1x384xf32, #tpu.memory_space<vmem>>, %arg6: memref<128x384xbf16, #tpu.memory_space<vmem>>, %arg7: memref<1x128xf32, #tpu.memory_space<vmem>>, %arg8: memref<128x384xbf16, #tpu.memory_space<vmem>>, %arg9: memref<1x384xf32, #tpu.memory_space<vmem>>, %arg10: memref<128x384xbf16, #tpu.memory_space<vmem>>, %arg11: memref<1x128xf32, #tpu.memory_space<vmem>>, %arg12: memref<256x384xbf16, #tpu.memory_space<vmem>>, %arg13: memref<1x384xf32, #tpu.memory_space<vmem>>, %arg14: memref<128x384xbf16, #tpu.memory_space<vmem>>, %arg15: memref<1x128xf32, #tpu.memory_space<vmem>>, %arg16: memref<128x256xbf16, #tpu.memory_space<vmem>>, %arg17: memref<1x256xf32, #tpu.memory_space<vmem>>, %arg18: memref<64x256xf32, #tpu.memory_space<vmem>>, %arg19: memref<8x128xf32, #tpu.memory_space<vmem>>, %arg20: memref<8x128xf32, #tpu.memory_space<vmem>>, %arg21: memref<8x128xf32, #tpu.memory_space<vmem>>, %arg22: memref<64x384xf32, #tpu.memory_space<vmem>>, %arg23: memref<64x128xf32, #tpu.memory_space<vmem>>, %arg24: memref<64x384xf32, #tpu.memory_space<vmem>>, %arg25: memref<64x128xf32, #tpu.memory_space<vmem>>) attributes {dimension_semantics = [], scalar_prefetch = 0 : i64, scratch_operands = 4 : i64, tpu.core_type = #tpu.core_type<tc>} {
    %c0 = arith.constant 0 : index
    %c0_0 = arith.constant 0 : index
    %0 = vector.load %arg1[%c0, %c0_0] : memref<64x128xbf16, #tpu.memory_space<vmem>>, vector<64x128xbf16>
    %c0_1 = arith.constant 0 : index
    %c0_2 = arith.constant 0 : index
    %1 = vector.load %arg4[%c0_1, %c0_2] : memref<128x384xbf16, #tpu.memory_space<vmem>>, vector<128x384xbf16>
    %cst = arith.constant dense<0.000000e+00> : vector<64x384xf32>
    %2 = tpu.matmul %0, %1, %cst {dimension_numbers = #tpu.dot_dimension_numbers<[1], [0], [0], [1], [0, 0, 1, 1], [], []>} : vector<64x128xbf16>, vector<128x384xbf16>, vector<64x384xf32> -> vector<64x384xf32>
    %c0_3 = arith.constant 0 : index
    %c0_4 = arith.constant 0 : index
    %3 = vector.load %arg5[%c0_3, %c0_4] : memref<1x384xf32, #tpu.memory_space<vmem>>, vector<1x384xf32>
    %4 = vector.broadcast %3 : vector<1x384xf32> to vector<64x384xf32>
    %5 = arith.addf %2, %4 : vector<64x384xf32>
    %c0_5 = arith.constant 0 : index
    %c0_6 = arith.constant 0 : index
    %6 = vector.load %arg22[%c0_5, %c0_6] : memref<64x384xf32, #tpu.memory_space<vmem>>, vector<64x384xf32>
    tpu.vector_store %arg22[%c0_5, %c0_6], %5 {strides = array<i32>} : memref<64x384xf32, #tpu.memory_space<vmem>>, vector<64x384xf32>,
    %c0_7 = arith.constant 0 : index
    %c0_8 = arith.constant 0 : index
    %7 = vector.load %arg6[%c0_7, %c0_8] : memref<128x384xbf16, #tpu.memory_space<vmem>>, vector<128x384xbf16>
    %c0_9 = arith.constant 0 : index
    %c0_10 = arith.constant 0 : index
    %8 = vector.load %arg7[%c0_9, %c0_10] : memref<1x128xf32, #tpu.memory_space<vmem>>, vector<1x128xf32>
    %9 = vector.shape_cast %8 : vector<1x128xf32> to vector<1x128xf32>
    %10 = vector.broadcast %9 : vector<1x128xf32> to vector<8x128xf32>
    %cst_11 = arith.constant 0.000000e+00 : f32
    %11 = vector.broadcast %cst_11 : f32 to vector<8x128xf32>
    %c0_i32 = arith.constant 0 : i32
    %c8_i32 = arith.constant 8 : i32
    %12 = arith.muli %c0_i32, %c8_i32 : i32
    %13 = tpu.assume_multiple %12, 8 : i32
    %14 = arith.index_cast %13 : i32 to index
    %c0_12 = arith.constant 0 : index
    %15 = vector.load %arg22[%14, %c0_12] : memref<64x384xf32, #tpu.memory_space<vmem>>, vector<8x384xf32>
    %16 = arith.truncf %11 : vector<8x128xf32> to vector<8x128xbf16>
    %cst_13 = arith.constant dense<0.000000e+00> : vector<8x384xf32>
    %17 = tpu.matmul %16, %7, %cst_13 {dimension_numbers = #tpu.dot_dimension_numbers<[1], [0], [0], [1], [0, 0, 1, 1], [], []>} : vector<8x128xbf16>, vector<128x384xbf16>, vector<8x384xf32> -> vector<8x384xf32>
    %18 = vector.extract_strided_slice %15 {offsets = [0, 0], sizes = [8, 128], strides = [1, 1]} : vector<8x384xf32> to vector<8x128xf32>
    %19 = vector.extract_strided_slice %17 {offsets = [0, 0], sizes = [8, 128], strides = [1, 1]} : vector<8x384xf32> to vector<8x128xf32>
    %20 = arith.addf %18, %19 : vector<8x128xf32>
    %21 = arith.negf %20 : vector<8x128xf32>
    %22 = math.exp %21 : vector<8x128xf32>
    %cst_14 = arith.constant 1.000000e+00 : f32
    %23 = vector.broadcast %cst_14 : f32 to vector<8x128xf32>
    %24 = arith.addf %23, %22 : vector<8x128xf32>
    %25 = arith.divf %23, %24 : vector<8x128xf32>
    %26 = vector.extract_strided_slice %15 {offsets = [0, 128], sizes = [8, 128], strides = [1, 1]} : vector<8x384xf32> to vector<8x128xf32>
    %27 = vector.extract_strided_slice %17 {offsets = [0, 128], sizes = [8, 128], strides = [1, 1]} : vector<8x384xf32> to vector<8x128xf32>
    %28 = arith.addf %26, %27 : vector<8x128xf32>
    %29 = arith.negf %28 : vector<8x128xf32>
    %30 = math.exp %29 : vector<8x128xf32>
    %cst_15 = arith.constant 1.000000e+00 : f32
    %31 = vector.broadcast %cst_15 : f32 to vector<8x128xf32>
    %32 = arith.addf %31, %30 : vector<8x128xf32>
    %33 = arith.divf %31, %32 : vector<8x128xf32>
    %34 = vector.extract_strided_slice %15 {offsets = [0, 256], sizes = [8, 128], strides = [1, 1]} : vector<8x384xf32> to vector<8x128xf32>
    %35 = vector.extract_strided_slice %17 {offsets = [0, 256], sizes = [8, 128], strides = [1, 1]} : vector<8x384xf32> to vector<8x128xf32>
    %36 = arith.addf %35, %10 : vector<8x128xf32>
    %37 = arith.mulf %25, %36 : vector<8x128xf32>
    %38 = arith.addf %34, %37 : vector<8x128xf32>
    %39 = math.tanh %38 : vector<8x128xf32>
    %cst_16 = arith.constant 1.000000e+00 : f32
    %40 = vector.broadcast %cst_16 : f32 to vector<8x128xf32>
    %41 = arith.subf %40, %33 : vector<8x128xf32>
    %42 = arith.mulf %41, %39 : vector<8x128xf32>
    %43 = arith.mulf %33, %11 : vector<8x128xf32>
    %44 = arith.addf %42, %43 : vector<8x128xf32>
    %45 = arith.index_cast %13 : i32 to index
    %c0_17 = arith.constant 0 : index
    %46 = vector.load %arg23[%45, %c0_17] : memref<64x128xf32, #tpu.memory_space<vmem>>, vector<8x128xf32>
    tpu.vector_store %arg23[%45, %c0_17], %44 {strides = array<i32>} : memref<64x128xf32, #tpu.memory_space<vmem>>, vector<8x128xf32>,
    %c1_i32 = arith.constant 1 : i32
    %c8_i32_18 = arith.constant 8 : i32
    %47 = arith.muli %c1_i32, %c8_i32_18 : i32
    %48 = tpu.assume_multiple %47, 8 : i32
    %49 = arith.index_cast %48 : i32 to index
    %c0_19 = arith.constant 0 : index
    %50 = vector.load %arg22[%49, %c0_19] : memref<64x384xf32, #tpu.memory_space<vmem>>, vector<8x384xf32>
    %51 = arith.truncf %44 : vector<8x128xf32> to vector<8x128xbf16>
    %cst_20 = arith.constant dense<0.000000e+00> : vector<8x384xf32>
    %52 = tpu.matmul %51, %7, %cst_20 {dimension_numbers = #tpu.dot_dimension_numbers<[1], [0], [0], [1], [0, 0, 1, 1], [], []>} : vector<8x128xbf16>, vector<128x384xbf16>, vector<8x384xf32> -> vector<8x384xf32>
    %53 = vector.extract_strided_slice %50 {offsets = [0, 0], sizes = [8, 128], strides = [1, 1]} : vector<8x384xf32> to vector<8x128xf32>
    %54 = vector.extract_strided_slice %52 {offsets = [0, 0], sizes = [8, 128], strides = [1, 1]} : vector<8x384xf32> to vector<8x128xf32>
    %55 = arith.addf %53, %54 : vector<8x128xf32>
    %56 = arith.negf %55 : vector<8x128xf32>
    %57 = math.exp %56 : vector<8x128xf32>
    %cst_21 = arith.constant 1.000000e+00 : f32
    %58 = vector.broadcast %cst_21 : f32 to vector<8x128xf32>
    %59 = arith.addf %58, %57 : vector<8x128xf32>
    %60 = arith.divf %58, %59 : vector<8x128xf32>
    %61 = vector.extract_strided_slice %50 {offsets = [0, 128], sizes = [8, 128], strides = [1, 1]} : vector<8x384xf32> to vector<8x128xf32>
    %62 = vector.extract_strided_slice %52 {offsets = [0, 128], sizes = [8, 128], strides = [1, 1]} : vector<8x384xf32> to vector<8x128xf32>
    %63 = arith.addf %61, %62 : vector<8x128xf32>
    %64 = arith.negf %63 : vector<8x128xf32>
    %65 = math.exp %64 : vector<8x128xf32>
    %cst_22 = arith.constant 1.000000e+00 : f32
    %66 = vector.broadcast %cst_22 : f32 to vector<8x128xf32>
    %67 = arith.addf %66, %65 : vector<8x128xf32>
    %68 = arith.divf %66, %67 : vector<8x128xf32>
    %69 = vector.extract_strided_slice %50 {offsets = [0, 256], sizes = [8, 128], strides = [1, 1]} : vector<8x384xf32> to vector<8x128xf32>
    %70 = vector.extract_strided_slice %52 {offsets = [0, 256], sizes = [8, 128], strides = [1, 1]} : vector<8x384xf32> to vector<8x128xf32>
    %71 = arith.addf %70, %10 : vector<8x128xf32>
    %72 = arith.mulf %60, %71 : vector<8x128xf32>
    %73 = arith.addf %69, %72 : vector<8x128xf32>
    %74 = math.tanh %73 : vector<8x128xf32>
    %cst_23 = arith.constant 1.000000e+00 : f32
    %75 = vector.broadcast %cst_23 : f32 to vector<8x128xf32>
    %76 = arith.subf %75, %68 : vector<8x128xf32>
    %77 = arith.mulf %76, %74 : vector<8x128xf32>
    %78 = arith.mulf %68, %44 : vector<8x128xf32>
    %79 = arith.addf %77, %78 : vector<8x128xf32>
    %80 = arith.index_cast %48 : i32 to index
    %c0_24 = arith.constant 0 : index
    %81 = vector.load %arg23[%80, %c0_24] : memref<64x128xf32, #tpu.memory_space<vmem>>, vector<8x128xf32>
    tpu.vector_store %arg23[%80, %c0_24], %79 {strides = array<i32>} : memref<64x128xf32, #tpu.memory_space<vmem>>, vector<8x128xf32>,
    %c2_i32 = arith.constant 2 : i32
    %c8_i32_25 = arith.constant 8 : i32
    %82 = arith.muli %c2_i32, %c8_i32_25 : i32
    %83 = tpu.assume_multiple %82, 8 : i32
    %84 = arith.index_cast %83 : i32 to index
    %c0_26 = arith.constant 0 : index
    %85 = vector.load %arg22[%84, %c0_26] : memref<64x384xf32, #tpu.memory_space<vmem>>, vector<8x384xf32>
    %86 = arith.truncf %79 : vector<8x128xf32> to vector<8x128xbf16>
    %cst_27 = arith.constant dense<0.000000e+00> : vector<8x384xf32>
    %87 = tpu.matmul %86, %7, %cst_27 {dimension_numbers = #tpu.dot_dimension_numbers<[1], [0], [0], [1], [0, 0, 1, 1], [], []>} : vector<8x128xbf16>, vector<128x384xbf16>, vector<8x384xf32> -> vector<8x384xf32>
    %88 = vector.extract_strided_slice %85 {offsets = [0, 0], sizes = [8, 128], strides = [1, 1]} : vector<8x384xf32> to vector<8x128xf32>
    %89 = vector.extract_strided_slice %87 {offsets = [0, 0], sizes = [8, 128], strides = [1, 1]} : vector<8x384xf32> to vector<8x128xf32>
    %90 = arith.addf %88, %89 : vector<8x128xf32>
    %91 = arith.negf %90 : vector<8x128xf32>
    %92 = math.exp %91 : vector<8x128xf32>
    %cst_28 = arith.constant 1.000000e+00 : f32
    %93 = vector.broadcast %cst_28 : f32 to vector<8x128xf32>
    %94 = arith.addf %93, %92 : vector<8x128xf32>
    %95 = arith.divf %93, %94 : vector<8x128xf32>
    %96 = vector.extract_strided_slice %85 {offsets = [0, 128], sizes = [8, 128], strides = [1, 1]} : vector<8x384xf32> to vector<8x128xf32>
    %97 = vector.extract_strided_slice %87 {offsets = [0, 128], sizes = [8, 128], strides = [1, 1]} : vector<8x384xf32> to vector<8x128xf32>
    %98 = arith.addf %96, %97 : vector<8x128xf32>
    %99 = arith.negf %98 : vector<8x128xf32>
    %100 = math.exp %99 : vector<8x128xf32>
    %cst_29 = arith.constant 1.000000e+00 : f32
    %101 = vector.broadcast %cst_29 : f32 to vector<8x128xf32>
    %102 = arith.addf %101, %100 : vector<8x128xf32>
    %103 = arith.divf %101, %102 : vector<8x128xf32>
    %104 = vector.extract_strided_slice %85 {offsets = [0, 256], sizes = [8, 128], strides = [1, 1]} : vector<8x384xf32> to vector<8x128xf32>
    %105 = vector.extract_strided_slice %87 {offsets = [0, 256], sizes = [8, 128], strides = [1, 1]} : vector<8x384xf32> to vector<8x128xf32>
    %106 = arith.addf %105, %10 : vector<8x128xf32>
    %107 = arith.mulf %95, %106 : vector<8x128xf32>
    %108 = arith.addf %104, %107 : vector<8x128xf32>
    %109 = math.tanh %108 : vector<8x128xf32>
    %cst_30 = arith.constant 1.000000e+00 : f32
    %110 = vector.broadcast %cst_30 : f32 to vector<8x128xf32>
    %111 = arith.subf %110, %103 : vector<8x128xf32>
    %112 = arith.mulf %111, %109 : vector<8x128xf32>
    %113 = arith.mulf %103, %79 : vector<8x128xf32>
    %114 = arith.addf %112, %113 : vector<8x128xf32>
    %115 = arith.index_cast %83 : i32 to index
    %c0_31 = arith.constant 0 : index
    %116 = vector.load %arg23[%115, %c0_31] : memref<64x128xf32, #tpu.memory_space<vmem>>, vector<8x128xf32>
    tpu.vector_store %arg23[%115, %c0_31], %114 {strides = array<i32>} : memref<64x128xf32, #tpu.memory_space<vmem>>, vector<8x128xf32>,
    %c3_i32 = arith.constant 3 : i32
    %c8_i32_32 = arith.constant 8 : i32
    %117 = arith.muli %c3_i32, %c8_i32_32 : i32
    %118 = tpu.assume_multiple %117, 8 : i32
    %119 = arith.index_cast %118 : i32 to index
    %c0_33 = arith.constant 0 : index
    %120 = vector.load %arg22[%119, %c0_33] : memref<64x384xf32, #tpu.memory_space<vmem>>, vector<8x384xf32>
    %121 = arith.truncf %114 : vector<8x128xf32> to vector<8x128xbf16>
    %cst_34 = arith.constant dense<0.000000e+00> : vector<8x384xf32>
    %122 = tpu.matmul %121, %7, %cst_34 {dimension_numbers = #tpu.dot_dimension_numbers<[1], [0], [0], [1], [0, 0, 1, 1], [], []>} : vector<8x128xbf16>, vector<128x384xbf16>, vector<8x384xf32> -> vector<8x384xf32>
    %123 = vector.extract_strided_slice %120 {offsets = [0, 0], sizes = [8, 128], strides = [1, 1]} : vector<8x384xf32> to vector<8x128xf32>
    %124 = vector.extract_strided_slice %122 {offsets = [0, 0], sizes = [8, 128], strides = [1, 1]} : vector<8x384xf32> to vector<8x128xf32>
    %125 = arith.addf %123, %124 : vector<8x128xf32>
    %126 = arith.negf %125 : vector<8x128xf32>
    %127 = math.exp %126 : vector<8x128xf32>
    %cst_35 = arith.constant 1.000000e+00 : f32
    %128 = vector.broadcast %cst_35 : f32 to vector<8x128xf32>
    %129 = arith.addf %128, %127 : vector<8x128xf32>
    %130 = arith.divf %128, %129 : vector<8x128xf32>
    %131 = vector.extract_strided_slice %120 {offsets = [0, 128], sizes = [8, 128], strides = [1, 1]} : vector<8x384xf32> to vector<8x128xf32>
    %132 = vector.extract_strided_slice %122 {offsets = [0, 128], sizes = [8, 128], strides = [1, 1]} : vector<8x384xf32> to vector<8x128xf32>
    %133 = arith.addf %131, %132 : vector<8x128xf32>
    %134 = arith.negf %133 : vector<8x128xf32>
    %135 = math.exp %134 : vector<8x128xf32>
    %cst_36 = arith.constant 1.000000e+00 : f32
    %136 = vector.broadcast %cst_36 : f32 to vector<8x128xf32>
    %137 = arith.addf %136, %135 : vector<8x128xf32>
    %138 = arith.divf %136, %137 : vector<8x128xf32>
    %139 = vector.extract_strided_slice %120 {offsets = [0, 256], sizes = [8, 128], strides = [1, 1]} : vector<8x384xf32> to vector<8x128xf32>
    %140 = vector.extract_strided_slice %122 {offsets = [0, 256], sizes = [8, 128], strides = [1, 1]} : vector<8x384xf32> to vector<8x128xf32>
    %141 = arith.addf %140, %10 : vector<8x128xf32>
    %142 = arith.mulf %130, %141 : vector<8x128xf32>
    %143 = arith.addf %139, %142 : vector<8x128xf32>
    %144 = math.tanh %143 : vector<8x128xf32>
    %cst_37 = arith.constant 1.000000e+00 : f32
    %145 = vector.broadcast %cst_37 : f32 to vector<8x128xf32>
    %146 = arith.subf %145, %138 : vector<8x128xf32>
    %147 = arith.mulf %146, %144 : vector<8x128xf32>
    %148 = arith.mulf %138, %114 : vector<8x128xf32>
    %149 = arith.addf %147, %148 : vector<8x128xf32>
    %150 = arith.index_cast %118 : i32 to index
    %c0_38 = arith.constant 0 : index
    %151 = vector.load %arg23[%150, %c0_38] : memref<64x128xf32, #tpu.memory_space<vmem>>, vector<8x128xf32>
    tpu.vector_store %arg23[%150, %c0_38], %149 {strides = array<i32>} : memref<64x128xf32, #tpu.memory_space<vmem>>, vector<8x128xf32>,
    %c4_i32 = arith.constant 4 : i32
    %c8_i32_39 = arith.constant 8 : i32
    %152 = arith.muli %c4_i32, %c8_i32_39 : i32
    %153 = tpu.assume_multiple %152, 8 : i32
    %154 = arith.index_cast %153 : i32 to index
    %c0_40 = arith.constant 0 : index
    %155 = vector.load %arg22[%154, %c0_40] : memref<64x384xf32, #tpu.memory_space<vmem>>, vector<8x384xf32>
    %156 = arith.truncf %149 : vector<8x128xf32> to vector<8x128xbf16>
    %cst_41 = arith.constant dense<0.000000e+00> : vector<8x384xf32>
    %157 = tpu.matmul %156, %7, %cst_41 {dimension_numbers = #tpu.dot_dimension_numbers<[1], [0], [0], [1], [0, 0, 1, 1], [], []>} : vector<8x128xbf16>, vector<128x384xbf16>, vector<8x384xf32> -> vector<8x384xf32>
    %158 = vector.extract_strided_slice %155 {offsets = [0, 0], sizes = [8, 128], strides = [1, 1]} : vector<8x384xf32> to vector<8x128xf32>
    %159 = vector.extract_strided_slice %157 {offsets = [0, 0], sizes = [8, 128], strides = [1, 1]} : vector<8x384xf32> to vector<8x128xf32>
    %160 = arith.addf %158, %159 : vector<8x128xf32>
    %161 = arith.negf %160 : vector<8x128xf32>
    %162 = math.exp %161 : vector<8x128xf32>
    %cst_42 = arith.constant 1.000000e+00 : f32
    %163 = vector.broadcast %cst_42 : f32 to vector<8x128xf32>
    %164 = arith.addf %163, %162 : vector<8x128xf32>
    %165 = arith.divf %163, %164 : vector<8x128xf32>
    %166 = vector.extract_strided_slice %155 {offsets = [0, 128], sizes = [8, 128], strides = [1, 1]} : vector<8x384xf32> to vector<8x128xf32>
    %167 = vector.extract_strided_slice %157 {offsets = [0, 128], sizes = [8, 128], strides = [1, 1]} : vector<8x384xf32> to vector<8x128xf32>
    %168 = arith.addf %166, %167 : vector<8x128xf32>
    %169 = arith.negf %168 : vector<8x128xf32>
    %170 = math.exp %169 : vector<8x128xf32>
    %cst_43 = arith.constant 1.000000e+00 : f32
    %171 = vector.broadcast %cst_43 : f32 to vector<8x128xf32>
    %172 = arith.addf %171, %170 : vector<8x128xf32>
    %173 = arith.divf %171, %172 : vector<8x128xf32>
    %174 = vector.extract_strided_slice %155 {offsets = [0, 256], sizes = [8, 128], strides = [1, 1]} : vector<8x384xf32> to vector<8x128xf32>
    %175 = vector.extract_strided_slice %157 {offsets = [0, 256], sizes = [8, 128], strides = [1, 1]} : vector<8x384xf32> to vector<8x128xf32>
    %176 = arith.addf %175, %10 : vector<8x128xf32>
    %177 = arith.mulf %165, %176 : vector<8x128xf32>
    %178 = arith.addf %174, %177 : vector<8x128xf32>
    %179 = math.tanh %178 : vector<8x128xf32>
    %cst_44 = arith.constant 1.000000e+00 : f32
    %180 = vector.broadcast %cst_44 : f32 to vector<8x128xf32>
    %181 = arith.subf %180, %173 : vector<8x128xf32>
    %182 = arith.mulf %181, %179 : vector<8x128xf32>
    %183 = arith.mulf %173, %149 : vector<8x128xf32>
    %184 = arith.addf %182, %183 : vector<8x128xf32>
    %185 = arith.index_cast %153 : i32 to index
    %c0_45 = arith.constant 0 : index
    %186 = vector.load %arg23[%185, %c0_45] : memref<64x128xf32, #tpu.memory_space<vmem>>, vector<8x128xf32>
    tpu.vector_store %arg23[%185, %c0_45], %184 {strides = array<i32>} : memref<64x128xf32, #tpu.memory_space<vmem>>, vector<8x128xf32>,
    %c5_i32 = arith.constant 5 : i32
    %c8_i32_46 = arith.constant 8 : i32
    %187 = arith.muli %c5_i32, %c8_i32_46 : i32
    %188 = tpu.assume_multiple %187, 8 : i32
    %189 = arith.index_cast %188 : i32 to index
    %c0_47 = arith.constant 0 : index
    %190 = vector.load %arg22[%189, %c0_47] : memref<64x384xf32, #tpu.memory_space<vmem>>, vector<8x384xf32>
    %191 = arith.truncf %184 : vector<8x128xf32> to vector<8x128xbf16>
    %cst_48 = arith.constant dense<0.000000e+00> : vector<8x384xf32>
    %192 = tpu.matmul %191, %7, %cst_48 {dimension_numbers = #tpu.dot_dimension_numbers<[1], [0], [0], [1], [0, 0, 1, 1], [], []>} : vector<8x128xbf16>, vector<128x384xbf16>, vector<8x384xf32> -> vector<8x384xf32>
    %193 = vector.extract_strided_slice %190 {offsets = [0, 0], sizes = [8, 128], strides = [1, 1]} : vector<8x384xf32> to vector<8x128xf32>
    %194 = vector.extract_strided_slice %192 {offsets = [0, 0], sizes = [8, 128], strides = [1, 1]} : vector<8x384xf32> to vector<8x128xf32>
    %195 = arith.addf %193, %194 : vector<8x128xf32>
    %196 = arith.negf %195 : vector<8x128xf32>
    %197 = math.exp %196 : vector<8x128xf32>
    %cst_49 = arith.constant 1.000000e+00 : f32
    %198 = vector.broadcast %cst_49 : f32 to vector<8x128xf32>
    %199 = arith.addf %198, %197 : vector<8x128xf32>
    %200 = arith.divf %198, %199 : vector<8x128xf32>
    %201 = vector.extract_strided_slice %190 {offsets = [0, 128], sizes = [8, 128], strides = [1, 1]} : vector<8x384xf32> to vector<8x128xf32>
    %202 = vector.extract_strided_slice %192 {offsets = [0, 128], sizes = [8, 128], strides = [1, 1]} : vector<8x384xf32> to vector<8x128xf32>
    %203 = arith.addf %201, %202 : vector<8x128xf32>
    %204 = arith.negf %203 : vector<8x128xf32>
    %205 = math.exp %204 : vector<8x128xf32>
    %cst_50 = arith.constant 1.000000e+00 : f32
    %206 = vector.broadcast %cst_50 : f32 to vector<8x128xf32>
    %207 = arith.addf %206, %205 : vector<8x128xf32>
    %208 = arith.divf %206, %207 : vector<8x128xf32>
    %209 = vector.extract_strided_slice %190 {offsets = [0, 256], sizes = [8, 128], strides = [1, 1]} : vector<8x384xf32> to vector<8x128xf32>
    %210 = vector.extract_strided_slice %192 {offsets = [0, 256], sizes = [8, 128], strides = [1, 1]} : vector<8x384xf32> to vector<8x128xf32>
    %211 = arith.addf %210, %10 : vector<8x128xf32>
    %212 = arith.mulf %200, %211 : vector<8x128xf32>
    %213 = arith.addf %209, %212 : vector<8x128xf32>
    %214 = math.tanh %213 : vector<8x128xf32>
    %cst_51 = arith.constant 1.000000e+00 : f32
    %215 = vector.broadcast %cst_51 : f32 to vector<8x128xf32>
    %216 = arith.subf %215, %208 : vector<8x128xf32>
    %217 = arith.mulf %216, %214 : vector<8x128xf32>
    %218 = arith.mulf %208, %184 : vector<8x128xf32>
    %219 = arith.addf %217, %218 : vector<8x128xf32>
    %220 = arith.index_cast %188 : i32 to index
    %c0_52 = arith.constant 0 : index
    %221 = vector.load %arg23[%220, %c0_52] : memref<64x128xf32, #tpu.memory_space<vmem>>, vector<8x128xf32>
    tpu.vector_store %arg23[%220, %c0_52], %219 {strides = array<i32>} : memref<64x128xf32, #tpu.memory_space<vmem>>, vector<8x128xf32>,
    %c6_i32 = arith.constant 6 : i32
    %c8_i32_53 = arith.constant 8 : i32
    %222 = arith.muli %c6_i32, %c8_i32_53 : i32
    %223 = tpu.assume_multiple %222, 8 : i32
    %224 = arith.index_cast %223 : i32 to index
    %c0_54 = arith.constant 0 : index
    %225 = vector.load %arg22[%224, %c0_54] : memref<64x384xf32, #tpu.memory_space<vmem>>, vector<8x384xf32>
    %226 = arith.truncf %219 : vector<8x128xf32> to vector<8x128xbf16>
    %cst_55 = arith.constant dense<0.000000e+00> : vector<8x384xf32>
    %227 = tpu.matmul %226, %7, %cst_55 {dimension_numbers = #tpu.dot_dimension_numbers<[1], [0], [0], [1], [0, 0, 1, 1], [], []>} : vector<8x128xbf16>, vector<128x384xbf16>, vector<8x384xf32> -> vector<8x384xf32>
    %228 = vector.extract_strided_slice %225 {offsets = [0, 0], sizes = [8, 128], strides = [1, 1]} : vector<8x384xf32> to vector<8x128xf32>
    %229 = vector.extract_strided_slice %227 {offsets = [0, 0], sizes = [8, 128], strides = [1, 1]} : vector<8x384xf32> to vector<8x128xf32>
    %230 = arith.addf %228, %229 : vector<8x128xf32>
    %231 = arith.negf %230 : vector<8x128xf32>
    %232 = math.exp %231 : vector<8x128xf32>
    %cst_56 = arith.constant 1.000000e+00 : f32
    %233 = vector.broadcast %cst_56 : f32 to vector<8x128xf32>
    %234 = arith.addf %233, %232 : vector<8x128xf32>
    %235 = arith.divf %233, %234 : vector<8x128xf32>
    %236 = vector.extract_strided_slice %225 {offsets = [0, 128], sizes = [8, 128], strides = [1, 1]} : vector<8x384xf32> to vector<8x128xf32>
    %237 = vector.extract_strided_slice %227 {offsets = [0, 128], sizes = [8, 128], strides = [1, 1]} : vector<8x384xf32> to vector<8x128xf32>
    %238 = arith.addf %236, %237 : vector<8x128xf32>
    %239 = arith.negf %238 : vector<8x128xf32>
    %240 = math.exp %239 : vector<8x128xf32>
    %cst_57 = arith.constant 1.000000e+00 : f32
    %241 = vector.broadcast %cst_57 : f32 to vector<8x128xf32>
    %242 = arith.addf %241, %240 : vector<8x128xf32>
    %243 = arith.divf %241, %242 : vector<8x128xf32>
    %244 = vector.extract_strided_slice %225 {offsets = [0, 256], sizes = [8, 128], strides = [1, 1]} : vector<8x384xf32> to vector<8x128xf32>
    %245 = vector.extract_strided_slice %227 {offsets = [0, 256], sizes = [8, 128], strides = [1, 1]} : vector<8x384xf32> to vector<8x128xf32>
    %246 = arith.addf %245, %10 : vector<8x128xf32>
    %247 = arith.mulf %235, %246 : vector<8x128xf32>
    %248 = arith.addf %244, %247 : vector<8x128xf32>
    %249 = math.tanh %248 : vector<8x128xf32>
    %cst_58 = arith.constant 1.000000e+00 : f32
    %250 = vector.broadcast %cst_58 : f32 to vector<8x128xf32>
    %251 = arith.subf %250, %243 : vector<8x128xf32>
    %252 = arith.mulf %251, %249 : vector<8x128xf32>
    %253 = arith.mulf %243, %219 : vector<8x128xf32>
    %254 = arith.addf %252, %253 : vector<8x128xf32>
    %255 = arith.index_cast %223 : i32 to index
    %c0_59 = arith.constant 0 : index
    %256 = vector.load %arg23[%255, %c0_59] : memref<64x128xf32, #tpu.memory_space<vmem>>, vector<8x128xf32>
    tpu.vector_store %arg23[%255, %c0_59], %254 {strides = array<i32>} : memref<64x128xf32, #tpu.memory_space<vmem>>, vector<8x128xf32>,
    %c7_i32 = arith.constant 7 : i32
    %c8_i32_60 = arith.constant 8 : i32
    %257 = arith.muli %c7_i32, %c8_i32_60 : i32
    %258 = tpu.assume_multiple %257, 8 : i32
    %259 = arith.index_cast %258 : i32 to index
    %c0_61 = arith.constant 0 : index
    %260 = vector.load %arg22[%259, %c0_61] : memref<64x384xf32, #tpu.memory_space<vmem>>, vector<8x384xf32>
    %261 = arith.truncf %254 : vector<8x128xf32> to vector<8x128xbf16>
    %cst_62 = arith.constant dense<0.000000e+00> : vector<8x384xf32>
    %262 = tpu.matmul %261, %7, %cst_62 {dimension_numbers = #tpu.dot_dimension_numbers<[1], [0], [0], [1], [0, 0, 1, 1], [], []>} : vector<8x128xbf16>, vector<128x384xbf16>, vector<8x384xf32> -> vector<8x384xf32>
    %263 = vector.extract_strided_slice %260 {offsets = [0, 0], sizes = [8, 128], strides = [1, 1]} : vector<8x384xf32> to vector<8x128xf32>
    %264 = vector.extract_strided_slice %262 {offsets = [0, 0], sizes = [8, 128], strides = [1, 1]} : vector<8x384xf32> to vector<8x128xf32>
    %265 = arith.addf %263, %264 : vector<8x128xf32>
    %266 = arith.negf %265 : vector<8x128xf32>
    %267 = math.exp %266 : vector<8x128xf32>
    %cst_63 = arith.constant 1.000000e+00 : f32
    %268 = vector.broadcast %cst_63 : f32 to vector<8x128xf32>
    %269 = arith.addf %268, %267 : vector<8x128xf32>
    %270 = arith.divf %268, %269 : vector<8x128xf32>
    %271 = vector.extract_strided_slice %260 {offsets = [0, 128], sizes = [8, 128], strides = [1, 1]} : vector<8x384xf32> to vector<8x128xf32>
    %272 = vector.extract_strided_slice %262 {offsets = [0, 128], sizes = [8, 128], strides = [1, 1]} : vector<8x384xf32> to vector<8x128xf32>
    %273 = arith.addf %271, %272 : vector<8x128xf32>
    %274 = arith.negf %273 : vector<8x128xf32>
    %275 = math.exp %274 : vector<8x128xf32>
    %cst_64 = arith.constant 1.000000e+00 : f32
    %276 = vector.broadcast %cst_64 : f32 to vector<8x128xf32>
    %277 = arith.addf %276, %275 : vector<8x128xf32>
    %278 = arith.divf %276, %277 : vector<8x128xf32>
    %279 = vector.extract_strided_slice %260 {offsets = [0, 256], sizes = [8, 128], strides = [1, 1]} : vector<8x384xf32> to vector<8x128xf32>
    %280 = vector.extract_strided_slice %262 {offsets = [0, 256], sizes = [8, 128], strides = [1, 1]} : vector<8x384xf32> to vector<8x128xf32>
    %281 = arith.addf %280, %10 : vector<8x128xf32>
    %282 = arith.mulf %270, %281 : vector<8x128xf32>
    %283 = arith.addf %279, %282 : vector<8x128xf32>
    %284 = math.tanh %283 : vector<8x128xf32>
    %cst_65 = arith.constant 1.000000e+00 : f32
    %285 = vector.broadcast %cst_65 : f32 to vector<8x128xf32>
    %286 = arith.subf %285, %278 : vector<8x128xf32>
    %287 = arith.mulf %286, %284 : vector<8x128xf32>
    %288 = arith.mulf %278, %254 : vector<8x128xf32>
    %289 = arith.addf %287, %288 : vector<8x128xf32>
    %290 = arith.index_cast %258 : i32 to index
    %c0_66 = arith.constant 0 : index
    %291 = vector.load %arg23[%290, %c0_66] : memref<64x128xf32, #tpu.memory_space<vmem>>, vector<8x128xf32>
    tpu.vector_store %arg23[%290, %c0_66], %289 {strides = array<i32>} : memref<64x128xf32, #tpu.memory_space<vmem>>, vector<8x128xf32>,
    %c8_i32_67 = arith.constant 8 : i32
    %c0_68 = arith.constant 0 : index
    %c0_69 = arith.constant 0 : index
    %292 = vector.load %arg20[%c0_68, %c0_69] : memref<8x128xf32, #tpu.memory_space<vmem>>, vector<8x128xf32>
    tpu.vector_store %arg20[%c0_68, %c0_69], %289 {strides = array<i32>} : memref<8x128xf32, #tpu.memory_space<vmem>>, vector<8x128xf32>,
    %c0_70 = arith.constant 0 : index
    %c0_71 = arith.constant 0 : index
    %293 = vector.load %arg8[%c0_70, %c0_71] : memref<128x384xbf16, #tpu.memory_space<vmem>>, vector<128x384xbf16>
    %c0_72 = arith.constant 0 : index
    %c0_73 = arith.constant 0 : index
    %294 = vector.load %arg9[%c0_72, %c0_73] : memref<1x384xf32, #tpu.memory_space<vmem>>, vector<1x384xf32>
    %c0_74 = arith.constant 0 : index
    %c0_75 = arith.constant 0 : index
    %295 = vector.load %arg10[%c0_74, %c0_75] : memref<128x384xbf16, #tpu.memory_space<vmem>>, vector<128x384xbf16>
    %c0_76 = arith.constant 0 : index
    %c0_77 = arith.constant 0 : index
    %296 = vector.load %arg11[%c0_76, %c0_77] : memref<1x128xf32, #tpu.memory_space<vmem>>, vector<1x128xf32>
    %297 = vector.shape_cast %296 : vector<1x128xf32> to vector<1x128xf32>
    %298 = vector.broadcast %297 : vector<1x128xf32> to vector<8x128xf32>
    %299 = tpu.iota {dimensions = array<i32: 0>} : vector<8x128xi32>
    %cst_78 = arith.constant 0.000000e+00 : f32
    %300 = vector.broadcast %cst_78 : f32 to vector<8x128xf32>
    %cst_79 = arith.constant 0.000000e+00 : f32
    %301 = vector.broadcast %cst_79 : f32 to vector<8x128xf32>
    %c0_80 = arith.constant 0 : index
    %c0_81 = arith.constant 0 : index
    %302 = memref.load %arg0[%c0_80, %c0_81] : memref<8x2xi32, #tpu.memory_space<smem>>
    %c8_i32_82 = arith.constant 8 : i32
    %303 = arith.muli %302, %c8_i32_82 : i32
    %304 = tpu.assume_multiple %303, 8 : i32
    %305 = arith.index_cast %304 : i32 to index
    %c0_83 = arith.constant 0 : index
    %306 = vector.load %arg23[%305, %c0_83] : memref<64x128xf32, #tpu.memory_space<vmem>>, vector<8x128xf32>
    %c0_i32_84 = arith.constant 0 : i32
    %307 = vector.broadcast %c0_i32_84 : i32 to vector<8x128xi32>
    %308 = arith.cmpi eq, %299, %307 : vector<8x128xi32>
    %309 = arith.select %308, %306, %301 : vector<8x128xi1>, vector<8x128xf32>
    %c1 = arith.constant 1 : index
    %c0_85 = arith.constant 0 : index
    %310 = memref.load %arg0[%c1, %c0_85] : memref<8x2xi32, #tpu.memory_space<smem>>
    %c8_i32_86 = arith.constant 8 : i32
    %311 = arith.muli %310, %c8_i32_86 : i32
    %312 = tpu.assume_multiple %311, 8 : i32
    %313 = arith.index_cast %312 : i32 to index
    %c0_87 = arith.constant 0 : index
    %314 = vector.load %arg23[%313, %c0_87] : memref<64x128xf32, #tpu.memory_space<vmem>>, vector<8x128xf32>
    %c1_i32_88 = arith.constant 1 : i32
    %315 = vector.broadcast %c1_i32_88 : i32 to vector<8x128xi32>
    %316 = arith.cmpi eq, %299, %315 : vector<8x128xi32>
    %317 = arith.select %316, %314, %309 : vector<8x128xi1>, vector<8x128xf32>
    %c2 = arith.constant 2 : index
    %c0_89 = arith.constant 0 : index
    %318 = memref.load %arg0[%c2, %c0_89] : memref<8x2xi32, #tpu.memory_space<smem>>
    %c8_i32_90 = arith.constant 8 : i32
    %319 = arith.muli %318, %c8_i32_90 : i32
    %320 = tpu.assume_multiple %319, 8 : i32
    %321 = arith.index_cast %320 : i32 to index
    %c0_91 = arith.constant 0 : index
    %322 = vector.load %arg23[%321, %c0_91] : memref<64x128xf32, #tpu.memory_space<vmem>>, vector<8x128xf32>
    %c2_i32_92 = arith.constant 2 : i32
    %323 = vector.broadcast %c2_i32_92 : i32 to vector<8x128xi32>
    %324 = arith.cmpi eq, %299, %323 : vector<8x128xi32>
    %325 = arith.select %324, %322, %317 : vector<8x128xi1>, vector<8x128xf32>
    %c3 = arith.constant 3 : index
    %c0_93 = arith.constant 0 : index
    %326 = memref.load %arg0[%c3, %c0_93] : memref<8x2xi32, #tpu.memory_space<smem>>
    %c8_i32_94 = arith.constant 8 : i32
    %327 = arith.muli %326, %c8_i32_94 : i32
    %328 = tpu.assume_multiple %327, 8 : i32
    %329 = arith.index_cast %328 : i32 to index
    %c0_95 = arith.constant 0 : index
    %330 = vector.load %arg23[%329, %c0_95] : memref<64x128xf32, #tpu.memory_space<vmem>>, vector<8x128xf32>
    %c3_i32_96 = arith.constant 3 : i32
    %331 = vector.broadcast %c3_i32_96 : i32 to vector<8x128xi32>
    %332 = arith.cmpi eq, %299, %331 : vector<8x128xi32>
    %333 = arith.select %332, %330, %325 : vector<8x128xi1>, vector<8x128xf32>
    %c4 = arith.constant 4 : index
    %c0_97 = arith.constant 0 : index
    %334 = memref.load %arg0[%c4, %c0_97] : memref<8x2xi32, #tpu.memory_space<smem>>
    %c8_i32_98 = arith.constant 8 : i32
    %335 = arith.muli %334, %c8_i32_98 : i32
    %336 = tpu.assume_multiple %335, 8 : i32
    %337 = arith.index_cast %336 : i32 to index
    %c0_99 = arith.constant 0 : index
    %338 = vector.load %arg23[%337, %c0_99] : memref<64x128xf32, #tpu.memory_space<vmem>>, vector<8x128xf32>
    %c4_i32_100 = arith.constant 4 : i32
    %339 = vector.broadcast %c4_i32_100 : i32 to vector<8x128xi32>
    %340 = arith.cmpi eq, %299, %339 : vector<8x128xi32>
    %341 = arith.select %340, %338, %333 : vector<8x128xi1>, vector<8x128xf32>
    %c5 = arith.constant 5 : index
    %c0_101 = arith.constant 0 : index
    %342 = memref.load %arg0[%c5, %c0_101] : memref<8x2xi32, #tpu.memory_space<smem>>
    %c8_i32_102 = arith.constant 8 : i32
    %343 = arith.muli %342, %c8_i32_102 : i32
    %344 = tpu.assume_multiple %343, 8 : i32
    %345 = arith.index_cast %344 : i32 to index
    %c0_103 = arith.constant 0 : index
    %346 = vector.load %arg23[%345, %c0_103] : memref<64x128xf32, #tpu.memory_space<vmem>>, vector<8x128xf32>
    %c5_i32_104 = arith.constant 5 : i32
    %347 = vector.broadcast %c5_i32_104 : i32 to vector<8x128xi32>
    %348 = arith.cmpi eq, %299, %347 : vector<8x128xi32>
    %349 = arith.select %348, %346, %341 : vector<8x128xi1>, vector<8x128xf32>
    %c6 = arith.constant 6 : index
    %c0_105 = arith.constant 0 : index
    %350 = memref.load %arg0[%c6, %c0_105] : memref<8x2xi32, #tpu.memory_space<smem>>
    %c8_i32_106 = arith.constant 8 : i32
    %351 = arith.muli %350, %c8_i32_106 : i32
    %352 = tpu.assume_multiple %351, 8 : i32
    %353 = arith.index_cast %352 : i32 to index
    %c0_107 = arith.constant 0 : index
    %354 = vector.load %arg23[%353, %c0_107] : memref<64x128xf32, #tpu.memory_space<vmem>>, vector<8x128xf32>
    %c6_i32_108 = arith.constant 6 : i32
    %355 = vector.broadcast %c6_i32_108 : i32 to vector<8x128xi32>
    %356 = arith.cmpi eq, %299, %355 : vector<8x128xi32>
    %357 = arith.select %356, %354, %349 : vector<8x128xi1>, vector<8x128xf32>
    %c7 = arith.constant 7 : index
    %c0_109 = arith.constant 0 : index
    %358 = memref.load %arg0[%c7, %c0_109] : memref<8x2xi32, #tpu.memory_space<smem>>
    %c8_i32_110 = arith.constant 8 : i32
    %359 = arith.muli %358, %c8_i32_110 : i32
    %360 = tpu.assume_multiple %359, 8 : i32
    %361 = arith.index_cast %360 : i32 to index
    %c0_111 = arith.constant 0 : index
    %362 = vector.load %arg23[%361, %c0_111] : memref<64x128xf32, #tpu.memory_space<vmem>>, vector<8x128xf32>
    %c7_i32_112 = arith.constant 7 : i32
    %363 = vector.broadcast %c7_i32_112 : i32 to vector<8x128xi32>
    %364 = arith.cmpi eq, %299, %363 : vector<8x128xi32>
    %365 = arith.select %364, %362, %357 : vector<8x128xi1>, vector<8x128xf32>
    %366 = arith.truncf %365 : vector<8x128xf32> to vector<8x128xbf16>
    %cst_113 = arith.constant dense<0.000000e+00> : vector<8x384xf32>
    %367 = tpu.matmul %366, %293, %cst_113 {dimension_numbers = #tpu.dot_dimension_numbers<[1], [0], [0], [1], [0, 0, 1, 1], [], []>} : vector<8x128xbf16>, vector<128x384xbf16>, vector<8x384xf32> -> vector<8x384xf32>
    %368 = vector.broadcast %294 : vector<1x384xf32> to vector<8x384xf32>
    %369 = arith.addf %367, %368 : vector<8x384xf32>
    %370 = arith.truncf %300 : vector<8x128xf32> to vector<8x128xbf16>
    %cst_114 = arith.constant dense<0.000000e+00> : vector<8x384xf32>
    %371 = tpu.matmul %370, %295, %cst_114 {dimension_numbers = #tpu.dot_dimension_numbers<[1], [0], [0], [1], [0, 0, 1, 1], [], []>} : vector<8x128xbf16>, vector<128x384xbf16>, vector<8x384xf32> -> vector<8x384xf32>
    %372 = vector.extract_strided_slice %369 {offsets = [0, 0], sizes = [8, 128], strides = [1, 1]} : vector<8x384xf32> to vector<8x128xf32>
    %373 = vector.extract_strided_slice %371 {offsets = [0, 0], sizes = [8, 128], strides = [1, 1]} : vector<8x384xf32> to vector<8x128xf32>
    %374 = arith.addf %372, %373 : vector<8x128xf32>
    %375 = arith.negf %374 : vector<8x128xf32>
    %376 = math.exp %375 : vector<8x128xf32>
    %cst_115 = arith.constant 1.000000e+00 : f32
    %377 = vector.broadcast %cst_115 : f32 to vector<8x128xf32>
    %378 = arith.addf %377, %376 : vector<8x128xf32>
    %379 = arith.divf %377, %378 : vector<8x128xf32>
    %380 = vector.extract_strided_slice %369 {offsets = [0, 128], sizes = [8, 128], strides = [1, 1]} : vector<8x384xf32> to vector<8x128xf32>
    %381 = vector.extract_strided_slice %371 {offsets = [0, 128], sizes = [8, 128], strides = [1, 1]} : vector<8x384xf32> to vector<8x128xf32>
    %382 = arith.addf %380, %381 : vector<8x128xf32>
    %383 = arith.negf %382 : vector<8x128xf32>
    %384 = math.exp %383 : vector<8x128xf32>
    %cst_116 = arith.constant 1.000000e+00 : f32
    %385 = vector.broadcast %cst_116 : f32 to vector<8x128xf32>
    %386 = arith.addf %385, %384 : vector<8x128xf32>
    %387 = arith.divf %385, %386 : vector<8x128xf32>
    %388 = vector.extract_strided_slice %369 {offsets = [0, 256], sizes = [8, 128], strides = [1, 1]} : vector<8x384xf32> to vector<8x128xf32>
    %389 = vector.extract_strided_slice %371 {offsets = [0, 256], sizes = [8, 128], strides = [1, 1]} : vector<8x384xf32> to vector<8x128xf32>
    %390 = arith.addf %389, %298 : vector<8x128xf32>
    %391 = arith.mulf %379, %390 : vector<8x128xf32>
    %392 = arith.addf %388, %391 : vector<8x128xf32>
    %393 = math.tanh %392 : vector<8x128xf32>
    %cst_117 = arith.constant 1.000000e+00 : f32
    %394 = vector.broadcast %cst_117 : f32 to vector<8x128xf32>
    %395 = arith.subf %394, %387 : vector<8x128xf32>
    %396 = arith.mulf %395, %393 : vector<8x128xf32>
    %397 = arith.mulf %387, %300 : vector<8x128xf32>
    %398 = arith.addf %396, %397 : vector<8x128xf32>
    %cst_118 = arith.constant 0.000000e+00 : f32
    %399 = vector.broadcast %cst_118 : f32 to vector<8x128xf32>
    %c0_119 = arith.constant 0 : index
    %c1_120 = arith.constant 1 : index
    %400 = memref.load %arg0[%c0_119, %c1_120] : memref<8x2xi32, #tpu.memory_space<smem>>
    %c8_i32_121 = arith.constant 8 : i32
    %401 = arith.muli %400, %c8_i32_121 : i32
    %402 = tpu.assume_multiple %401, 8 : i32
    %403 = arith.index_cast %402 : i32 to index
    %c0_122 = arith.constant 0 : index
    %404 = vector.load %arg23[%403, %c0_122] : memref<64x128xf32, #tpu.memory_space<vmem>>, vector<8x128xf32>
    %c0_i32_123 = arith.constant 0 : i32
    %405 = vector.broadcast %c0_i32_123 : i32 to vector<8x128xi32>
    %406 = arith.cmpi eq, %299, %405 : vector<8x128xi32>
    %407 = arith.select %406, %404, %399 : vector<8x128xi1>, vector<8x128xf32>
    %c1_124 = arith.constant 1 : index
    %c1_125 = arith.constant 1 : index
    %408 = memref.load %arg0[%c1_124, %c1_125] : memref<8x2xi32, #tpu.memory_space<smem>>
    %c8_i32_126 = arith.constant 8 : i32
    %409 = arith.muli %408, %c8_i32_126 : i32
    %410 = tpu.assume_multiple %409, 8 : i32
    %411 = arith.index_cast %410 : i32 to index
    %c0_127 = arith.constant 0 : index
    %412 = vector.load %arg23[%411, %c0_127] : memref<64x128xf32, #tpu.memory_space<vmem>>, vector<8x128xf32>
    %c1_i32_128 = arith.constant 1 : i32
    %413 = vector.broadcast %c1_i32_128 : i32 to vector<8x128xi32>
    %414 = arith.cmpi eq, %299, %413 : vector<8x128xi32>
    %415 = arith.select %414, %412, %407 : vector<8x128xi1>, vector<8x128xf32>
    %c2_129 = arith.constant 2 : index
    %c1_130 = arith.constant 1 : index
    %416 = memref.load %arg0[%c2_129, %c1_130] : memref<8x2xi32, #tpu.memory_space<smem>>
    %c8_i32_131 = arith.constant 8 : i32
    %417 = arith.muli %416, %c8_i32_131 : i32
    %418 = tpu.assume_multiple %417, 8 : i32
    %419 = arith.index_cast %418 : i32 to index
    %c0_132 = arith.constant 0 : index
    %420 = vector.load %arg23[%419, %c0_132] : memref<64x128xf32, #tpu.memory_space<vmem>>, vector<8x128xf32>
    %c2_i32_133 = arith.constant 2 : i32
    %421 = vector.broadcast %c2_i32_133 : i32 to vector<8x128xi32>
    %422 = arith.cmpi eq, %299, %421 : vector<8x128xi32>
    %423 = arith.select %422, %420, %415 : vector<8x128xi1>, vector<8x128xf32>
    %c3_134 = arith.constant 3 : index
    %c1_135 = arith.constant 1 : index
    %424 = memref.load %arg0[%c3_134, %c1_135] : memref<8x2xi32, #tpu.memory_space<smem>>
    %c8_i32_136 = arith.constant 8 : i32
    %425 = arith.muli %424, %c8_i32_136 : i32
    %426 = tpu.assume_multiple %425, 8 : i32
    %427 = arith.index_cast %426 : i32 to index
    %c0_137 = arith.constant 0 : index
    %428 = vector.load %arg23[%427, %c0_137] : memref<64x128xf32, #tpu.memory_space<vmem>>, vector<8x128xf32>
    %c3_i32_138 = arith.constant 3 : i32
    %429 = vector.broadcast %c3_i32_138 : i32 to vector<8x128xi32>
    %430 = arith.cmpi eq, %299, %429 : vector<8x128xi32>
    %431 = arith.select %430, %428, %423 : vector<8x128xi1>, vector<8x128xf32>
    %c4_139 = arith.constant 4 : index
    %c1_140 = arith.constant 1 : index
    %432 = memref.load %arg0[%c4_139, %c1_140] : memref<8x2xi32, #tpu.memory_space<smem>>
    %c8_i32_141 = arith.constant 8 : i32
    %433 = arith.muli %432, %c8_i32_141 : i32
    %434 = tpu.assume_multiple %433, 8 : i32
    %435 = arith.index_cast %434 : i32 to index
    %c0_142 = arith.constant 0 : index
    %436 = vector.load %arg23[%435, %c0_142] : memref<64x128xf32, #tpu.memory_space<vmem>>, vector<8x128xf32>
    %c4_i32_143 = arith.constant 4 : i32
    %437 = vector.broadcast %c4_i32_143 : i32 to vector<8x128xi32>
    %438 = arith.cmpi eq, %299, %437 : vector<8x128xi32>
    %439 = arith.select %438, %436, %431 : vector<8x128xi1>, vector<8x128xf32>
    %c5_144 = arith.constant 5 : index
    %c1_145 = arith.constant 1 : index
    %440 = memref.load %arg0[%c5_144, %c1_145] : memref<8x2xi32, #tpu.memory_space<smem>>
    %c8_i32_146 = arith.constant 8 : i32
    %441 = arith.muli %440, %c8_i32_146 : i32
    %442 = tpu.assume_multiple %441, 8 : i32
    %443 = arith.index_cast %442 : i32 to index
    %c0_147 = arith.constant 0 : index
    %444 = vector.load %arg23[%443, %c0_147] : memref<64x128xf32, #tpu.memory_space<vmem>>, vector<8x128xf32>
    %c5_i32_148 = arith.constant 5 : i32
    %445 = vector.broadcast %c5_i32_148 : i32 to vector<8x128xi32>
    %446 = arith.cmpi eq, %299, %445 : vector<8x128xi32>
    %447 = arith.select %446, %444, %439 : vector<8x128xi1>, vector<8x128xf32>
    %c6_149 = arith.constant 6 : index
    %c1_150 = arith.constant 1 : index
    %448 = memref.load %arg0[%c6_149, %c1_150] : memref<8x2xi32, #tpu.memory_space<smem>>
    %c8_i32_151 = arith.constant 8 : i32
    %449 = arith.muli %448, %c8_i32_151 : i32
    %450 = tpu.assume_multiple %449, 8 : i32
    %451 = arith.index_cast %450 : i32 to index
    %c0_152 = arith.constant 0 : index
    %452 = vector.load %arg23[%451, %c0_152] : memref<64x128xf32, #tpu.memory_space<vmem>>, vector<8x128xf32>
    %c6_i32_153 = arith.constant 6 : i32
    %453 = vector.broadcast %c6_i32_153 : i32 to vector<8x128xi32>
    %454 = arith.cmpi eq, %299, %453 : vector<8x128xi32>
    %455 = arith.select %454, %452, %447 : vector<8x128xi1>, vector<8x128xf32>
    %c7_154 = arith.constant 7 : index
    %c1_155 = arith.constant 1 : index
    %456 = memref.load %arg0[%c7_154, %c1_155] : memref<8x2xi32, #tpu.memory_space<smem>>
    %c8_i32_156 = arith.constant 8 : i32
    %457 = arith.muli %456, %c8_i32_156 : i32
    %458 = tpu.assume_multiple %457, 8 : i32
    %459 = arith.index_cast %458 : i32 to index
    %c0_157 = arith.constant 0 : index
    %460 = vector.load %arg23[%459, %c0_157] : memref<64x128xf32, #tpu.memory_space<vmem>>, vector<8x128xf32>
    %c7_i32_158 = arith.constant 7 : i32
    %461 = vector.broadcast %c7_i32_158 : i32 to vector<8x128xi32>
    %462 = arith.cmpi eq, %299, %461 : vector<8x128xi32>
    %463 = arith.select %462, %460, %455 : vector<8x128xi1>, vector<8x128xf32>
    %464 = arith.truncf %463 : vector<8x128xf32> to vector<8x128xbf16>
    %cst_159 = arith.constant dense<0.000000e+00> : vector<8x384xf32>
    %465 = tpu.matmul %464, %293, %cst_159 {dimension_numbers = #tpu.dot_dimension_numbers<[1], [0], [0], [1], [0, 0, 1, 1], [], []>} : vector<8x128xbf16>, vector<128x384xbf16>, vector<8x384xf32> -> vector<8x384xf32>
    %466 = vector.broadcast %294 : vector<1x384xf32> to vector<8x384xf32>
    %467 = arith.addf %465, %466 : vector<8x384xf32>
    %468 = arith.truncf %398 : vector<8x128xf32> to vector<8x128xbf16>
    %cst_160 = arith.constant dense<0.000000e+00> : vector<8x384xf32>
    %469 = tpu.matmul %468, %295, %cst_160 {dimension_numbers = #tpu.dot_dimension_numbers<[1], [0], [0], [1], [0, 0, 1, 1], [], []>} : vector<8x128xbf16>, vector<128x384xbf16>, vector<8x384xf32> -> vector<8x384xf32>
    %470 = vector.extract_strided_slice %467 {offsets = [0, 0], sizes = [8, 128], strides = [1, 1]} : vector<8x384xf32> to vector<8x128xf32>
    %471 = vector.extract_strided_slice %469 {offsets = [0, 0], sizes = [8, 128], strides = [1, 1]} : vector<8x384xf32> to vector<8x128xf32>
    %472 = arith.addf %470, %471 : vector<8x128xf32>
    %473 = arith.negf %472 : vector<8x128xf32>
    %474 = math.exp %473 : vector<8x128xf32>
    %cst_161 = arith.constant 1.000000e+00 : f32
    %475 = vector.broadcast %cst_161 : f32 to vector<8x128xf32>
    %476 = arith.addf %475, %474 : vector<8x128xf32>
    %477 = arith.divf %475, %476 : vector<8x128xf32>
    %478 = vector.extract_strided_slice %467 {offsets = [0, 128], sizes = [8, 128], strides = [1, 1]} : vector<8x384xf32> to vector<8x128xf32>
    %479 = vector.extract_strided_slice %469 {offsets = [0, 128], sizes = [8, 128], strides = [1, 1]} : vector<8x384xf32> to vector<8x128xf32>
    %480 = arith.addf %478, %479 : vector<8x128xf32>
    %481 = arith.negf %480 : vector<8x128xf32>
    %482 = math.exp %481 : vector<8x128xf32>
    %cst_162 = arith.constant 1.000000e+00 : f32
    %483 = vector.broadcast %cst_162 : f32 to vector<8x128xf32>
    %484 = arith.addf %483, %482 : vector<8x128xf32>
    %485 = arith.divf %483, %484 : vector<8x128xf32>
    %486 = vector.extract_strided_slice %467 {offsets = [0, 256], sizes = [8, 128], strides = [1, 1]} : vector<8x384xf32> to vector<8x128xf32>
    %487 = vector.extract_strided_slice %469 {offsets = [0, 256], sizes = [8, 128], strides = [1, 1]} : vector<8x384xf32> to vector<8x128xf32>
    %488 = arith.addf %487, %298 : vector<8x128xf32>
    %489 = arith.mulf %477, %488 : vector<8x128xf32>
    %490 = arith.addf %486, %489 : vector<8x128xf32>
    %491 = math.tanh %490 : vector<8x128xf32>
    %cst_163 = arith.constant 1.000000e+00 : f32
    %492 = vector.broadcast %cst_163 : f32 to vector<8x128xf32>
    %493 = arith.subf %492, %485 : vector<8x128xf32>
    %494 = arith.mulf %493, %491 : vector<8x128xf32>
    %495 = arith.mulf %485, %398 : vector<8x128xf32>
    %496 = arith.addf %494, %495 : vector<8x128xf32>
    %c0_164 = arith.constant 0 : index
    %c0_165 = arith.constant 0 : index
    %497 = vector.load %arg21[%c0_164, %c0_165] : memref<8x128xf32, #tpu.memory_space<vmem>>, vector<8x128xf32>
    tpu.vector_store %arg21[%c0_164, %c0_165], %496 {strides = array<i32>} : memref<8x128xf32, #tpu.memory_space<vmem>>, vector<8x128xf32>,
    %c0_166 = arith.constant 0 : index
    %c0_167 = arith.constant 0 : index
    %498 = vector.load %arg2[%c0_166, %c0_167] : memref<64x128xbf16, #tpu.memory_space<vmem>>, vector<64x128xbf16>
    %c0_168 = arith.constant 0 : index
    %c0_169 = arith.constant 0 : index
    %499 = vector.load %arg12[%c0_168, %c0_169] : memref<256x384xbf16, #tpu.memory_space<vmem>>, vector<128x384xbf16>
    %cst_170 = arith.constant dense<0.000000e+00> : vector<64x384xf32>
    %500 = tpu.matmul %498, %499, %cst_170 {dimension_numbers = #tpu.dot_dimension_numbers<[1], [0], [0], [1], [0, 0, 1, 1], [], []>} : vector<64x128xbf16>, vector<128x384xbf16>, vector<64x384xf32> -> vector<64x384xf32>
    %c0_171 = arith.constant 0 : index
    %c0_172 = arith.constant 0 : index
    %501 = vector.load %arg3[%c0_171, %c0_172] : memref<64x128xbf16, #tpu.memory_space<vmem>>, vector<64x128xbf16>
    %c128 = arith.constant 128 : index
    %c0_173 = arith.constant 0 : index
    %502 = vector.load %arg12[%c128, %c0_173] : memref<256x384xbf16, #tpu.memory_space<vmem>>, vector<128x384xbf16>
    %cst_174 = arith.constant dense<0.000000e+00> : vector<64x384xf32>
    %503 = tpu.matmul %501, %502, %cst_174 {dimension_numbers = #tpu.dot_dimension_numbers<[1], [0], [0], [1], [0, 0, 1, 1], [], []>} : vector<64x128xbf16>, vector<128x384xbf16>, vector<64x384xf32> -> vector<64x384xf32>
    %504 = arith.addf %500, %503 : vector<64x384xf32>
    %c0_175 = arith.constant 0 : index
    %c0_176 = arith.constant 0 : index
    %505 = vector.load %arg13[%c0_175, %c0_176] : memref<1x384xf32, #tpu.memory_space<vmem>>, vector<1x384xf32>
    %506 = vector.broadcast %505 : vector<1x384xf32> to vector<64x384xf32>
    %507 = arith.addf %504, %506 : vector<64x384xf32>
    %c0_177 = arith.constant 0 : index
    %c0_178 = arith.constant 0 : index
    %508 = vector.load %arg24[%c0_177, %c0_178] : memref<64x384xf32, #tpu.memory_space<vmem>>, vector<64x384xf32>
    tpu.vector_store %arg24[%c0_177, %c0_178], %507 {strides = array<i32>} : memref<64x384xf32, #tpu.memory_space<vmem>>, vector<64x384xf32>,
    %c0_179 = arith.constant 0 : index
    %c0_180 = arith.constant 0 : index
    %509 = vector.load %arg14[%c0_179, %c0_180] : memref<128x384xbf16, #tpu.memory_space<vmem>>, vector<128x384xbf16>
    %c0_181 = arith.constant 0 : index
    %c0_182 = arith.constant 0 : index
    %510 = vector.load %arg15[%c0_181, %c0_182] : memref<1x128xf32, #tpu.memory_space<vmem>>, vector<1x128xf32>
    %511 = vector.shape_cast %510 : vector<1x128xf32> to vector<1x128xf32>
    %512 = vector.broadcast %511 : vector<1x128xf32> to vector<8x128xf32>
    %c0_i32_183 = arith.constant 0 : i32
    %c8_i32_184 = arith.constant 8 : i32
    %513 = arith.muli %c0_i32_183, %c8_i32_184 : i32
    %514 = tpu.assume_multiple %513, 8 : i32
    %515 = arith.index_cast %514 : i32 to index
    %c0_185 = arith.constant 0 : index
    %516 = vector.load %arg24[%515, %c0_185] : memref<64x384xf32, #tpu.memory_space<vmem>>, vector<8x384xf32>
    %517 = arith.truncf %289 : vector<8x128xf32> to vector<8x128xbf16>
    %cst_186 = arith.constant dense<0.000000e+00> : vector<8x384xf32>
    %518 = tpu.matmul %517, %509, %cst_186 {dimension_numbers = #tpu.dot_dimension_numbers<[1], [0], [0], [1], [0, 0, 1, 1], [], []>} : vector<8x128xbf16>, vector<128x384xbf16>, vector<8x384xf32> -> vector<8x384xf32>
    %519 = vector.extract_strided_slice %516 {offsets = [0, 0], sizes = [8, 128], strides = [1, 1]} : vector<8x384xf32> to vector<8x128xf32>
    %520 = vector.extract_strided_slice %518 {offsets = [0, 0], sizes = [8, 128], strides = [1, 1]} : vector<8x384xf32> to vector<8x128xf32>
    %521 = arith.addf %519, %520 : vector<8x128xf32>
    %522 = arith.negf %521 : vector<8x128xf32>
    %523 = math.exp %522 : vector<8x128xf32>
    %cst_187 = arith.constant 1.000000e+00 : f32
    %524 = vector.broadcast %cst_187 : f32 to vector<8x128xf32>
    %525 = arith.addf %524, %523 : vector<8x128xf32>
    %526 = arith.divf %524, %525 : vector<8x128xf32>
    %527 = vector.extract_strided_slice %516 {offsets = [0, 128], sizes = [8, 128], strides = [1, 1]} : vector<8x384xf32> to vector<8x128xf32>
    %528 = vector.extract_strided_slice %518 {offsets = [0, 128], sizes = [8, 128], strides = [1, 1]} : vector<8x384xf32> to vector<8x128xf32>
    %529 = arith.addf %527, %528 : vector<8x128xf32>
    %530 = arith.negf %529 : vector<8x128xf32>
    %531 = math.exp %530 : vector<8x128xf32>
    %cst_188 = arith.constant 1.000000e+00 : f32
    %532 = vector.broadcast %cst_188 : f32 to vector<8x128xf32>
    %533 = arith.addf %532, %531 : vector<8x128xf32>
    %534 = arith.divf %532, %533 : vector<8x128xf32>
    %535 = vector.extract_strided_slice %516 {offsets = [0, 256], sizes = [8, 128], strides = [1, 1]} : vector<8x384xf32> to vector<8x128xf32>
    %536 = vector.extract_strided_slice %518 {offsets = [0, 256], sizes = [8, 128], strides = [1, 1]} : vector<8x384xf32> to vector<8x128xf32>
    %537 = arith.addf %536, %512 : vector<8x128xf32>
    %538 = arith.mulf %526, %537 : vector<8x128xf32>
    %539 = arith.addf %535, %538 : vector<8x128xf32>
    %540 = math.tanh %539 : vector<8x128xf32>
    %cst_189 = arith.constant 1.000000e+00 : f32
    %541 = vector.broadcast %cst_189 : f32 to vector<8x128xf32>
    %542 = arith.subf %541, %534 : vector<8x128xf32>
    %543 = arith.mulf %542, %540 : vector<8x128xf32>
    %544 = arith.mulf %534, %289 : vector<8x128xf32>
    %545 = arith.addf %543, %544 : vector<8x128xf32>
    %546 = arith.index_cast %514 : i32 to index
    %c0_190 = arith.constant 0 : index
    %547 = vector.load %arg25[%546, %c0_190] : memref<64x128xf32, #tpu.memory_space<vmem>>, vector<8x128xf32>
    tpu.vector_store %arg25[%546, %c0_190], %545 {strides = array<i32>} : memref<64x128xf32, #tpu.memory_space<vmem>>, vector<8x128xf32>,
    %c1_i32_191 = arith.constant 1 : i32
    %c8_i32_192 = arith.constant 8 : i32
    %548 = arith.muli %c1_i32_191, %c8_i32_192 : i32
    %549 = tpu.assume_multiple %548, 8 : i32
    %550 = arith.index_cast %549 : i32 to index
    %c0_193 = arith.constant 0 : index
    %551 = vector.load %arg24[%550, %c0_193] : memref<64x384xf32, #tpu.memory_space<vmem>>, vector<8x384xf32>
    %552 = arith.truncf %545 : vector<8x128xf32> to vector<8x128xbf16>
    %cst_194 = arith.constant dense<0.000000e+00> : vector<8x384xf32>
    %553 = tpu.matmul %552, %509, %cst_194 {dimension_numbers = #tpu.dot_dimension_numbers<[1], [0], [0], [1], [0, 0, 1, 1], [], []>} : vector<8x128xbf16>, vector<128x384xbf16>, vector<8x384xf32> -> vector<8x384xf32>
    %554 = vector.extract_strided_slice %551 {offsets = [0, 0], sizes = [8, 128], strides = [1, 1]} : vector<8x384xf32> to vector<8x128xf32>
    %555 = vector.extract_strided_slice %553 {offsets = [0, 0], sizes = [8, 128], strides = [1, 1]} : vector<8x384xf32> to vector<8x128xf32>
    %556 = arith.addf %554, %555 : vector<8x128xf32>
    %557 = arith.negf %556 : vector<8x128xf32>
    %558 = math.exp %557 : vector<8x128xf32>
    %cst_195 = arith.constant 1.000000e+00 : f32
    %559 = vector.broadcast %cst_195 : f32 to vector<8x128xf32>
    %560 = arith.addf %559, %558 : vector<8x128xf32>
    %561 = arith.divf %559, %560 : vector<8x128xf32>
    %562 = vector.extract_strided_slice %551 {offsets = [0, 128], sizes = [8, 128], strides = [1, 1]} : vector<8x384xf32> to vector<8x128xf32>
    %563 = vector.extract_strided_slice %553 {offsets = [0, 128], sizes = [8, 128], strides = [1, 1]} : vector<8x384xf32> to vector<8x128xf32>
    %564 = arith.addf %562, %563 : vector<8x128xf32>
    %565 = arith.negf %564 : vector<8x128xf32>
    %566 = math.exp %565 : vector<8x128xf32>
    %cst_196 = arith.constant 1.000000e+00 : f32
    %567 = vector.broadcast %cst_196 : f32 to vector<8x128xf32>
    %568 = arith.addf %567, %566 : vector<8x128xf32>
    %569 = arith.divf %567, %568 : vector<8x128xf32>
    %570 = vector.extract_strided_slice %551 {offsets = [0, 256], sizes = [8, 128], strides = [1, 1]} : vector<8x384xf32> to vector<8x128xf32>
    %571 = vector.extract_strided_slice %553 {offsets = [0, 256], sizes = [8, 128], strides = [1, 1]} : vector<8x384xf32> to vector<8x128xf32>
    %572 = arith.addf %571, %512 : vector<8x128xf32>
    %573 = arith.mulf %561, %572 : vector<8x128xf32>
    %574 = arith.addf %570, %573 : vector<8x128xf32>
    %575 = math.tanh %574 : vector<8x128xf32>
    %cst_197 = arith.constant 1.000000e+00 : f32
    %576 = vector.broadcast %cst_197 : f32 to vector<8x128xf32>
    %577 = arith.subf %576, %569 : vector<8x128xf32>
    %578 = arith.mulf %577, %575 : vector<8x128xf32>
    %579 = arith.mulf %569, %545 : vector<8x128xf32>
    %580 = arith.addf %578, %579 : vector<8x128xf32>
    %581 = arith.index_cast %549 : i32 to index
    %c0_198 = arith.constant 0 : index
    %582 = vector.load %arg25[%581, %c0_198] : memref<64x128xf32, #tpu.memory_space<vmem>>, vector<8x128xf32>
    tpu.vector_store %arg25[%581, %c0_198], %580 {strides = array<i32>} : memref<64x128xf32, #tpu.memory_space<vmem>>, vector<8x128xf32>,
    %c2_i32_199 = arith.constant 2 : i32
    %c8_i32_200 = arith.constant 8 : i32
    %583 = arith.muli %c2_i32_199, %c8_i32_200 : i32
    %584 = tpu.assume_multiple %583, 8 : i32
    %585 = arith.index_cast %584 : i32 to index
    %c0_201 = arith.constant 0 : index
    %586 = vector.load %arg24[%585, %c0_201] : memref<64x384xf32, #tpu.memory_space<vmem>>, vector<8x384xf32>
    %587 = arith.truncf %580 : vector<8x128xf32> to vector<8x128xbf16>
    %cst_202 = arith.constant dense<0.000000e+00> : vector<8x384xf32>
    %588 = tpu.matmul %587, %509, %cst_202 {dimension_numbers = #tpu.dot_dimension_numbers<[1], [0], [0], [1], [0, 0, 1, 1], [], []>} : vector<8x128xbf16>, vector<128x384xbf16>, vector<8x384xf32> -> vector<8x384xf32>
    %589 = vector.extract_strided_slice %586 {offsets = [0, 0], sizes = [8, 128], strides = [1, 1]} : vector<8x384xf32> to vector<8x128xf32>
    %590 = vector.extract_strided_slice %588 {offsets = [0, 0], sizes = [8, 128], strides = [1, 1]} : vector<8x384xf32> to vector<8x128xf32>
    %591 = arith.addf %589, %590 : vector<8x128xf32>
    %592 = arith.negf %591 : vector<8x128xf32>
    %593 = math.exp %592 : vector<8x128xf32>
    %cst_203 = arith.constant 1.000000e+00 : f32
    %594 = vector.broadcast %cst_203 : f32 to vector<8x128xf32>
    %595 = arith.addf %594, %593 : vector<8x128xf32>
    %596 = arith.divf %594, %595 : vector<8x128xf32>
    %597 = vector.extract_strided_slice %586 {offsets = [0, 128], sizes = [8, 128], strides = [1, 1]} : vector<8x384xf32> to vector<8x128xf32>
    %598 = vector.extract_strided_slice %588 {offsets = [0, 128], sizes = [8, 128], strides = [1, 1]} : vector<8x384xf32> to vector<8x128xf32>
    %599 = arith.addf %597, %598 : vector<8x128xf32>
    %600 = arith.negf %599 : vector<8x128xf32>
    %601 = math.exp %600 : vector<8x128xf32>
    %cst_204 = arith.constant 1.000000e+00 : f32
    %602 = vector.broadcast %cst_204 : f32 to vector<8x128xf32>
    %603 = arith.addf %602, %601 : vector<8x128xf32>
    %604 = arith.divf %602, %603 : vector<8x128xf32>
    %605 = vector.extract_strided_slice %586 {offsets = [0, 256], sizes = [8, 128], strides = [1, 1]} : vector<8x384xf32> to vector<8x128xf32>
    %606 = vector.extract_strided_slice %588 {offsets = [0, 256], sizes = [8, 128], strides = [1, 1]} : vector<8x384xf32> to vector<8x128xf32>
    %607 = arith.addf %606, %512 : vector<8x128xf32>
    %608 = arith.mulf %596, %607 : vector<8x128xf32>
    %609 = arith.addf %605, %608 : vector<8x128xf32>
    %610 = math.tanh %609 : vector<8x128xf32>
    %cst_205 = arith.constant 1.000000e+00 : f32
    %611 = vector.broadcast %cst_205 : f32 to vector<8x128xf32>
    %612 = arith.subf %611, %604 : vector<8x128xf32>
    %613 = arith.mulf %612, %610 : vector<8x128xf32>
    %614 = arith.mulf %604, %580 : vector<8x128xf32>
    %615 = arith.addf %613, %614 : vector<8x128xf32>
    %616 = arith.index_cast %584 : i32 to index
    %c0_206 = arith.constant 0 : index
    %617 = vector.load %arg25[%616, %c0_206] : memref<64x128xf32, #tpu.memory_space<vmem>>, vector<8x128xf32>
    tpu.vector_store %arg25[%616, %c0_206], %615 {strides = array<i32>} : memref<64x128xf32, #tpu.memory_space<vmem>>, vector<8x128xf32>,
    %c3_i32_207 = arith.constant 3 : i32
    %c8_i32_208 = arith.constant 8 : i32
    %618 = arith.muli %c3_i32_207, %c8_i32_208 : i32
    %619 = tpu.assume_multiple %618, 8 : i32
    %620 = arith.index_cast %619 : i32 to index
    %c0_209 = arith.constant 0 : index
    %621 = vector.load %arg24[%620, %c0_209] : memref<64x384xf32, #tpu.memory_space<vmem>>, vector<8x384xf32>
    %622 = arith.truncf %615 : vector<8x128xf32> to vector<8x128xbf16>
    %cst_210 = arith.constant dense<0.000000e+00> : vector<8x384xf32>
    %623 = tpu.matmul %622, %509, %cst_210 {dimension_numbers = #tpu.dot_dimension_numbers<[1], [0], [0], [1], [0, 0, 1, 1], [], []>} : vector<8x128xbf16>, vector<128x384xbf16>, vector<8x384xf32> -> vector<8x384xf32>
    %624 = vector.extract_strided_slice %621 {offsets = [0, 0], sizes = [8, 128], strides = [1, 1]} : vector<8x384xf32> to vector<8x128xf32>
    %625 = vector.extract_strided_slice %623 {offsets = [0, 0], sizes = [8, 128], strides = [1, 1]} : vector<8x384xf32> to vector<8x128xf32>
    %626 = arith.addf %624, %625 : vector<8x128xf32>
    %627 = arith.negf %626 : vector<8x128xf32>
    %628 = math.exp %627 : vector<8x128xf32>
    %cst_211 = arith.constant 1.000000e+00 : f32
    %629 = vector.broadcast %cst_211 : f32 to vector<8x128xf32>
    %630 = arith.addf %629, %628 : vector<8x128xf32>
    %631 = arith.divf %629, %630 : vector<8x128xf32>
    %632 = vector.extract_strided_slice %621 {offsets = [0, 128], sizes = [8, 128], strides = [1, 1]} : vector<8x384xf32> to vector<8x128xf32>
    %633 = vector.extract_strided_slice %623 {offsets = [0, 128], sizes = [8, 128], strides = [1, 1]} : vector<8x384xf32> to vector<8x128xf32>
    %634 = arith.addf %632, %633 : vector<8x128xf32>
    %635 = arith.negf %634 : vector<8x128xf32>
    %636 = math.exp %635 : vector<8x128xf32>
    %cst_212 = arith.constant 1.000000e+00 : f32
    %637 = vector.broadcast %cst_212 : f32 to vector<8x128xf32>
    %638 = arith.addf %637, %636 : vector<8x128xf32>
    %639 = arith.divf %637, %638 : vector<8x128xf32>
    %640 = vector.extract_strided_slice %621 {offsets = [0, 256], sizes = [8, 128], strides = [1, 1]} : vector<8x384xf32> to vector<8x128xf32>
    %641 = vector.extract_strided_slice %623 {offsets = [0, 256], sizes = [8, 128], strides = [1, 1]} : vector<8x384xf32> to vector<8x128xf32>
    %642 = arith.addf %641, %512 : vector<8x128xf32>
    %643 = arith.mulf %631, %642 : vector<8x128xf32>
    %644 = arith.addf %640, %643 : vector<8x128xf32>
    %645 = math.tanh %644 : vector<8x128xf32>
    %cst_213 = arith.constant 1.000000e+00 : f32
    %646 = vector.broadcast %cst_213 : f32 to vector<8x128xf32>
    %647 = arith.subf %646, %639 : vector<8x128xf32>
    %648 = arith.mulf %647, %645 : vector<8x128xf32>
    %649 = arith.mulf %639, %615 : vector<8x128xf32>
    %650 = arith.addf %648, %649 : vector<8x128xf32>
    %651 = arith.index_cast %619 : i32 to index
    %c0_214 = arith.constant 0 : index
    %652 = vector.load %arg25[%651, %c0_214] : memref<64x128xf32, #tpu.memory_space<vmem>>, vector<8x128xf32>
    tpu.vector_store %arg25[%651, %c0_214], %650 {strides = array<i32>} : memref<64x128xf32, #tpu.memory_space<vmem>>, vector<8x128xf32>,
    %c4_i32_215 = arith.constant 4 : i32
    %c8_i32_216 = arith.constant 8 : i32
    %653 = arith.muli %c4_i32_215, %c8_i32_216 : i32
    %654 = tpu.assume_multiple %653, 8 : i32
    %655 = arith.index_cast %654 : i32 to index
    %c0_217 = arith.constant 0 : index
    %656 = vector.load %arg24[%655, %c0_217] : memref<64x384xf32, #tpu.memory_space<vmem>>, vector<8x384xf32>
    %657 = arith.truncf %650 : vector<8x128xf32> to vector<8x128xbf16>
    %cst_218 = arith.constant dense<0.000000e+00> : vector<8x384xf32>
    %658 = tpu.matmul %657, %509, %cst_218 {dimension_numbers = #tpu.dot_dimension_numbers<[1], [0], [0], [1], [0, 0, 1, 1], [], []>} : vector<8x128xbf16>, vector<128x384xbf16>, vector<8x384xf32> -> vector<8x384xf32>
    %659 = vector.extract_strided_slice %656 {offsets = [0, 0], sizes = [8, 128], strides = [1, 1]} : vector<8x384xf32> to vector<8x128xf32>
    %660 = vector.extract_strided_slice %658 {offsets = [0, 0], sizes = [8, 128], strides = [1, 1]} : vector<8x384xf32> to vector<8x128xf32>
    %661 = arith.addf %659, %660 : vector<8x128xf32>
    %662 = arith.negf %661 : vector<8x128xf32>
    %663 = math.exp %662 : vector<8x128xf32>
    %cst_219 = arith.constant 1.000000e+00 : f32
    %664 = vector.broadcast %cst_219 : f32 to vector<8x128xf32>
    %665 = arith.addf %664, %663 : vector<8x128xf32>
    %666 = arith.divf %664, %665 : vector<8x128xf32>
    %667 = vector.extract_strided_slice %656 {offsets = [0, 128], sizes = [8, 128], strides = [1, 1]} : vector<8x384xf32> to vector<8x128xf32>
    %668 = vector.extract_strided_slice %658 {offsets = [0, 128], sizes = [8, 128], strides = [1, 1]} : vector<8x384xf32> to vector<8x128xf32>
    %669 = arith.addf %667, %668 : vector<8x128xf32>
    %670 = arith.negf %669 : vector<8x128xf32>
    %671 = math.exp %670 : vector<8x128xf32>
    %cst_220 = arith.constant 1.000000e+00 : f32
    %672 = vector.broadcast %cst_220 : f32 to vector<8x128xf32>
    %673 = arith.addf %672, %671 : vector<8x128xf32>
    %674 = arith.divf %672, %673 : vector<8x128xf32>
    %675 = vector.extract_strided_slice %656 {offsets = [0, 256], sizes = [8, 128], strides = [1, 1]} : vector<8x384xf32> to vector<8x128xf32>
    %676 = vector.extract_strided_slice %658 {offsets = [0, 256], sizes = [8, 128], strides = [1, 1]} : vector<8x384xf32> to vector<8x128xf32>
    %677 = arith.addf %676, %512 : vector<8x128xf32>
    %678 = arith.mulf %666, %677 : vector<8x128xf32>
    %679 = arith.addf %675, %678 : vector<8x128xf32>
    %680 = math.tanh %679 : vector<8x128xf32>
    %cst_221 = arith.constant 1.000000e+00 : f32
    %681 = vector.broadcast %cst_221 : f32 to vector<8x128xf32>
    %682 = arith.subf %681, %674 : vector<8x128xf32>
    %683 = arith.mulf %682, %680 : vector<8x128xf32>
    %684 = arith.mulf %674, %650 : vector<8x128xf32>
    %685 = arith.addf %683, %684 : vector<8x128xf32>
    %686 = arith.index_cast %654 : i32 to index
    %c0_222 = arith.constant 0 : index
    %687 = vector.load %arg25[%686, %c0_222] : memref<64x128xf32, #tpu.memory_space<vmem>>, vector<8x128xf32>
    tpu.vector_store %arg25[%686, %c0_222], %685 {strides = array<i32>} : memref<64x128xf32, #tpu.memory_space<vmem>>, vector<8x128xf32>,
    %c5_i32_223 = arith.constant 5 : i32
    %c8_i32_224 = arith.constant 8 : i32
    %688 = arith.muli %c5_i32_223, %c8_i32_224 : i32
    %689 = tpu.assume_multiple %688, 8 : i32
    %690 = arith.index_cast %689 : i32 to index
    %c0_225 = arith.constant 0 : index
    %691 = vector.load %arg24[%690, %c0_225] : memref<64x384xf32, #tpu.memory_space<vmem>>, vector<8x384xf32>
    %692 = arith.truncf %685 : vector<8x128xf32> to vector<8x128xbf16>
    %cst_226 = arith.constant dense<0.000000e+00> : vector<8x384xf32>
    %693 = tpu.matmul %692, %509, %cst_226 {dimension_numbers = #tpu.dot_dimension_numbers<[1], [0], [0], [1], [0, 0, 1, 1], [], []>} : vector<8x128xbf16>, vector<128x384xbf16>, vector<8x384xf32> -> vector<8x384xf32>
    %694 = vector.extract_strided_slice %691 {offsets = [0, 0], sizes = [8, 128], strides = [1, 1]} : vector<8x384xf32> to vector<8x128xf32>
    %695 = vector.extract_strided_slice %693 {offsets = [0, 0], sizes = [8, 128], strides = [1, 1]} : vector<8x384xf32> to vector<8x128xf32>
    %696 = arith.addf %694, %695 : vector<8x128xf32>
    %697 = arith.negf %696 : vector<8x128xf32>
    %698 = math.exp %697 : vector<8x128xf32>
    %cst_227 = arith.constant 1.000000e+00 : f32
    %699 = vector.broadcast %cst_227 : f32 to vector<8x128xf32>
    %700 = arith.addf %699, %698 : vector<8x128xf32>
    %701 = arith.divf %699, %700 : vector<8x128xf32>
    %702 = vector.extract_strided_slice %691 {offsets = [0, 128], sizes = [8, 128], strides = [1, 1]} : vector<8x384xf32> to vector<8x128xf32>
    %703 = vector.extract_strided_slice %693 {offsets = [0, 128], sizes = [8, 128], strides = [1, 1]} : vector<8x384xf32> to vector<8x128xf32>
    %704 = arith.addf %702, %703 : vector<8x128xf32>
    %705 = arith.negf %704 : vector<8x128xf32>
    %706 = math.exp %705 : vector<8x128xf32>
    %cst_228 = arith.constant 1.000000e+00 : f32
    %707 = vector.broadcast %cst_228 : f32 to vector<8x128xf32>
    %708 = arith.addf %707, %706 : vector<8x128xf32>
    %709 = arith.divf %707, %708 : vector<8x128xf32>
    %710 = vector.extract_strided_slice %691 {offsets = [0, 256], sizes = [8, 128], strides = [1, 1]} : vector<8x384xf32> to vector<8x128xf32>
    %711 = vector.extract_strided_slice %693 {offsets = [0, 256], sizes = [8, 128], strides = [1, 1]} : vector<8x384xf32> to vector<8x128xf32>
    %712 = arith.addf %711, %512 : vector<8x128xf32>
    %713 = arith.mulf %701, %712 : vector<8x128xf32>
    %714 = arith.addf %710, %713 : vector<8x128xf32>
    %715 = math.tanh %714 : vector<8x128xf32>
    %cst_229 = arith.constant 1.000000e+00 : f32
    %716 = vector.broadcast %cst_229 : f32 to vector<8x128xf32>
    %717 = arith.subf %716, %709 : vector<8x128xf32>
    %718 = arith.mulf %717, %715 : vector<8x128xf32>
    %719 = arith.mulf %709, %685 : vector<8x128xf32>
    %720 = arith.addf %718, %719 : vector<8x128xf32>
    %721 = arith.index_cast %689 : i32 to index
    %c0_230 = arith.constant 0 : index
    %722 = vector.load %arg25[%721, %c0_230] : memref<64x128xf32, #tpu.memory_space<vmem>>, vector<8x128xf32>
    tpu.vector_store %arg25[%721, %c0_230], %720 {strides = array<i32>} : memref<64x128xf32, #tpu.memory_space<vmem>>, vector<8x128xf32>,
    %c6_i32_231 = arith.constant 6 : i32
    %c8_i32_232 = arith.constant 8 : i32
    %723 = arith.muli %c6_i32_231, %c8_i32_232 : i32
    %724 = tpu.assume_multiple %723, 8 : i32
    %725 = arith.index_cast %724 : i32 to index
    %c0_233 = arith.constant 0 : index
    %726 = vector.load %arg24[%725, %c0_233] : memref<64x384xf32, #tpu.memory_space<vmem>>, vector<8x384xf32>
    %727 = arith.truncf %720 : vector<8x128xf32> to vector<8x128xbf16>
    %cst_234 = arith.constant dense<0.000000e+00> : vector<8x384xf32>
    %728 = tpu.matmul %727, %509, %cst_234 {dimension_numbers = #tpu.dot_dimension_numbers<[1], [0], [0], [1], [0, 0, 1, 1], [], []>} : vector<8x128xbf16>, vector<128x384xbf16>, vector<8x384xf32> -> vector<8x384xf32>
    %729 = vector.extract_strided_slice %726 {offsets = [0, 0], sizes = [8, 128], strides = [1, 1]} : vector<8x384xf32> to vector<8x128xf32>
    %730 = vector.extract_strided_slice %728 {offsets = [0, 0], sizes = [8, 128], strides = [1, 1]} : vector<8x384xf32> to vector<8x128xf32>
    %731 = arith.addf %729, %730 : vector<8x128xf32>
    %732 = arith.negf %731 : vector<8x128xf32>
    %733 = math.exp %732 : vector<8x128xf32>
    %cst_235 = arith.constant 1.000000e+00 : f32
    %734 = vector.broadcast %cst_235 : f32 to vector<8x128xf32>
    %735 = arith.addf %734, %733 : vector<8x128xf32>
    %736 = arith.divf %734, %735 : vector<8x128xf32>
    %737 = vector.extract_strided_slice %726 {offsets = [0, 128], sizes = [8, 128], strides = [1, 1]} : vector<8x384xf32> to vector<8x128xf32>
    %738 = vector.extract_strided_slice %728 {offsets = [0, 128], sizes = [8, 128], strides = [1, 1]} : vector<8x384xf32> to vector<8x128xf32>
    %739 = arith.addf %737, %738 : vector<8x128xf32>
    %740 = arith.negf %739 : vector<8x128xf32>
    %741 = math.exp %740 : vector<8x128xf32>
    %cst_236 = arith.constant 1.000000e+00 : f32
    %742 = vector.broadcast %cst_236 : f32 to vector<8x128xf32>
    %743 = arith.addf %742, %741 : vector<8x128xf32>
    %744 = arith.divf %742, %743 : vector<8x128xf32>
    %745 = vector.extract_strided_slice %726 {offsets = [0, 256], sizes = [8, 128], strides = [1, 1]} : vector<8x384xf32> to vector<8x128xf32>
    %746 = vector.extract_strided_slice %728 {offsets = [0, 256], sizes = [8, 128], strides = [1, 1]} : vector<8x384xf32> to vector<8x128xf32>
    %747 = arith.addf %746, %512 : vector<8x128xf32>
    %748 = arith.mulf %736, %747 : vector<8x128xf32>
    %749 = arith.addf %745, %748 : vector<8x128xf32>
    %750 = math.tanh %749 : vector<8x128xf32>
    %cst_237 = arith.constant 1.000000e+00 : f32
    %751 = vector.broadcast %cst_237 : f32 to vector<8x128xf32>
    %752 = arith.subf %751, %744 : vector<8x128xf32>
    %753 = arith.mulf %752, %750 : vector<8x128xf32>
    %754 = arith.mulf %744, %720 : vector<8x128xf32>
    %755 = arith.addf %753, %754 : vector<8x128xf32>
    %756 = arith.index_cast %724 : i32 to index
    %c0_238 = arith.constant 0 : index
    %757 = vector.load %arg25[%756, %c0_238] : memref<64x128xf32, #tpu.memory_space<vmem>>, vector<8x128xf32>
    tpu.vector_store %arg25[%756, %c0_238], %755 {strides = array<i32>} : memref<64x128xf32, #tpu.memory_space<vmem>>, vector<8x128xf32>,
    %c7_i32_239 = arith.constant 7 : i32
    %c8_i32_240 = arith.constant 8 : i32
    %758 = arith.muli %c7_i32_239, %c8_i32_240 : i32
    %759 = tpu.assume_multiple %758, 8 : i32
    %760 = arith.index_cast %759 : i32 to index
    %c0_241 = arith.constant 0 : index
    %761 = vector.load %arg24[%760, %c0_241] : memref<64x384xf32, #tpu.memory_space<vmem>>, vector<8x384xf32>
    %762 = arith.truncf %755 : vector<8x128xf32> to vector<8x128xbf16>
    %cst_242 = arith.constant dense<0.000000e+00> : vector<8x384xf32>
    %763 = tpu.matmul %762, %509, %cst_242 {dimension_numbers = #tpu.dot_dimension_numbers<[1], [0], [0], [1], [0, 0, 1, 1], [], []>} : vector<8x128xbf16>, vector<128x384xbf16>, vector<8x384xf32> -> vector<8x384xf32>
    %764 = vector.extract_strided_slice %761 {offsets = [0, 0], sizes = [8, 128], strides = [1, 1]} : vector<8x384xf32> to vector<8x128xf32>
    %765 = vector.extract_strided_slice %763 {offsets = [0, 0], sizes = [8, 128], strides = [1, 1]} : vector<8x384xf32> to vector<8x128xf32>
    %766 = arith.addf %764, %765 : vector<8x128xf32>
    %767 = arith.negf %766 : vector<8x128xf32>
    %768 = math.exp %767 : vector<8x128xf32>
    %cst_243 = arith.constant 1.000000e+00 : f32
    %769 = vector.broadcast %cst_243 : f32 to vector<8x128xf32>
    %770 = arith.addf %769, %768 : vector<8x128xf32>
    %771 = arith.divf %769, %770 : vector<8x128xf32>
    %772 = vector.extract_strided_slice %761 {offsets = [0, 128], sizes = [8, 128], strides = [1, 1]} : vector<8x384xf32> to vector<8x128xf32>
    %773 = vector.extract_strided_slice %763 {offsets = [0, 128], sizes = [8, 128], strides = [1, 1]} : vector<8x384xf32> to vector<8x128xf32>
    %774 = arith.addf %772, %773 : vector<8x128xf32>
    %775 = arith.negf %774 : vector<8x128xf32>
    %776 = math.exp %775 : vector<8x128xf32>
    %cst_244 = arith.constant 1.000000e+00 : f32
    %777 = vector.broadcast %cst_244 : f32 to vector<8x128xf32>
    %778 = arith.addf %777, %776 : vector<8x128xf32>
    %779 = arith.divf %777, %778 : vector<8x128xf32>
    %780 = vector.extract_strided_slice %761 {offsets = [0, 256], sizes = [8, 128], strides = [1, 1]} : vector<8x384xf32> to vector<8x128xf32>
    %781 = vector.extract_strided_slice %763 {offsets = [0, 256], sizes = [8, 128], strides = [1, 1]} : vector<8x384xf32> to vector<8x128xf32>
    %782 = arith.addf %781, %512 : vector<8x128xf32>
    %783 = arith.mulf %771, %782 : vector<8x128xf32>
    %784 = arith.addf %780, %783 : vector<8x128xf32>
    %785 = math.tanh %784 : vector<8x128xf32>
    %cst_245 = arith.constant 1.000000e+00 : f32
    %786 = vector.broadcast %cst_245 : f32 to vector<8x128xf32>
    %787 = arith.subf %786, %779 : vector<8x128xf32>
    %788 = arith.mulf %787, %785 : vector<8x128xf32>
    %789 = arith.mulf %779, %755 : vector<8x128xf32>
    %790 = arith.addf %788, %789 : vector<8x128xf32>
    %791 = arith.index_cast %759 : i32 to index
    %c0_246 = arith.constant 0 : index
    %792 = vector.load %arg25[%791, %c0_246] : memref<64x128xf32, #tpu.memory_space<vmem>>, vector<8x128xf32>
    tpu.vector_store %arg25[%791, %c0_246], %790 {strides = array<i32>} : memref<64x128xf32, #tpu.memory_space<vmem>>, vector<8x128xf32>,
    %c8_i32_247 = arith.constant 8 : i32
    %c0_248 = arith.constant 0 : index
    %c0_249 = arith.constant 0 : index
    %793 = vector.load %arg19[%c0_248, %c0_249] : memref<8x128xf32, #tpu.memory_space<vmem>>, vector<8x128xf32>
    tpu.vector_store %arg19[%c0_248, %c0_249], %790 {strides = array<i32>} : memref<8x128xf32, #tpu.memory_space<vmem>>, vector<8x128xf32>,
    %c0_250 = arith.constant 0 : index
    %c0_251 = arith.constant 0 : index
    %794 = vector.load %arg25[%c0_250, %c0_251] : memref<64x128xf32, #tpu.memory_space<vmem>>, vector<64x128xf32>
    %795 = arith.truncf %794 : vector<64x128xf32> to vector<64x128xbf16>
    %c0_252 = arith.constant 0 : index
    %c0_253 = arith.constant 0 : index
    %796 = vector.load %arg16[%c0_252, %c0_253] : memref<128x256xbf16, #tpu.memory_space<vmem>>, vector<128x256xbf16>
    %cst_254 = arith.constant dense<0.000000e+00> : vector<64x256xf32>
    %797 = tpu.matmul %795, %796, %cst_254 {dimension_numbers = #tpu.dot_dimension_numbers<[1], [0], [0], [1], [0, 0, 1, 1], [], []>} : vector<64x128xbf16>, vector<128x256xbf16>, vector<64x256xf32> -> vector<64x256xf32>
    %c0_255 = arith.constant 0 : index
    %c0_256 = arith.constant 0 : index
    %798 = vector.load %arg17[%c0_255, %c0_256] : memref<1x256xf32, #tpu.memory_space<vmem>>, vector<1x256xf32>
    %799 = vector.broadcast %798 : vector<1x256xf32> to vector<64x256xf32>
    %800 = arith.addf %797, %799 : vector<64x256xf32>
    %cst_257 = arith.constant dense<0xFF800000> : vector<64xf32>
    %801 = vector.multi_reduction <maximumf>, %800, %cst_257 [1] : vector<64x256xf32> to vector<64xf32>
    %802 = vector.shape_cast %801 : vector<64xf32> to vector<64x1xf32>
    %803 = vector.broadcast %802 : vector<64x1xf32> to vector<64x256xf32>
    %804 = arith.subf %800, %803 : vector<64x256xf32>
    %805 = math.exp %804 : vector<64x256xf32>
    %cst_258 = arith.constant dense<0.000000e+00> : vector<64xf32>
    %806 = vector.multi_reduction <add>, %805, %cst_258 [1] : vector<64x256xf32> to vector<64xf32>
    %807 = vector.shape_cast %806 : vector<64xf32> to vector<64x1xf32>
    %808 = math.log %807 : vector<64x1xf32>
    %809 = arith.addf %808, %802 : vector<64x1xf32>
    %810 = vector.broadcast %809 : vector<64x1xf32> to vector<64x256xf32>
    %811 = arith.subf %800, %810 : vector<64x256xf32>
    %c0_259 = arith.constant 0 : index
    %c0_260 = arith.constant 0 : index
    %812 = vector.load %arg18[%c0_259, %c0_260] : memref<64x256xf32, #tpu.memory_space<vmem>>, vector<64x256xf32>
    tpu.vector_store %arg18[%c0_259, %c0_260], %811 {strides = array<i32>} : memref<64x256xf32, #tpu.memory_space<vmem>>, vector<64x256xf32>,
    return
  }
}

</mosaic_0001>

<bundles_post_ra>
// kernel: seq2seq_forward.1
= control target key start
LH: loop header
LB: loop body
LE: loop exit
PB: predicated region body
PF: predicated region fallthrough
CT: control target
= control target key end

     0   :  { %s8696_s0 = inlined_call_operand.vmem [shape: s32[8,2], index: 0, kind: input, shape index: {}]   ;;  %s8697_s1 = inlined_call_operand.vmem [shape: bf16[64,128], index: 1, kind: input, shape index: {}]   ;;  %s8698_s2 = inlined_call_operand.vmem [shape: bf16[64,128], index: 2, kind: input, shape index: {}]   ;;  %s8699_s3 = inlined_call_operand.vmem [shape: bf16[64,128], index: 3, kind: input, shape index: {}]   ;;  %s8700_s4 = inlined_call_operand.vmem [shape: bf16[128,384], index: 4, kind: input, shape index: {}]   ;;  %s8701_s5 = inlined_call_operand.vmem [shape: f32[1,384], index: 5, kind: input, shape index: {}]   ;;  %s8702_s6 = inlined_call_operand.vmem [shape: bf16[128,384], index: 6, kind: input, shape index: {}]   ;;  %s8703_s7 = inlined_call_operand.hbm [shape: f32[1,128], index: 7, kind: input, shape index: {}]   ;;  %s8704_s8 = inlined_call_operand.vmem [shape: bf16[128,384], index: 8, kind: input, shape index: {}]   ;;  %s8705_s9 = inlined_call_operand.vmem [shape: f32[1,384], index: 9, kind: input, shape index: {}]   ;;  %s8706_s10 = inlined_call_operand.vmem [shape: bf16[128,384], index: 10, kind: input, shape index: {}]   ;;  %s8707_s11 = inlined_call_operand.hbm [shape: f32[1,128], index: 11, kind: input, shape index: {}]   ;;  %s8708_s12 = inlined_call_operand.vmem [shape: bf16[256,384], index: 12, kind: input, shape index: {}]   ;;  %s8709_s13 = inlined_call_operand.hbm [shape: f32[1,384], index: 13, kind: input, shape index: {}]   ;;  %s8710_s14 = inlined_call_operand.hbm [shape: bf16[128,384], index: 14, kind: input, shape index: {}]   ;;  %s8711_s15 = inlined_call_operand.hbm [shape: f32[1,128], index: 15, kind: input, shape index: {}]   ;;  %s8712_s16 = inlined_call_operand.vmem [shape: bf16[128,256], index: 16, kind: input, shape index: {}]   ;;  %s8713_s17 = inlined_call_operand.vmem [shape: f32[1,256], index: 17, kind: input, shape index: {}]   ;;  %s8714_s18 = inlined_call_operand.hbm [shape: f32[64,256], index: 18, kind: output, shape index: {0}]   ;;  %s8715_s19 = inlined_call_operand.hbm [shape: f32[8,128], index: 19, kind: output, shape index: {1}]   ;;  %s8716_s20 = inlined_call_operand.hbm [shape: f32[8,128], index: 20, kind: output, shape index: {2}]   ;;  %s8717_s21 = inlined_call_operand.hbm [shape: f32[8,128], index: 21, kind: output, shape index: {3}]  }
   0x1   :  { %8737 = sst [smem:[#allocation38_spill]] %s8696_s0 }
   0x2   :  { %8738 = sst [smem:[#allocation39_spill]] %s8697_s1 }
   0x3   :  { %8739 = sst [smem:[#allocation40_spill]] %s8698_s2 }
   0x4   :  { %8740 = sst [smem:[#allocation41_spill]] %s8699_s3 }
   0x5   :  { %8741 = sst [smem:[#allocation42_spill]] %s8700_s4 }
   0x6   :  { %8742 = sst [smem:[#allocation43_spill]] %s8701_s5 }
   0x7   :  { %8743 = sst [smem:[#allocation44_spill]] %s8714_s18 }
   0x8   :  { %8744 = sst [smem:[#allocation45_spill]] %s8716_s20 }
   0x9   :  { %8745 = sst [smem:[#allocation46_spill]] %s8717_s21 }
   0xa   :  { %27 = vsyncpa [#allocation9], 0 }
   0xb   :  { %28 = vsyncpa [#allocation7], 0 }
   0xc   :  { %29 = vsyncpa [#allocation12], 0 }
   0xd   :  { %30 = vsyncpa [#allocation15], 0 }
   0xe   :  { %31 = vsyncpa [#allocation8], 0 }
   0xf   :  { %32 = vsyncpa [#allocation19], 0 }
  0x10   :  { %33 = vsyncpa [#allocation22], 0  ;;  %s6380_s2 = smov [#allocation11]   ;;  %s6381_s26 = smov [#allocation14]  }
  0x11   :  { %s78_s25 = sshll.u32 %s6380_s2, 4  ;;  %s99_s27 = sshll.u32 %s6381_s26, 4  ;;  %s79_s25 = int_to_ptr.vmem [resolvable:$true] %s78_s25  ;;  %s6507_s27 = int_to_ptr.vmem [resolvable:$true] %s99_s27 }
  0x12   :  { %s6156_s29 = scalar_lea.hbm %s8707_s11, 16 }
  0x13   :  { %p6157_p0 = scmp.ne.s32.totalorder %s8707_s11, %s6156_s29  ;;  %p6160_p1 = scmp.lt.u32.totalorder %s6156_s29, %s8707_s11 }
  0x15   :  { %p6162_p2 = pnand %p6160_p1, %p6157_p0 }
  0x17   :  { %6165 = shalt.err (!%p6162_p2)
}
  0x18   :  { %s6166_s22 = scalar_lea.vmem %s79_s25, 16  ;;  %s6170_s23 = scalar_lea.vmem %s79_s25, 32 }
  0x19   :  { %p6167_p3 = scmp.ne.s32.totalorder %s79_s25, %s6166_s22  ;;  %p6171_p4 = scmp.lt.s32.totalorder %s79_s25, %s79_s25 }
  0x1a   :  { %p6172_p5 = scmp.lt.s32.totalorder %s6170_s23, %s6166_s22 }
  0x1c   :  { %p6173_p6 = por %p6172_p5, %p6171_p4 }
  0x1e   :  { %p6174_p7 = pnand %p6173_p6, %p6167_p3 }
  0x20   :  { %6177 = shalt.err (!%p6174_p7)
}
  0x21   :  { %81 = dma.hbm_to_vmem [thread:$0]  %s8707_s11, 16, %s79_s25, [#allocation12]  }
  0x22   :  { %s6178_s3 = scalar_lea.hbm %s8710_s14, 3072 }
  0x23   :  { %p6179_p8 = scmp.ne.s32.totalorder %s8710_s14, %s6178_s3  ;;  %p6182_p9 = scmp.lt.u32.totalorder %s6178_s3, %s8710_s14 }
  0x25   :  { %p6184_p10 = pnand %p6182_p9, %p6179_p8 }
  0x27   :  { %6187 = shalt.err (!%p6184_p10)
}
  0x28   :  { %s6188_s30 = scalar_lea.vmem %s6507_s27, 3072  ;;  %p6193_p12 = scmp.lt.s32.totalorder %s6507_s27, %s6507_s27 }
  0x29   :  { %p6189_p11 = scmp.ne.s32.totalorder %s6507_s27, %s6188_s30  ;;  %p6194_p13 = scmp.lt.s32.totalorder %s6188_s30, %s6188_s30 }
  0x2b   :  { %p6195_p0 = por %p6194_p13, %p6193_p12 }
  0x2d   :  { %p6196_p1 = pnand %p6195_p0, %p6189_p11 }
  0x2f   :  { %6199 = shalt.err (!%p6196_p1)
}
  0x30   :  { %s6382_s11 = smov 192   ;;  %s6383_s25 = smov 12  }
  0x31   :  { %105 = dma.hbm_to_vmem [thread:$0]  %s8710_s14, 3072, %s6507_s27, [#allocation15], %s6382_s11, %s6382_s11, %s6383_s25  }
  0x32   :  { %s8746_s24 = sld [smem:[#allocation38_spill]] }
  0x38   :  { %s40_s2 = sshll.u32 %s8746_s24, 4  ;;  %s41_s2 = int_to_ptr.vmem [resolvable:$true] %s40_s2 }
  0x39   :  { %s6200_s26 = scalar_lea.vmem %s41_s2, 128  ;;  %p6205_p3 = scmp.lt.s32.totalorder %s41_s2, %s41_s2 }
  0x3a   :  { %p6201_p2 = scmp.ne.s32.totalorder %s41_s2, %s6200_s26  ;;  %p6206_p4 = scmp.lt.s32.totalorder %s6200_s26, %s6200_s26 }
  0x3c   :  { %p6207_p5 = por %p6206_p4, %p6205_p3 }
  0x3e   :  { %p6208_p6 = pnand %p6207_p5, %p6201_p2 }
  0x40   :  { %6211 = shalt.err (!%p6208_p6)
}
  0x41   :  { %s6384_s3 = smov [#allocation6]   ;;  %s6385_s28 = smov [#allocation10]  }
  0x42   :  { %43 = dma.vmem_to_smem %s41_s2, 128, %s6384_s3, [#allocation9]  }
  0x43   :  { %s62_s29 = sshll.u32 %s6385_s28, 4  ;;  %s6386_s0 = smov [#allocation13]   ;;  %s63_s29 = int_to_ptr.vmem [resolvable:$true] %s62_s29 }
  0x44   :  { %s90_s4 = sshll.u32 %s6386_s0, 4  ;;  %s6212_s30 = scalar_lea.hbm %s8703_s7, 16  ;;  %s91_s4 = int_to_ptr.vmem [resolvable:$true] %s90_s4 }
  0x45   :  { %p6213_p7 = scmp.ne.s32.totalorder %s8703_s7, %s6212_s30  ;;  %p6216_p8 = scmp.lt.u32.totalorder %s6212_s30, %s8703_s7 }
  0x47   :  { %p6218_p9 = pnand %p6216_p8, %p6213_p7 }
  0x49   :  { %6221 = shalt.err (!%p6218_p9)
}
  0x4a   :  { %s6222_s23 = scalar_lea.vmem %s63_s29, 16  ;;  %s6226_s1 = scalar_lea.vmem %s63_s29, 32 }
  0x4b   :  { %p6223_p10 = scmp.ne.s32.totalorder %s63_s29, %s6222_s23  ;;  %p6227_p11 = scmp.lt.s32.totalorder %s63_s29, %s63_s29 }
  0x4c   :  { %p6228_p12 = scmp.lt.s32.totalorder %s6226_s1, %s6222_s23 }
  0x4e   :  { %p6229_p13 = por %p6228_p12, %p6227_p11 }
  0x50   :  { %p6230_p0 = pnand %p6229_p13, %p6223_p10 }
  0x52   :  { %6233 = shalt.err (!%p6230_p0)
}
  0x53   :  { %65 = dma.hbm_to_vmem [thread:$0]  %s8703_s7, 16, %s63_s29, [#allocation7]  }
  0x54   :  { %s6234_s28 = scalar_lea.hbm %s8709_s13, 48 }
  0x55   :  { %p6235_p1 = scmp.ne.s32.totalorder %s8709_s13, %s6234_s28  ;;  %p6238_p2 = scmp.lt.u32.totalorder %s6234_s28, %s8709_s13 }
  0x57   :  { %p6240_p3 = pnand %p6238_p2, %p6235_p1 }
  0x59   :  { %6243 = shalt.err (!%p6240_p3)
}
  0x5a   :  { %s6244_s11 = scalar_lea.vmem %s91_s4, 48  ;;  %s6248_s25 = scalar_lea.vmem %s91_s4, 64 }
  0x5b   :  { %p6245_p4 = scmp.ne.s32.totalorder %s91_s4, %s6244_s11  ;;  %p6249_p5 = scmp.lt.s32.totalorder %s91_s4, %s91_s4 }
  0x5c   :  { %p6250_p6 = scmp.lt.s32.totalorder %s6248_s25, %s6244_s11 }
  0x5e   :  { %p6251_p7 = por %p6250_p6, %p6249_p5 }
  0x60   :  { %p6252_p8 = pnand %p6251_p7, %p6245_p4 }
  0x62   :  { %6255 = shalt.err (!%p6252_p8)
}
  0x63   :  { %93 = dma.hbm_to_vmem [thread:$0]  %s8709_s13, 48, %s91_s4, [#allocation12]  }
  0x64   :  { %s6387_s5 = smov [#allocation16]   ;;  %s6256_s24 = scalar_lea.hbm %s8711_s15, 16 }
  0x65   :  { %s112_s22 = sshll.u32 %s6387_s5, 4  ;;  %p6257_p9 = scmp.ne.s32.totalorder %s8711_s15, %s6256_s24  ;;  %s113_s22 = int_to_ptr.vmem [resolvable:$true] %s112_s22 }
  0x66   :  { %p6260_p10 = scmp.lt.u32.totalorder %s6256_s24, %s8711_s15 }
  0x68   :  { %p6262_p11 = pnand %p6260_p10, %p6257_p9 }
  0x6a   :  { %6265 = shalt.err (!%p6262_p11)
}
  0x6b   :  { %s6266_s0 = scalar_lea.vmem %s113_s22, 16  ;;  %s6270_s13 = scalar_lea.vmem %s113_s22, 32 }
  0x6c   :  { %p6267_p12 = scmp.ne.s32.totalorder %s113_s22, %s6266_s0  ;;  %p6271_p13 = scmp.lt.s32.totalorder %s113_s22, %s113_s22 }
  0x6d   :  { %p6272_p0 = scmp.lt.s32.totalorder %s6270_s13, %s6266_s0 }
  0x6f   :  { %p6273_p1 = por %p6272_p0, %p6271_p13 }
  0x71   :  { %p6274_p2 = pnand %p6273_p1, %p6267_p12 }
  0x73   :  { %6277 = shalt.err (!%p6274_p2)
}
  0x74   :  { %115 = dma.hbm_to_vmem [thread:$0]  %s8711_s15, 16, %s113_s22, [#allocation15]  }
  0x75   :  { %6366 = dma.done.wait [#allocation9], 128  }
  0x76   :  { %6367 = vsyncadd [#allocation9], 4294967168 }
  0x77   :  { %6368 = dma.done.wait [#allocation7], 16  }
  0x78   :  { %6369 = vsyncadd [#allocation7], 4294967280 }
  0x79   :  { %6370 = dma.done.wait [#allocation12], 64  }
  0x7a   :  { %6371 = vsyncadd [#allocation12], 4294967232 }
  0x7b   :  { %6372 = dma.done.wait [#allocation15], 3088  }
  0x7c   :  { %6373 = vsyncadd [#allocation15], 4294964208 }
  0x7d   :  { %138 = sfence }
  0x7e   :  { %s8747_s11 = sld [smem:[#allocation42_spill]]  ;;  %v8722_v2 = vmov 0   ;;  %v6588_v3 = vld [vmem:[%s8702_s6 + $0x4] ss:$12 sps:$4 sm:$0xff]   ;;  %v6593_v4 = vld [vmem:[%s8702_s6] ss:$12 sps:$4 sm:$0xff]   ;;  %v182_v54 = vlaneseq }
  0x7f   :  { %381 = vmatprep.mubr.bf16.mxu1 %v8722_v2  ;;  %716 = vmatprep.mubr.bf16.mxu0 %v8722_v2  ;;  %v6605_v7 = vld [vmem:[%s8702_s6 + $0x1c] ss:$12 sps:$4 sm:$0xff]   ;;  %v6611_v8 = vld [vmem:[%s8702_s6 + $0x18] ss:$12 sps:$4 sm:$0xff]   ;;  %v6623_v11 = vld [vmem:[%s8702_s6 + $0x34] ss:$12 sps:$4 sm:$0xff]  }
  0x80   :  { %684 = vmatprep.subr.bf16.mxu0 %v6588_v3  ;;  %v6632_v13 = vld [vmem:[%s8702_s6 + $0x30] ss:$12 sps:$4 sm:$0xff]   ;;  %v6638_v14 = vld [vmem:[%s8702_s6 + $0x4c] ss:$12 sps:$4 sm:$0xff]   ;;  %v6650_v17 = vld [vmem:[%s8702_s6 + $0x48] ss:$12 sps:$4 sm:$0xff]  }
  0x81   :  { %685 = vmatpush1.bf16.msra.mxu0 %v6593_v4  ;;  %v6656_v18 = vld [vmem:[%s8702_s6 + $0x64] ss:$12 sps:$4 sm:$0xff]   ;;  %v6668_v21 = vld [vmem:[%s8702_s6 + $0x60] ss:$12 sps:$4 sm:$0xff]   ;;  %v6674_v22 = vld [vmem:[%s8702_s6 + $0x7c] ss:$12 sps:$4 sm:$0xff]  }
  0x82   :  { %686 = vmatprep.subr.bf16.mxu0 %v6605_v7  ;;  %v6686_v25 = vld [vmem:[%s8702_s6 + $0x78] ss:$12 sps:$4 sm:$0xff]   ;;  %v6692_v26 = vld [vmem:[%s8702_s6 + $0x94] ss:$12 sps:$4 sm:$0xff]   ;;  %v6704_v29 = vld [vmem:[%s8702_s6 + $0x90] ss:$12 sps:$4 sm:$0xff]  }
  0x83   :  { %v6710_v30 = vld [vmem:[%s8702_s6 + $0xac] ss:$12 sps:$4 sm:$0xff]   ;;  %v6722_v33 = vld [vmem:[%s8702_s6 + $0xa8] ss:$12 sps:$4 sm:$0xff]   ;;  %s8748_s2 = sld [smem:[#allocation39_spill]]  ;;  %v8724_v46 = vmov 0.0  }
  0x84   :  { %v5618_v0 = vld [vmem:[%s8747_s11 + $0x4] ss:$12 sps:$4 sm:$0xff]   ;;  %v5620_v1 = vld [vmem:[%s8747_s11] ss:$12 sps:$4 sm:$0xff]   ;;  %v5624_v5 = vld [vmem:[%s8747_s11 + $0x1c] ss:$12 sps:$4 sm:$0xff]  }
  0x85   :  { %349 = vmatprep.subr.bf16.mxu1 %v5618_v0  ;;  %v5626_v6 = vld [vmem:[%s8747_s11 + $0x18] ss:$12 sps:$4 sm:$0xff]   ;;  %v5630_v9 = vld [vmem:[%s8747_s11 + $0x34] ss:$12 sps:$4 sm:$0xff]   ;;  %v5632_v10 = vld [vmem:[%s8747_s11 + $0x30] ss:$12 sps:$4 sm:$0xff]   ;;  %687 = vmatpush1.bf16.msra.mxu0 %v6611_v8 }
  0x86   :  { %350 = vmatpush1.bf16.msra.mxu1 %v5620_v1  ;;  %v5636_v12 = vld [vmem:[%s8747_s11 + $0x4c] ss:$12 sps:$4 sm:$0xff]   ;;  %688 = vmatprep.subr.bf16.mxu0 %v6623_v11  ;;  %v5638_v15 = vld [vmem:[%s8747_s11 + $0x48] ss:$12 sps:$4 sm:$0xff]   ;;  %v5642_v16 = vld [vmem:[%s8747_s11 + $0x64] ss:$12 sps:$4 sm:$0xff]  }
  0x87   :  { %351 = vmatprep.subr.bf16.mxu1 %v5624_v5  ;;  %v5644_v19 = vld [vmem:[%s8747_s11 + $0x60] ss:$12 sps:$4 sm:$0xff]   ;;  %v5648_v20 = vld [vmem:[%s8747_s11 + $0x7c] ss:$12 sps:$4 sm:$0xff]   ;;  %v5650_v23 = vld [vmem:[%s8747_s11 + $0x78] ss:$12 sps:$4 sm:$0xff]  }
  0x88   :  { %v5654_v24 = vld [vmem:[%s8747_s11 + $0x94] ss:$12 sps:$4 sm:$0xff]   ;;  %v5656_v27 = vld [vmem:[%s8747_s11 + $0x90] ss:$12 sps:$4 sm:$0xff]   ;;  %v5660_v28 = vld [vmem:[%s8747_s11 + $0xac] ss:$12 sps:$4 sm:$0xff]  }
  0x89   :  { %689 = vmatpush1.bf16.msra.mxu0 %v6632_v13  ;;  %v5662_v31 = vld [vmem:[%s8747_s11 + $0xa8] ss:$12 sps:$4 sm:$0xff]   ;;  %v5666_v34 = vld [vmem:[%s8748_s2] sm:$0xff]   ;;  %v5671_v38 = vld [vmem:[%s8747_s11 + $0x50] ss:$12 sps:$4 sm:$0xff]   ;;  %vm6390_vm0 = vmmov 0  }
  0x8a   :  { %352 = vmatpush1.bf16.msra.mxu1 %v5626_v6  ;;  %690 = vmatprep.subr.bf16.mxu0 %v6638_v14  ;;  %v5667_v32 = vld [vmem:[%s8747_s11 + $0x8] ss:$12 sps:$4 sm:$0xff]   ;;  %v5668_v35 = vld [vmem:[%s8747_s11 + $0x20] ss:$12 sps:$4 sm:$0xff]   ;;  %v5670_v36 = vld [vmem:[%s8747_s11 + $0x38] ss:$12 sps:$4 sm:$0xff]  }
  0x8b   :  { %353 = vmatprep.subr.bf16.mxu1 %v5630_v9  ;;  %v5669_v37 = vld [vmem:[%s8748_s2 + $0x8] sm:$0xff]   ;;  %v5672_v40 = vld [vmem:[%s8748_s2 + $0x10] sm:$0xff]   ;;  %v5676_v42 = vld [vmem:[%s8747_s11 + $0x98] ss:$12 sps:$4 sm:$0xff]   ;;  %v6859_v55 = vshrl.u32 %v182_v54, 7  ;;  %s8750_s26 = sld [smem:[#allocation43_spill]] }
  0x8c   :  { %v5673_v39 = vld [vmem:[%s8747_s11 + $0x68] ss:$12 sps:$4 sm:$0xff]   ;;  %v5674_v41 = vld [vmem:[%s8747_s11 + $0x80] ss:$12 sps:$4 sm:$0xff]   ;;  %v5675_v43 = vld [vmem:[%s8748_s2 + $0x18] sm:$0xff]   ;;  %s7468_s22 = sld [smem:[#allocation6 + $0x80]] }
  0x8d   :  { %691 = vmatpush1.bf16.msra.mxu0 %v6650_v17  ;;  %v5677_v44 = vld [vmem:[%s8747_s11 + $0xb0] ss:$12 sps:$4 sm:$0xff]   ;;  %v6780_v45 = vld [vmem:[%s8702_s6 + $0x8] ss:$12 sps:$4 sm:$0xff]   ;;  %v6788_v47 = vld [vmem:[%s8702_s6 + $0x20] ss:$12 sps:$4 sm:$0xff]  }
  0x8e   :  { %354 = vmatpush1.bf16.msra.mxu1 %v5632_v10  ;;  %692 = vmatprep.subr.bf16.mxu0 %v6656_v18  ;;  %v6797_v48 = vld [vmem:[%s8702_s6 + $0x38] ss:$12 sps:$4 sm:$0xff]   ;;  %v6804_v49 = vld [vmem:[%s8702_s6 + $0x50] ss:$12 sps:$4 sm:$0xff]   ;;  %v6813_v50 = vld [vmem:[%s8702_s6 + $0x68] ss:$12 sps:$4 sm:$0xff]  }
  0x8f   :  { %355 = vmatprep.subr.bf16.mxu1 %v5636_v12  ;;  %v6820_v51 = vld [vmem:[%s8702_s6 + $0x80] ss:$12 sps:$4 sm:$0xff]   ;;  %v6827_v52 = vld [vmem:[%s8702_s6 + $0x98] ss:$12 sps:$4 sm:$0xff]   ;;  %v6834_v53 = vld [vmem:[%s8702_s6 + $0xb0] ss:$12 sps:$4 sm:$0xff]  }
  0x90   :  { %v6862_v56 = vsub.s32 0, %v6859_v55  ;;  %v6868_v58 = vsub.s32 1, %v6859_v55  ;;  %v6895_v54 = vsub.s32 2, %v6859_v55  ;;  %s7471_s23 = sld [smem:[#allocation6 + $0x100]]  ;;  %s7486_s13 = sld [smem:[#allocation6 + $0x1]]  ;;  %vm1651_vm1 = vcmp.eq.s32.totalorder %v6859_v55, 0 }
  0x91   :  { %693 = vmatpush1.bf16.msra.mxu0 %v6668_v21  ;;  %v180_v57 = vld [vmem:[%s8750_s26] sm:$0x7]  ;;  %s7473_s1 = sld [smem:[#allocation6 + $0x180]]  ;;  %s7490_s14 = sld [smem:[#allocation6 + $0x81]]  ;;  %vm1657_vm2 = vcmp.eq.s32.totalorder %v6859_v55, 1  ;;  %vm1663_vm3 = vcmp.eq.s32.totalorder %v6859_v55, 2 }
  0x92   :  { %356 = vmatpush1.bf16.msra.mxu1 %v5638_v15  ;;  %694 = vmatprep.subr.bf16.mxu0 %v6674_v22  ;;  %8749 = vst [vmem:[#allocation30_spill] sm:$0xff] %v6862_v56  ;;  %8751 = vst [vmem:[#allocation31_spill] sm:$0xff] %v6868_v58  ;;  %v185_v59 = vrot.slane %v180_v57, %v6862_v56  ;;  %v189_v60 = vrot.slane %v180_v57, %v6868_v58  ;;  %s7477_s3 = sld [smem:[#allocation6 + $0x200]]  ;;  %s7497_s30 = sld [smem:[#allocation6 + $0x181]]  ;;  %vm1669_vm4 = vcmp.eq.s32.totalorder %v6859_v55, 3 }
  0x93   :  { %357 = vmatprep.subr.bf16.mxu1 %v5642_v16  ;;  %8752 = vst [vmem:[#allocation32_spill] sm:$0xff] %v6895_v54  ;;  %s7479_s28 = sld [smem:[#allocation6 + $0x280]]  ;;  %s7499_s25 = sld [smem:[#allocation6 + $0x201]]  ;;  %vm1675_vm5 = vcmp.eq.s32.totalorder %v6859_v55, 4  ;;  %vm1681_vm6 = vcmp.eq.s32.totalorder %v6859_v55, 5  ;;  %vm1687_vm7 = vcmp.eq.s32.totalorder %v6859_v55, 6 }
  0x94   :  { %s7482_s11 = sld [smem:[#allocation6 + $0x300]]  ;;  %s7504_s15 = sld [smem:[#allocation6 + $0x281]]  ;;  %vm1693_vm8 = vcmp.eq.s32.totalorder %v6859_v55, 7  ;;  %v7622_v55 = vld [vmem:[%s8706_s10 + $0x34] ss:$12 sps:$4 sm:$0xff]  }
  0x95   :  { %695 = vmatpush1.bf16.msra.mxu0 %v6686_v25  ;;  %s7484_s0 = sld [smem:[#allocation6 + $0x380]]  ;;  %s7506_s29 = sld [smem:[#allocation6 + $0x301]] }
  0x96   :  { %358 = vmatpush1.bf16.msra.mxu1 %v5644_v19  ;;  %696 = vmatprep.subr.bf16.mxu0 %v6692_v26  ;;  %s7509_s4 = sld [smem:[#allocation6 + $0x381]]  ;;  %s4747_s27 = sshll.u32 %s7486_s13, 3 }
  0x97   :  { %359 = vmatprep.subr.bf16.mxu1 %v5648_v20  ;;  %s4749_s26 = sshll.u32 %s7490_s14, 3  ;;  %s8756_s20 = sshll.u32 %s7468_s22, 3 }
  0x98   :  { %s4753_s18 = sshll.u32 %s7497_s30, 3  ;;  %s1655_s5 = scalar_lea.vmem [#allocation3], %s8756_s20 }
  0x99   :  { %697 = vmatpush1.bf16.msra.mxu0 %v6704_v29  ;;  %s4755_s13 = sshll.u32 %s7499_s25, 3  ;;  %s2154_s20 = scalar_lea.vmem [#allocation3], %s4747_s27 }
  0x9a   :  { %360 = vmatpush1.bf16.msra.mxu1 %v5650_v23  ;;  %698 = vmatprep.subr.bf16.mxu0 %v6710_v30  ;;  %s4757_s14 = sshll.u32 %s7504_s15, 3  ;;  %s8759_s27 = sshll.u32 %s7477_s3, 3 }
  0x9b   :  { %361 = vmatprep.subr.bf16.mxu1 %v5654_v24  ;;  %s4695_s2 = sshll.u32 %s7484_s0, 3  ;;  %s4759_s22 = sshll.u32 %s7506_s29, 3 }
  0x9c   :  { %s2169_s3 = scalar_lea.vmem [#allocation3], %s4753_s18  ;;  %s1691_s18 = scalar_lea.vmem [#allocation3], %s4695_s2 }
  0x9d   :  { %699 = vmatpush1.bf16.msra.mxu0 %v6722_v33  ;;  %s2184_s2 = scalar_lea.vmem [#allocation3], %s4759_s22 }
  0x9e   :  { %362 = vmatpush1.bf16.msra.mxu1 %v5656_v27  ;;  %795 = vmatprep.subr.bf16.mxu0 %v6588_v3 }
  0x9f   :  { %363 = vmatprep.subr.bf16.mxu1 %v5660_v28 }
  0xa0   :  { %717 = vmatmul.mubr.bf16.vlgmr.msra.gmra.mrb[0].mxu0 %v8722_v2 }
  0xa1   :  { %796 = vmatpush1.bf16.msra.mxu0 %v6593_v4  ;;  %827 = vmatprep.mubr.bf16.mxu0 %v8722_v2 }
  0xa2   :  { %364 = vmatpush1.bf16.msra.mxu1 %v5662_v31  ;;  %797 = vmatprep.subr.bf16.mxu0 %v6605_v7 }
  0xa3   :  { %5093 = vmatprep.subr.bf16.mxu1 %v5667_v32 }
  0xa5   :  { %382 = vmatmul.mubr.bf16.vlgmr.msra.gmra.mrb[0].mxu1 %v5666_v34  ;;  %798 = vmatpush1.bf16.msra.mxu0 %v6611_v8 }
  0xa6   :  { %5094 = vmatpush3.bf16.msra.mxu1 %v5667_v32  ;;  %391 = vmatprep.mubr.bf16.mxu1 %v8722_v2 }
  0xa7   :  { %5095 = vmatprep.subr.bf16.mxu1 %v5668_v35  ;;  %799 = vmatprep.subr.bf16.mxu0 %v6623_v11 }
  0xa9   :  { %800 = vmatpush1.bf16.msra.mxu0 %v6632_v13 }
  0xaa   :  { %5096 = vmatpush3.bf16.msra.mxu1 %v5668_v35  ;;  %801 = vmatprep.subr.bf16.mxu0 %v6638_v14 }
  0xab   :  { %5097 = vmatprep.subr.bf16.mxu1 %v5670_v36 }
  0xad   :  { %392 = vmatmul.mubr.bf16.gmra.mrb[4].mxu1 %v5669_v37  ;;  %802 = vmatpush1.bf16.msra.mxu0 %v6650_v17 }
  0xae   :  { %5098 = vmatpush3.bf16.msra.mxu1 %v5670_v36  ;;  %401 = vmatprep.mubr.bf16.mxu1 %v8722_v2 }
  0xaf   :  { %5099 = vmatprep.subr.bf16.mxu1 %v5671_v38  ;;  %803 = vmatprep.subr.bf16.mxu0 %v6656_v18 }
  0xb1   :  { %804 = vmatpush1.bf16.msra.mxu0 %v6668_v21 }
  0xb2   :  { %5100 = vmatpush3.bf16.msra.mxu1 %v5671_v38  ;;  %805 = vmatprep.subr.bf16.mxu0 %v6674_v22 }
  0xb3   :  { %5101 = vmatprep.subr.bf16.mxu1 %v5673_v39 }
  0xb5   :  { %402 = vmatmul.mubr.bf16.gmra.mrb[8].mxu1 %v5672_v40  ;;  %806 = vmatpush1.bf16.msra.mxu0 %v6686_v25 }
  0xb6   :  { %5102 = vmatpush3.bf16.msra.mxu1 %v5673_v39  ;;  %411 = vmatprep.mubr.bf16.mxu1 %v8722_v2 }
  0xb7   :  { %5103 = vmatprep.subr.bf16.mxu1 %v5674_v41  ;;  %807 = vmatprep.subr.bf16.mxu0 %v6692_v26 }
  0xb9   :  { %808 = vmatpush1.bf16.msra.mxu0 %v6704_v29 }
  0xba   :  { %5104 = vmatpush3.bf16.msra.mxu1 %v5674_v41  ;;  %809 = vmatprep.subr.bf16.mxu0 %v6710_v30 }
  0xbb   :  { %5105 = vmatprep.subr.bf16.mxu1 %v5676_v42 }
  0xbd   :  { %412 = vmatmul.mubr.bf16.gmra.mrb[12].mxu1 %v5675_v43  ;;  %810 = vmatpush1.bf16.msra.mxu0 %v6722_v33 }
  0xbe   :  { %5106 = vmatpush3.bf16.msra.mxu1 %v5676_v42  ;;  %5109 = vmatprep.mubr.bf16.mxu1 %v5666_v34 }
  0xbf   :  { %5107 = vmatprep.subr.bf16.mxu1 %v5677_v44  ;;  %907 = vmatprep.subr.bf16.mxu0 %v6588_v3 }
  0xc2   :  { %5108 = vmatpush3.bf16.msra.mxu1 %v5677_v44 }
  0xc3   :  { %5117 = vmatprep.subr.bf16.mxu1 %v8724_v46 }
  0xc5   :  { %5110 = vmatmul.mubr.bf16.vlgmr.msra.gmra.mrb[16].mxu1 %v5669_v37 }
  0xc6   :  { %5118 = vmatpush3.bf16.msra.mxu1 %v6780_v45  ;;  %5113 = vmatprep.mubr.bf16.mxu1 %v5672_v40 }
  0xc7   :  { %5119 = vmatprep.subr.bf16.mxu1 %v8724_v46 }
  0xca   :  { %5120 = vmatpush3.bf16.msra.mxu1 %v6788_v47 }
  0xcb   :  { %5121 = vmatprep.subr.bf16.mxu1 %v8724_v46 }
  0xcd   :  { %5114 = vmatmul.mubr.bf16.gmra.mrb[20].mxu1 %v5675_v43 }
  0xce   :  { %5122 = vmatpush3.bf16.msra.mxu1 %v6797_v48  ;;  %5133 = vmatprep.mubr.msk.bf16.mxu1 %vm6390_vm0, %v8724_v46 }
  0xcf   :  { %5123 = vmatprep.subr.bf16.mxu1 %v8724_v46 }
  0xd2   :  { %5124 = vmatpush3.bf16.msra.mxu1 %v6804_v49 }
  0xd3   :  { %5125 = vmatprep.subr.bf16.mxu1 %v8724_v46 }
  0xd6   :  { %5126 = vmatpush3.bf16.msra.mxu1 %v6813_v50 }
  0xd7   :  { %5127 = vmatprep.subr.bf16.mxu1 %v8724_v46 }
  0xda   :  { %5128 = vmatpush3.bf16.msra.mxu1 %v6820_v51 }
  0xdb   :  { %5129 = vmatprep.subr.bf16.mxu1 %v8724_v46 }
  0xde   :  { %5130 = vmatpush3.bf16.msra.mxu1 %v6827_v52 }
  0xdf   :  { %5131 = vmatprep.subr.bf16.mxu1 %v8724_v46 }
  0xe2   :  { %5132 = vmatpush3.bf16.msra.mxu1 %v6834_v53 }
  0xe3   :  { %5137 = vmatprep.subr.bf16.mxu1 %v8724_v46 }
  0xe5   :  { %5134 = vmatmul.mubr.bf16.vlgmr.msra.gmra.mrb[24].mxu1 %v8722_v2 }
  0xe6   :  { %5138 = vmatpush3.bf16.msra.mxu1 %v6780_v45  ;;  %5153 = vmatprep.mubr.msk.bf16.mxu1 %vm6390_vm0, %v8724_v46 }
  0xe7   :  { %5139 = vmatprep.subr.bf16.mxu1 %v8724_v46 }
  0xea   :  { %5140 = vmatpush3.bf16.msra.mxu1 %v6788_v47 }
  0xeb   :  { %5141 = vmatprep.subr.bf16.mxu1 %v8724_v46 }
  0xee   :  { %5142 = vmatpush3.bf16.msra.mxu1 %v6797_v48 }
  0xef   :  { %5143 = vmatprep.subr.bf16.mxu1 %v8724_v46 }
  0xf2   :  { %5144 = vmatpush3.bf16.msra.mxu1 %v6804_v49 }
  0xf3   :  { %5145 = vmatprep.subr.bf16.mxu1 %v8724_v46 }
  0xf6   :  { %5146 = vmatpush3.bf16.msra.mxu1 %v6813_v50 }
  0xf7   :  { %5147 = vmatprep.subr.bf16.mxu1 %v8724_v46 }
  0xfa   :  { %5148 = vmatpush3.bf16.msra.mxu1 %v6820_v51 }
  0xfb   :  { %5149 = vmatprep.subr.bf16.mxu1 %v8724_v46 }
  0xfe   :  { %5150 = vmatpush3.bf16.msra.mxu1 %v6827_v52 }
  0xff   :  { %5151 = vmatprep.subr.bf16.mxu1 %v8724_v46 }
 0x102   :  { %5152 = vmatpush3.bf16.msra.mxu1 %v6834_v53 }
 0x103   :  { %5157 = vmatprep.subr.bf16.mxu1 %v8724_v46 }
 0x173   :  { %v718_v3 = vpop.f32.mrb[0].mxu0 }
 0x174   :  { %v720_v9 = vpop.f32.mrb[1].mxu0 }
 0x175   :  { %v722_v15 = vpop.f32.mrb[2].mxu0 }
 0x176   :  { %v723_v16 = vpop.f32.mrb[3].mxu0 }
 0x178   :  { %v383_v61 = vpop.f32.mrb[0].mxu1 }
 0x179   :  { %v384_v62 = vadd.f32 %v383_v61, %v185_v59  ;;  %v385_v63 = vpop.f32.mrb[1].mxu1 }
 0x17a   :  { %v386_v0 = vadd.f32 %v385_v63, %v189_v60  ;;  %v387_v1 = vpop.f32.mrb[2].mxu1 }
 0x17b   :  { %v6872_v4 = vadd.f32 %v387_v1, %v185_v59  ;;  %v765_v5 = vadd.f32 %v718_v3, %v384_v62  ;;  %v389_v6 = vpop.f32.mrb[3].mxu1  ;;  %v193_v3 = vrot.slane %v180_v57, %v6895_v54 }
 0x17c   :  { %v6874_v10 = vadd.f32 %v389_v6, %v189_v60  ;;  %v772_v12 = vadd.f32 %v720_v9, %v386_v0 }
 0x180   :  { %v393_v19 = vpop.f32.mrb[4].mxu1 }
 0x181   :  { %v6876_v20 = vadd.f32 %v393_v19, %v185_v59  ;;  %v395_v23 = vpop.f32.mrb[5].mxu1  ;;  %v4664_v19 = vmul.f32 -1.442695, %v765_v5 }
 0x182   :  { %v6878_v24 = vadd.f32 %v395_v23, %v189_v60  ;;  %v397_v27 = vpop.f32.mrb[6].mxu1 }
 0x183   :  { %v6880_v28 = vadd.f32 %v397_v27, %v185_v59  ;;  %v399_v31 = vpop.f32.mrb[7].mxu1  ;;  %5878 = vpow2.f32 %v4664_v19 }
 0x184   :  { %v6882_v32 = vadd.f32 %v399_v31, %v189_v60 }
 0x188   :  { %v403_v34 = vpop.f32.mrb[8].mxu1 }
 0x189   :  { %v6884_v35 = vadd.f32 %v403_v34, %v185_v59  ;;  %v405_v36 = vpop.f32.mrb[9].mxu1 }
 0x18a   :  { %v6886_v37 = vadd.f32 %v405_v36, %v189_v60  ;;  %v407_v38 = vpop.f32.mrb[10].mxu1 }
 0x18b   :  { %v6888_v39 = vadd.f32 %v407_v38, %v185_v59  ;;  %v409_v40 = vpop.f32.mrb[11].mxu1 }
 0x18c   :  { %v6890_v41 = vadd.f32 %v409_v40, %v189_v60 }
 0x18d   :  { %v5879_v5 = vpop.eup %5878 }
 0x190   :  { %v413_v42 = vpop.f32.mrb[12].mxu1 }
 0x191   :  { %v6892_v43 = vadd.f32 %v413_v42, %v185_v59  ;;  %v415_v44 = vpop.f32.mrb[13].mxu1 }
 0x192   :  { %v6897_v61 = vadd.f32 %v415_v44, %v189_v60  ;;  %v417_v62 = vpop.f32.mrb[14].mxu1  ;;  %v4665_v44 = vmul.f32 -1.442695, %v772_v12 }
 0x193   :  { %v6899_v63 = vadd.f32 %v417_v62, %v185_v59  ;;  %v419_v0 = vpop.f32.mrb[15].mxu1  ;;  %v769_v62 = vadd.f32 1.0, %v5879_v5 }
 0x194   :  { %v6901_v1 = vadd.f32 %v419_v0, %v189_v60  ;;  %5880 = vpow2.f32 %v4665_v44 }
 0x195   :  { %5882 = vrcp.f32 %v769_v62 }
 0x198   :  { %v5111_v6 = vpop.f32.mrb[16].mxu1 }
 0x199   :  { %v6904_v9 = vadd.f32 %v5111_v6, %v193_v3  ;;  %v456_v15 = vpop.f32.mrb[17].mxu1  ;;  %v6918_v6 = vld [vmem:[#allocation10] ss:$0 sm:$0xff] }
 0x19a   :  { %v5112_v16 = vpop.f32.mrb[18].mxu1 }
 0x19b   :  { %v6906_v23 = vadd.f32 %v5112_v16, %v193_v3  ;;  %v459_v27 = vpop.f32.mrb[19].mxu1 }
 0x19c   :  { %v6908_v31 = vadd.f32 %v459_v27, %v193_v3 }
 0x19e   :  { %v5881_v0 = vpop.eup %5880 }
 0x19f   :  { %v776_v16 = vadd.f32 1.0, %v5881_v0 }
 0x1a0   :  { %v5115_v34 = vpop.f32.mrb[20].mxu1 }
 0x1a1   :  { %v6910_v59 = vadd.f32 %v5115_v34, %v193_v3  ;;  %v472_v36 = vpop.f32.mrb[21].mxu1  ;;  %5884 = vrcp.f32 %v776_v16 }
 0x1a2   :  { %v6912_v60 = vadd.f32 %v472_v36, %v193_v3  ;;  %v5116_v38 = vpop.f32.mrb[22].mxu1  ;;  %v5883_v36 = vpop.eup %5882 }
 0x1a3   :  { %v6914_v57 = vadd.f32 %v5116_v38, %v193_v3  ;;  %v475_v40 = vpop.f32.mrb[23].mxu1  ;;  %v457_v38 = vadd.f32 %v456_v15, %v193_v3 }
 0x1a4   :  { %v6916_v42 = vadd.f32 %v475_v40, %v193_v3 }
 0x1ab   :  { %v5885_v12 = vpop.eup %5884 }
 0x1ac   :  { %v783_v44 = vsub.f32 1.0, %v5885_v12  ;;  %v785_v58 = vmul.f32 0.0, %v5885_v12 }
 0x1b8   :  { %v759_v19 = vpop.f32.mrb[24].mxu1 }
 0x1b9   :  { %v779_v27 = vadd.f32 %v6918_v6, %v759_v19  ;;  %v5135_v34 = vpop.f32.mrb[25].mxu1 }
 0x1ba   :  { %v762_v2 = vpop.f32.mrb[26].mxu1 }
 0x1bb   :  { %v780_v46 = vmul.f32 %v5883_v36, %v779_v27  ;;  %v5136_v40 = vpop.f32.mrb[27].mxu1  ;;  %v6929_v2 = vld [vmem:[%s8702_s6] ss:$12 sps:$4 sm:$0xff]  }
 0x1bd   :  { %v781_v54 = vadd.f32 %v780_v46, %v457_v38  ;;  %v8753_v46 = vmov 0.0  }
 0x1bf   :  { %5886 = vtanh.f32 %v781_v54 }
 0x1c9   :  { %v5887_v5 = vpop.eup %5886 }
 0x1ca   :  { %v784_v62 = vmul.f32 %v5887_v5, %v783_v44  ;;  %v7003_v5 = vld [vmem:[%s8702_s6 + $0x34] ss:$12 sps:$4 sm:$0xff]  }
 0x1cc   :  { %v6921_v56 = vadd.f32 %v785_v58, %v784_v62  ;;  %v8754_v58 = vmov 0   ;;  %v7010_v62 = vld [vmem:[%s8702_s6 + $0x30] ss:$12 sps:$4 sm:$0xff]  }
 0x1ce   :  { %787 = vst [vmem:[#allocation3] sm:$0xff] %v6921_v56  ;;  %v794_v0 = vpack.c.bf16 %v6921_v56, %v6921_v56 }
 0x1d0   :  { %828 = vmatmul.mubr.bf16.vlgmr.msra.gmra.mrb[4].mxu0 %v794_v0  ;;  %5154 = vmatmul.mubr.bf16.vlgmr.msra.gmra.mrb[28].mxu1 %v794_v0  ;;  %v7017_v0 = vld [vmem:[%s8702_s6 + $0x4c] ss:$12 sps:$4 sm:$0xff]  }
 0x1d1   :  { %908 = vmatpush1.bf16.msra.mxu0 %v6929_v2  ;;  %5158 = vmatpush3.bf16.msra.mxu1 %v6780_v45 }
 0x1d2   :  { %909 = vmatprep.subr.bf16.mxu0 %v6605_v7  ;;  %5159 = vmatprep.subr.bf16.mxu1 %v8753_v46  ;;  %v6967_v7 = vld [vmem:[%s8702_s6 + $0x4] ss:$12 sps:$4 sm:$0xff]  }
 0x1d3   :  { %939 = vmatprep.mubr.bf16.mxu0 %v8754_v58  ;;  %5173 = vmatprep.mubr.msk.bf16.mxu1 %vm6390_vm0, %v8753_v46 }
 0x1d5   :  { %910 = vmatpush1.bf16.msra.mxu0 %v6611_v8  ;;  %5160 = vmatpush3.bf16.msra.mxu1 %v6788_v47 }
 0x1d6   :  { %911 = vmatprep.subr.bf16.mxu0 %v6623_v11  ;;  %5161 = vmatprep.subr.bf16.mxu1 %v8753_v46 }
 0x1d9   :  { %912 = vmatpush1.bf16.msra.mxu0 %v6632_v13  ;;  %5162 = vmatpush3.bf16.msra.mxu1 %v6797_v48 }
 0x1da   :  { %913 = vmatprep.subr.bf16.mxu0 %v6638_v14  ;;  %5163 = vmatprep.subr.bf16.mxu1 %v8753_v46 }
 0x1dd   :  { %914 = vmatpush1.bf16.msra.mxu0 %v6650_v17  ;;  %5164 = vmatpush3.bf16.msra.mxu1 %v6804_v49 }
 0x1de   :  { %915 = vmatprep.subr.bf16.mxu0 %v6656_v18  ;;  %5165 = vmatprep.subr.bf16.mxu1 %v8753_v46 }
 0x1e1   :  { %916 = vmatpush1.bf16.msra.mxu0 %v6668_v21  ;;  %5166 = vmatpush3.bf16.msra.mxu1 %v6813_v50 }
 0x1e2   :  { %917 = vmatprep.subr.bf16.mxu0 %v6674_v22  ;;  %5167 = vmatprep.subr.bf16.mxu1 %v8753_v46 }
 0x1e5   :  { %918 = vmatpush1.bf16.msra.mxu0 %v6686_v25  ;;  %5168 = vmatpush3.bf16.msra.mxu1 %v6820_v51 }
 0x1e6   :  { %919 = vmatprep.subr.bf16.mxu0 %v6692_v26  ;;  %5169 = vmatprep.subr.bf16.mxu1 %v8753_v46 }
 0x1e9   :  { %920 = vmatpush1.bf16.msra.mxu0 %v6704_v29  ;;  %5170 = vmatpush3.bf16.msra.mxu1 %v6827_v52 }
 0x1ea   :  { %921 = vmatprep.subr.bf16.mxu0 %v6710_v30  ;;  %5171 = vmatprep.subr.bf16.mxu1 %v8753_v46 }
 0x1ed   :  { %922 = vmatpush1.bf16.msra.mxu0 %v6722_v33  ;;  %5172 = vmatpush3.bf16.msra.mxu1 %v6834_v53 }
 0x1ee   :  { %1019 = vmatprep.subr.bf16.mxu0 %v6967_v7  ;;  %5177 = vmatprep.subr.bf16.mxu1 %v8753_v46 }
 0x2a3   :  { %v829_v8 = vpop.f32.mrb[4].mxu0  ;;  %v870_v11 = vpop.f32.mrb[28].mxu1 }
 0x2a4   :  { %v876_v13 = vadd.f32 %v829_v8, %v6872_v4  ;;  %v831_v14 = vpop.f32.mrb[5].mxu0  ;;  %v5155_v17 = vpop.f32.mrb[29].mxu1  ;;  %v890_v16 = vadd.f32 %v6918_v6, %v870_v11  ;;  %v7024_v8 = vld [vmem:[%s8702_s6 + $0x48] ss:$12 sps:$4 sm:$0xff]   ;;  %v7031_v11 = vld [vmem:[%s8702_s6 + $0x64] ss:$12 sps:$4 sm:$0xff]  }
 0x2a5   :  { %v883_v18 = vadd.f32 %v831_v14, %v6874_v10  ;;  %v833_v21 = vpop.f32.mrb[6].mxu0  ;;  %v873_v22 = vpop.f32.mrb[30].mxu1  ;;  %v7045_v14 = vld [vmem:[%s8702_s6 + $0x7c] ss:$12 sps:$4 sm:$0xff]   ;;  %v7052_v17 = vld [vmem:[%s8702_s6 + $0x78] ss:$12 sps:$4 sm:$0xff]  }
 0x2a6   :  { %v4666_v25 = vmul.f32 -1.442695, %v876_v13  ;;  %v834_v26 = vpop.f32.mrb[7].mxu0  ;;  %v5156_v29 = vpop.f32.mrb[31].mxu1  ;;  %v7038_v13 = vld [vmem:[%s8702_s6 + $0x60] ss:$12 sps:$4 sm:$0xff]  }
 0x2a7   :  { %v4667_v30 = vmul.f32 -1.442695, %v883_v18  ;;  %v7059_v18 = vld [vmem:[%s8702_s6 + $0x94] ss:$12 sps:$4 sm:$0xff]   ;;  %v7066_v21 = vld [vmem:[%s8702_s6 + $0x90] ss:$12 sps:$4 sm:$0xff]  }
 0x2a8   :  { %5888 = vpow2.f32 %v4666_v25  ;;  %v7073_v22 = vld [vmem:[%s8702_s6 + $0xac] ss:$12 sps:$4 sm:$0xff]   ;;  %v7080_v25 = vld [vmem:[%s8702_s6 + $0xa8] ss:$12 sps:$4 sm:$0xff]  }
 0x2a9   :  { %5890 = vpow2.f32 %v4667_v30 }
 0x2b2   :  { %v5889_v33 = vpop.eup %5888 }
 0x2b3   :  { %v880_v54 = vadd.f32 1.0, %v5889_v33  ;;  %v5891_v3 = vpop.eup %5890 }
 0x2b4   :  { %v887_v15 = vadd.f32 1.0, %v5891_v3 }
 0x2b5   :  { %5892 = vrcp.f32 %v880_v54 }
 0x2b6   :  { %5894 = vrcp.f32 %v887_v15 }
 0x2bf   :  { %v5893_v4 = vpop.eup %5892 }
 0x2c0   :  { %v891_v19 = vmul.f32 %v5893_v4, %v890_v16  ;;  %v5895_v27 = vpop.eup %5894 }
 0x2c1   :  { %v894_v34 = vsub.f32 1.0, %v5895_v27  ;;  %v896_v40 = vmul.f32 %v5895_v27, %v6921_v56  ;;  %v6996_v56 = vld [vmem:[%s8702_s6 + $0x18] ss:$12 sps:$4 sm:$0xff]  }
 0x2c2   :  { %v892_v10 = vadd.f32 %v891_v19, %v6908_v31  ;;  %v6986_v31 = vld [vmem:[%s8702_s6 + $0x1c] ss:$12 sps:$4 sm:$0xff]  }
 0x2c4   :  { %5896 = vtanh.f32 %v892_v10 }
 0x2ce   :  { %v5897_v36 = vpop.eup %5896 }
 0x2cf   :  { %v895_v38 = vmul.f32 %v5897_v36, %v894_v34 }
 0x2d1   :  { %v6976_v12 = vadd.f32 %v896_v40, %v895_v38 }
 0x2d3   :  { %899 = vst [vmem:[#allocation3 + $0x8] sm:$0xff] %v6976_v12  ;;  %v906_v44 = vpack.c.bf16 %v6976_v12, %v6976_v12 }
 0x2d5   :  { %940 = vmatmul.mubr.bf16.vlgmr.msra.gmra.mrb[8].mxu0 %v906_v44  ;;  %5174 = vmatmul.mubr.bf16.vlgmr.msra.gmra.mrb[32].mxu1 %v906_v44 }
 0x2d6   :  { %1020 = vmatpush1.bf16.msra.mxu0 %v6929_v2  ;;  %5178 = vmatpush3.bf16.msra.mxu1 %v6780_v45 }
 0x2d7   :  { %1021 = vmatprep.subr.bf16.mxu0 %v6986_v31  ;;  %5179 = vmatprep.subr.bf16.mxu1 %v8753_v46 }
 0x2d8   :  { %1051 = vmatprep.mubr.bf16.mxu0 %v8754_v58  ;;  %5193 = vmatprep.mubr.msk.bf16.mxu1 %vm6390_vm0, %v8753_v46 }
 0x2da   :  { %1022 = vmatpush1.bf16.msra.mxu0 %v6996_v56  ;;  %5180 = vmatpush3.bf16.msra.mxu1 %v6788_v47 }
 0x2db   :  { %1023 = vmatprep.subr.bf16.mxu0 %v7003_v5  ;;  %5181 = vmatprep.subr.bf16.mxu1 %v8753_v46 }
 0x2de   :  { %1024 = vmatpush1.bf16.msra.mxu0 %v7010_v62  ;;  %5182 = vmatpush3.bf16.msra.mxu1 %v6797_v48 }
 0x2df   :  { %1025 = vmatprep.subr.bf16.mxu0 %v7017_v0  ;;  %5183 = vmatprep.subr.bf16.mxu1 %v8753_v46 }
 0x2e2   :  { %1026 = vmatpush1.bf16.msra.mxu0 %v7024_v8  ;;  %5184 = vmatpush3.bf16.msra.mxu1 %v6804_v49 }
 0x2e3   :  { %1027 = vmatprep.subr.bf16.mxu0 %v7031_v11  ;;  %5185 = vmatprep.subr.bf16.mxu1 %v8753_v46 }
 0x2e6   :  { %1028 = vmatpush1.bf16.msra.mxu0 %v7038_v13  ;;  %5186 = vmatpush3.bf16.msra.mxu1 %v6813_v50 }
 0x2e7   :  { %1029 = vmatprep.subr.bf16.mxu0 %v7045_v14  ;;  %5187 = vmatprep.subr.bf16.mxu1 %v8753_v46 }
 0x2ea   :  { %1030 = vmatpush1.bf16.msra.mxu0 %v7052_v17  ;;  %5188 = vmatpush3.bf16.msra.mxu1 %v6820_v51 }
 0x2eb   :  { %1031 = vmatprep.subr.bf16.mxu0 %v7059_v18  ;;  %5189 = vmatprep.subr.bf16.mxu1 %v8753_v46 }
 0x2ee   :  { %1032 = vmatpush1.bf16.msra.mxu0 %v7066_v21  ;;  %5190 = vmatpush3.bf16.msra.mxu1 %v6827_v52 }
 0x2ef   :  { %1033 = vmatprep.subr.bf16.mxu0 %v7073_v22  ;;  %5191 = vmatprep.subr.bf16.mxu1 %v8753_v46 }
 0x2f2   :  { %1034 = vmatpush1.bf16.msra.mxu0 %v7080_v25  ;;  %5192 = vmatpush3.bf16.msra.mxu1 %v6834_v53 }
 0x2f3   :  { %1131 = vmatprep.subr.bf16.mxu0 %v6967_v7  ;;  %5197 = vmatprep.subr.bf16.mxu1 %v8753_v46 }
 0x3a8   :  { %v941_v26 = vpop.f32.mrb[8].mxu0  ;;  %v982_v29 = vpop.f32.mrb[32].mxu1 }
 0x3a9   :  { %v988_v30 = vadd.f32 %v941_v26, %v6876_v20  ;;  %v943_v33 = vpop.f32.mrb[9].mxu0  ;;  %v5175_v54 = vpop.f32.mrb[33].mxu1  ;;  %v1002_v44 = vadd.f32 %v6918_v6, %v982_v29 }
 0x3aa   :  { %v995_v3 = vadd.f32 %v943_v33, %v6878_v24  ;;  %v945_v15 = vpop.f32.mrb[10].mxu0  ;;  %v985_v16 = vpop.f32.mrb[34].mxu1 }
 0x3ab   :  { %v4668_v4 = vmul.f32 -1.442695, %v988_v30  ;;  %v946_v19 = vpop.f32.mrb[11].mxu0  ;;  %v5176_v10 = vpop.f32.mrb[35].mxu1 }
 0x3ac   :  { %v4669_v27 = vmul.f32 -1.442695, %v995_v3 }
 0x3ad   :  { %5898 = vpow2.f32 %v4668_v4 }
 0x3ae   :  { %5900 = vpow2.f32 %v4669_v27 }
 0x3b7   :  { %v5899_v34 = vpop.eup %5898 }
 0x3b8   :  { %v992_v36 = vadd.f32 1.0, %v5899_v34  ;;  %v5901_v38 = vpop.eup %5900 }
 0x3b9   :  { %v999_v40 = vadd.f32 1.0, %v5901_v38 }
 0x3ba   :  { %5902 = vrcp.f32 %v992_v36 }
 0x3bb   :  { %5904 = vrcp.f32 %v999_v40 }
 0x3c4   :  { %v5903_v20 = vpop.eup %5902 }
 0x3c5   :  { %v1003_v26 = vmul.f32 %v5903_v20, %v1002_v44  ;;  %v5905_v33 = vpop.eup %5904 }
 0x3c6   :  { %v1006_v30 = vsub.f32 1.0, %v5905_v33  ;;  %v1008_v3 = vmul.f32 %v5905_v33, %v6976_v12 }
 0x3c7   :  { %v1004_v24 = vadd.f32 %v1003_v26, %v6904_v9 }
 0x3c9   :  { %5906 = vtanh.f32 %v1004_v24 }
 0x3d3   :  { %v5907_v54 = vpop.eup %5906 }
 0x3d4   :  { %v1007_v15 = vmul.f32 %v5907_v54, %v1006_v30 }
 0x3d6   :  { %v7091_v16 = vadd.f32 %v1008_v3, %v1007_v15 }
 0x3d8   :  { %1011 = vst [vmem:[#allocation3 + $0x10] sm:$0xff] %v7091_v16  ;;  %v1018_v4 = vpack.c.bf16 %v7091_v16, %v7091_v16 }
 0x3da   :  { %1052 = vmatmul.mubr.bf16.vlgmr.msra.gmra.mrb[12].mxu0 %v1018_v4  ;;  %5194 = vmatmul.mubr.bf16.vlgmr.msra.gmra.mrb[36].mxu1 %v1018_v4 }
 0x3db   :  { %1132 = vmatpush1.bf16.msra.mxu0 %v6929_v2  ;;  %5198 = vmatpush3.bf16.msra.mxu1 %v6780_v45 }
 0x3dc   :  { %1133 = vmatprep.subr.bf16.mxu0 %v6986_v31  ;;  %5199 = vmatprep.subr.bf16.mxu1 %v8753_v46 }
 0x3dd   :  { %1163 = vmatprep.mubr.bf16.mxu0 %v8754_v58  ;;  %5213 = vmatprep.mubr.msk.bf16.mxu1 %vm6390_vm0, %v8753_v46 }
 0x3df   :  { %1134 = vmatpush1.bf16.msra.mxu0 %v6996_v56  ;;  %5200 = vmatpush3.bf16.msra.mxu1 %v6788_v47 }
 0x3e0   :  { %1135 = vmatprep.subr.bf16.mxu0 %v7003_v5  ;;  %5201 = vmatprep.subr.bf16.mxu1 %v8753_v46 }
 0x3e3   :  { %1136 = vmatpush1.bf16.msra.mxu0 %v7010_v62  ;;  %5202 = vmatpush3.bf16.msra.mxu1 %v6797_v48 }
 0x3e4   :  { %1137 = vmatprep.subr.bf16.mxu0 %v7017_v0  ;;  %5203 = vmatprep.subr.bf16.mxu1 %v8753_v46 }
 0x3e7   :  { %1138 = vmatpush1.bf16.msra.mxu0 %v7024_v8  ;;  %5204 = vmatpush3.bf16.msra.mxu1 %v6804_v49 }
 0x3e8   :  { %1139 = vmatprep.subr.bf16.mxu0 %v7031_v11  ;;  %5205 = vmatprep.subr.bf16.mxu1 %v8753_v46 }
 0x3eb   :  { %1140 = vmatpush1.bf16.msra.mxu0 %v7038_v13  ;;  %5206 = vmatpush3.bf16.msra.mxu1 %v6813_v50 }
 0x3ec   :  { %1141 = vmatprep.subr.bf16.mxu0 %v7045_v14  ;;  %5207 = vmatprep.subr.bf16.mxu1 %v8753_v46 }
 0x3ef   :  { %1142 = vmatpush1.bf16.msra.mxu0 %v7052_v17  ;;  %5208 = vmatpush3.bf16.msra.mxu1 %v6820_v51 }
 0x3f0   :  { %1143 = vmatprep.subr.bf16.mxu0 %v7059_v18  ;;  %5209 = vmatprep.subr.bf16.mxu1 %v8753_v46 }
 0x3f3   :  { %1144 = vmatpush1.bf16.msra.mxu0 %v7066_v21  ;;  %5210 = vmatpush3.bf16.msra.mxu1 %v6827_v52 }
 0x3f4   :  { %1145 = vmatprep.subr.bf16.mxu0 %v7073_v22  ;;  %5211 = vmatprep.subr.bf16.mxu1 %v8753_v46 }
 0x3f7   :  { %1146 = vmatpush1.bf16.msra.mxu0 %v7080_v25  ;;  %5212 = vmatpush3.bf16.msra.mxu1 %v6834_v53 }
 0x3f8   :  { %1243 = vmatprep.subr.bf16.mxu0 %v6967_v7  ;;  %5217 = vmatprep.subr.bf16.mxu1 %v8753_v46 }
 0x4ad   :  { %v1053_v9 = vpop.f32.mrb[12].mxu0  ;;  %v1094_v12 = vpop.f32.mrb[36].mxu1 }
 0x4ae   :  { %v1100_v29 = vadd.f32 %v1053_v9, %v6880_v28  ;;  %v1055_v19 = vpop.f32.mrb[13].mxu0  ;;  %v5195_v10 = vpop.f32.mrb[37].mxu1  ;;  %v1114_v54 = vadd.f32 %v6918_v6, %v1094_v12 }
 0x4af   :  { %v1107_v27 = vadd.f32 %v1055_v19, %v6882_v32  ;;  %v1057_v34 = vpop.f32.mrb[14].mxu0  ;;  %v1097_v36 = vpop.f32.mrb[38].mxu1 }
 0x4b0   :  { %v4670_v38 = vmul.f32 -1.442695, %v1100_v29  ;;  %v1058_v40 = vpop.f32.mrb[15].mxu0  ;;  %v5196_v44 = vpop.f32.mrb[39].mxu1 }
 0x4b1   :  { %v4671_v20 = vmul.f32 -1.442695, %v1107_v27 }
 0x4b2   :  { %5908 = vpow2.f32 %v4670_v38 }
 0x4b3   :  { %5910 = vpow2.f32 %v4671_v20 }
 0x4bc   :  { %v5909_v26 = vpop.eup %5908 }
 0x4bd   :  { %v1104_v24 = vadd.f32 1.0, %v5909_v26  ;;  %v5911_v33 = vpop.eup %5910 }
 0x4be   :  { %v1111_v30 = vadd.f32 1.0, %v5911_v33 }
 0x4bf   :  { %5912 = vrcp.f32 %v1104_v24 }
 0x4c0   :  { %5914 = vrcp.f32 %v1111_v30 }
 0x4c9   :  { %v5913_v28 = vpop.eup %5912 }
 0x4ca   :  { %v1115_v15 = vmul.f32 %v5913_v28, %v1114_v54  ;;  %v5915_v3 = vpop.eup %5914 }
 0x4cb   :  { %v1118_v4 = vsub.f32 1.0, %v5915_v3  ;;  %v1120_v19 = vmul.f32 %v5915_v3, %v7091_v16 }
 0x4cc   :  { %v1116_v32 = vadd.f32 %v1115_v15, %v6906_v23 }
 0x4ce   :  { %5916 = vtanh.f32 %v1116_v32 }
 0x4d8   :  { %v5917_v9 = vpop.eup %5916 }
 0x4d9   :  { %v1119_v29 = vmul.f32 %v5917_v9, %v1118_v4 }
 0x4db   :  { %v7136_v10 = vadd.f32 %v1120_v19, %v1119_v29  ;;  %v7202_v19 = vld [vmem:[%s8702_s6 + $0x20] ss:$12 sps:$4 sm:$0xff]  }
 0x4dd   :  { %1123 = vst [vmem:[#allocation3 + $0x18] sm:$0xff] %v7136_v10  ;;  %v1130_v27 = vpack.c.bf16 %v7136_v10, %v7136_v10 }
 0x4df   :  { %1164 = vmatmul.mubr.bf16.vlgmr.msra.gmra.mrb[16].mxu0 %v1130_v27  ;;  %5214 = vmatmul.mubr.bf16.vlgmr.msra.gmra.mrb[40].mxu1 %v1130_v27  ;;  %v7220_v27 = vld [vmem:[%s8702_s6 + $0x50] ss:$12 sps:$4 sm:$0xff]  }
 0x4e0   :  { %1244 = vmatpush1.bf16.msra.mxu0 %v6929_v2  ;;  %5218 = vmatpush3.bf16.msra.mxu1 %v6780_v45 }
 0x4e1   :  { %1245 = vmatprep.subr.bf16.mxu0 %v6986_v31  ;;  %5219 = vmatprep.subr.bf16.mxu1 %v8753_v46 }
 0x4e2   :  { %1275 = vmatprep.mubr.bf16.mxu0 %v8754_v58  ;;  %5233 = vmatprep.mubr.msk.bf16.mxu1 %vm6390_vm0, %v8753_v46 }
 0x4e4   :  { %1246 = vmatpush1.bf16.msra.mxu0 %v6996_v56  ;;  %5220 = vmatpush3.bf16.msra.mxu1 %v6788_v47 }
 0x4e5   :  { %1247 = vmatprep.subr.bf16.mxu0 %v7003_v5  ;;  %5221 = vmatprep.subr.bf16.mxu1 %v8753_v46 }
 0x4e8   :  { %1248 = vmatpush1.bf16.msra.mxu0 %v7010_v62  ;;  %5222 = vmatpush3.bf16.msra.mxu1 %v6797_v48 }
 0x4e9   :  { %1249 = vmatprep.subr.bf16.mxu0 %v7017_v0  ;;  %5223 = vmatprep.subr.bf16.mxu1 %v8753_v46 }
 0x4ec   :  { %1250 = vmatpush1.bf16.msra.mxu0 %v7024_v8  ;;  %5224 = vmatpush3.bf16.msra.mxu1 %v6804_v49 }
 0x4ed   :  { %1251 = vmatprep.subr.bf16.mxu0 %v7031_v11  ;;  %5225 = vmatprep.subr.bf16.mxu1 %v8753_v46 }
 0x4f0   :  { %1252 = vmatpush1.bf16.msra.mxu0 %v7038_v13  ;;  %5226 = vmatpush3.bf16.msra.mxu1 %v6813_v50 }
 0x4f1   :  { %1253 = vmatprep.subr.bf16.mxu0 %v7045_v14  ;;  %5227 = vmatprep.subr.bf16.mxu1 %v8753_v46 }
 0x4f4   :  { %1254 = vmatpush1.bf16.msra.mxu0 %v7052_v17  ;;  %5228 = vmatpush3.bf16.msra.mxu1 %v6820_v51 }
 0x4f5   :  { %1255 = vmatprep.subr.bf16.mxu0 %v7059_v18  ;;  %5229 = vmatprep.subr.bf16.mxu1 %v8753_v46 }
 0x4f8   :  { %1256 = vmatpush1.bf16.msra.mxu0 %v7066_v21  ;;  %5230 = vmatpush3.bf16.msra.mxu1 %v6827_v52 }
 0x4f9   :  { %1257 = vmatprep.subr.bf16.mxu0 %v7073_v22  ;;  %5231 = vmatprep.subr.bf16.mxu1 %v8753_v46 }
 0x4fc   :  { %1258 = vmatpush1.bf16.msra.mxu0 %v7080_v25  ;;  %5232 = vmatpush3.bf16.msra.mxu1 %v6834_v53 }
 0x4fd   :  { %1355 = vmatprep.subr.bf16.mxu0 %v6967_v7  ;;  %5237 = vmatprep.subr.bf16.mxu1 %v8753_v46 }
 0x5b2   :  { %v1165_v45 = vpop.f32.mrb[16].mxu0  ;;  %v1206_v47 = vpop.f32.mrb[40].mxu1 }
 0x5b3   :  { %v1212_v48 = vadd.f32 %v1165_v45, %v6884_v35  ;;  %v1167_v49 = vpop.f32.mrb[17].mxu0  ;;  %v5215_v23 = vpop.f32.mrb[41].mxu1  ;;  %v1226_v30 = vadd.f32 %v6918_v6, %v1206_v47 }
 0x5b4   :  { %v1219_v16 = vadd.f32 %v1167_v49, %v6886_v37  ;;  %v1169_v12 = vpop.f32.mrb[18].mxu0  ;;  %v1209_v34 = vpop.f32.mrb[42].mxu1 }
 0x5b5   :  { %v4672_v36 = vmul.f32 -1.442695, %v1212_v48  ;;  %v1170_v38 = vpop.f32.mrb[19].mxu0  ;;  %v5216_v40 = vpop.f32.mrb[43].mxu1 }
 0x5b6   :  { %v4673_v44 = vmul.f32 -1.442695, %v1219_v16 }
 0x5b7   :  { %5918 = vpow2.f32 %v4672_v36 }
 0x5b8   :  { %5920 = vpow2.f32 %v4673_v44 }
 0x5c1   :  { %v5919_v20 = vpop.eup %5918 }
 0x5c2   :  { %v1216_v26 = vadd.f32 1.0, %v5919_v20  ;;  %v5921_v24 = vpop.eup %5920 }
 0x5c3   :  { %v1223_v33 = vadd.f32 1.0, %v5921_v24 }
 0x5c4   :  { %5922 = vrcp.f32 %v1216_v26 }
 0x5c5   :  { %5924 = vrcp.f32 %v1223_v33 }
 0x5ce   :  { %v5923_v35 = vpop.eup %5922 }
 0x5cf   :  { %v1227_v54 = vmul.f32 %v5923_v35, %v1226_v30  ;;  %v5925_v28 = vpop.eup %5924 }
 0x5d0   :  { %v1230_v15 = vsub.f32 1.0, %v5925_v28  ;;  %v1232_v4 = vmul.f32 %v5925_v28, %v7136_v10  ;;  %v7211_v10 = vld [vmem:[%s8702_s6 + $0x38] ss:$12 sps:$4 sm:$0xff]  }
 0x5d1   :  { %v1228_v37 = vadd.f32 %v1227_v54, %v6912_v60  ;;  %v7190_v60 = vld [vmem:[%s8702_s6 + $0x8] ss:$12 sps:$4 sm:$0xff]  }
 0x5d3   :  { %5926 = vtanh.f32 %v1228_v37 }
 0x5dd   :  { %v5927_v32 = vpop.eup %5926 }
 0x5de   :  { %v1231_v3 = vmul.f32 %v5927_v32, %v1230_v15 }
 0x5e0   :  { %v7181_v9 = vadd.f32 %v1232_v4, %v1231_v3 }
 0x5e2   :  { %1235 = vst [vmem:[#allocation3 + $0x20] sm:$0xff] %v7181_v9  ;;  %v1242_v29 = vpack.c.bf16 %v7181_v9, %v7181_v9 }
 0x5e4   :  { %1276 = vmatmul.mubr.bf16.vlgmr.msra.gmra.mrb[20].mxu0 %v1242_v29  ;;  %5234 = vmatmul.mubr.bf16.vlgmr.msra.gmra.mrb[44].mxu1 %v1242_v29 }
 0x5e5   :  { %1356 = vmatpush1.bf16.msra.mxu0 %v6929_v2  ;;  %5238 = vmatpush3.bf16.msra.mxu1 %v7190_v60 }
 0x5e6   :  { %1357 = vmatprep.subr.bf16.mxu0 %v6986_v31  ;;  %5239 = vmatprep.subr.bf16.mxu1 %v8753_v46 }
 0x5e7   :  { %1387 = vmatprep.mubr.bf16.mxu0 %v8754_v58  ;;  %5253 = vmatprep.mubr.msk.bf16.mxu1 %vm6390_vm0, %v8753_v46 }
 0x5e9   :  { %1358 = vmatpush1.bf16.msra.mxu0 %v6996_v56  ;;  %5240 = vmatpush3.bf16.msra.mxu1 %v7202_v19 }
 0x5ea   :  { %1359 = vmatprep.subr.bf16.mxu0 %v7003_v5  ;;  %5241 = vmatprep.subr.bf16.mxu1 %v8753_v46 }
 0x5ed   :  { %1360 = vmatpush1.bf16.msra.mxu0 %v7010_v62  ;;  %5242 = vmatpush3.bf16.msra.mxu1 %v7211_v10 }
 0x5ee   :  { %1361 = vmatprep.subr.bf16.mxu0 %v7017_v0  ;;  %5243 = vmatprep.subr.bf16.mxu1 %v8753_v46 }
 0x5f1   :  { %1362 = vmatpush1.bf16.msra.mxu0 %v7024_v8  ;;  %5244 = vmatpush3.bf16.msra.mxu1 %v7220_v27 }
 0x5f2   :  { %1363 = vmatprep.subr.bf16.mxu0 %v7031_v11  ;;  %5245 = vmatprep.subr.bf16.mxu1 %v8753_v46 }
 0x5f5   :  { %1364 = vmatpush1.bf16.msra.mxu0 %v7038_v13  ;;  %5246 = vmatpush3.bf16.msra.mxu1 %v6813_v50 }
 0x5f6   :  { %1365 = vmatprep.subr.bf16.mxu0 %v7045_v14  ;;  %5247 = vmatprep.subr.bf16.mxu1 %v8753_v46 }
 0x5f9   :  { %1366 = vmatpush1.bf16.msra.mxu0 %v7052_v17  ;;  %5248 = vmatpush3.bf16.msra.mxu1 %v6820_v51 }
 0x5fa   :  { %1367 = vmatprep.subr.bf16.mxu0 %v7059_v18  ;;  %5249 = vmatprep.subr.bf16.mxu1 %v8753_v46 }
 0x5fd   :  { %1368 = vmatpush1.bf16.msra.mxu0 %v7066_v21  ;;  %5250 = vmatpush3.bf16.msra.mxu1 %v6827_v52 }
 0x5fe   :  { %1369 = vmatprep.subr.bf16.mxu0 %v7073_v22  ;;  %5251 = vmatprep.subr.bf16.mxu1 %v8753_v46 }
 0x601   :  { %1370 = vmatpush1.bf16.msra.mxu0 %v7080_v25  ;;  %5252 = vmatpush3.bf16.msra.mxu1 %v6834_v53 }
 0x602   :  { %1467 = vmatprep.subr.bf16.mxu0 %v6967_v7  ;;  %5257 = vmatprep.subr.bf16.mxu1 %v8753_v46 }
 0x6b7   :  { %v1277_v50 = vpop.f32.mrb[20].mxu0  ;;  %v1318_v51 = vpop.f32.mrb[44].mxu1 }
 0x6b8   :  { %v1324_v45 = vadd.f32 %v1277_v50, %v6888_v39  ;;  %v1279_v47 = vpop.f32.mrb[21].mxu0  ;;  %v5235_v48 = vpop.f32.mrb[45].mxu1  ;;  %v1338_v44 = vadd.f32 %v6918_v6, %v1318_v51 }
 0x6b9   :  { %v1331_v52 = vadd.f32 %v1279_v47, %v6890_v41  ;;  %v1281_v49 = vpop.f32.mrb[22].mxu0  ;;  %v1321_v23 = vpop.f32.mrb[46].mxu1  ;;  %v7327_v47 = vld [vmem:[%s8704_s8 + $0x1c] ss:$12 sps:$4 sm:$0xff]   ;;  %v7333_v48 = vld [vmem:[%s8704_s8 + $0x18] ss:$12 sps:$4 sm:$0xff]  }
 0x6ba   :  { %v4674_v16 = vmul.f32 -1.442695, %v1324_v45  ;;  %v1282_v12 = vpop.f32.mrb[23].mxu0  ;;  %v5236_v34 = vpop.f32.mrb[47].mxu1  ;;  %v7319_v45 = vld [vmem:[%s8704_s8 + $0x8] ss:$12 sps:$4 sm:$0xff]  }
 0x6bb   :  { %v4675_v36 = vmul.f32 -1.442695, %v1331_v52  ;;  %v7338_v52 = vld [vmem:[%s8704_s8 + $0x20] ss:$12 sps:$4 sm:$0xff]   ;;  %v7352_v23 = vld [vmem:[%s8704_s8 + $0x30] ss:$12 sps:$4 sm:$0xff]  }
 0x6bc   :  { %5928 = vpow2.f32 %v4674_v16  ;;  %v7346_v49 = vld [vmem:[%s8704_s8 + $0x34] ss:$12 sps:$4 sm:$0xff]   ;;  %v7357_v16 = vld [vmem:[%s8704_s8 + $0x38] ss:$12 sps:$4 sm:$0xff]  }
 0x6bd   :  { %5930 = vpow2.f32 %v4675_v36  ;;  %v7365_v12 = vld [vmem:[%s8704_s8 + $0x4c] ss:$12 sps:$4 sm:$0xff]   ;;  %v7371_v34 = vld [vmem:[%s8704_s8 + $0x48] ss:$12 sps:$4 sm:$0xff]   ;;  %v7376_v36 = vld [vmem:[%s8704_s8 + $0x50] ss:$12 sps:$4 sm:$0xff]  }
 0x6c6   :  { %v5929_v53 = vpop.eup %5928 }
 0x6c7   :  { %v1328_v7 = vadd.f32 1.0, %v5929_v53  ;;  %v5931_v38 = vpop.eup %5930  ;;  %v7384_v53 = vld [vmem:[%s8704_s8 + $0x64] ss:$12 sps:$4 sm:$0xff]  }
 0x6c8   :  { %v1335_v40 = vadd.f32 1.0, %v5931_v38  ;;  %v7395_v38 = vld [vmem:[%s8704_s8 + $0x68] ss:$12 sps:$4 sm:$0xff]  }
 0x6c9   :  { %5932 = vrcp.f32 %v1328_v7  ;;  %v7390_v7 = vld [vmem:[%s8704_s8 + $0x60] ss:$12 sps:$4 sm:$0xff]  }
 0x6ca   :  { %5934 = vrcp.f32 %v1335_v40  ;;  %v7401_v40 = vld [vmem:[%s8704_s8 + $0x7c] ss:$12 sps:$4 sm:$0xff]  }
 0x6d3   :  { %v5933_v39 = vpop.eup %5932 }
 0x6d4   :  { %v1339_v20 = vmul.f32 %v5933_v39, %v1338_v44  ;;  %v5935_v26 = vpop.eup %5934  ;;  %v7408_v44 = vld [vmem:[%s8704_s8 + $0x78] ss:$12 sps:$4 sm:$0xff]   ;;  %v7413_v39 = vld [vmem:[%s8704_s8 + $0x80] ss:$12 sps:$4 sm:$0xff]  }
 0x6d5   :  { %v1342_v24 = vsub.f32 1.0, %v5935_v26  ;;  %v1344_v35 = vmul.f32 %v5935_v26, %v7181_v9  ;;  %v7432_v26 = vld [vmem:[%s8704_s8 + $0x98] ss:$12 sps:$4 sm:$0xff]  }
 0x6d6   :  { %v1340_v41 = vadd.f32 %v1339_v20, %v6916_v42  ;;  %v6126_v42 = vld [vmem:[%s8702_s6 + $0x68] ss:$12 sps:$4 sm:$0xff]  }
 0x6d7   :  { %v7420_v20 = vld [vmem:[%s8704_s8 + $0x94] ss:$12 sps:$4 sm:$0xff]  }
 0x6d8   :  { %5936 = vtanh.f32 %v1340_v41  ;;  %v7427_v41 = vld [vmem:[%s8704_s8 + $0x90] ss:$12 sps:$4 sm:$0xff]  }
 0x6e2   :  { %v5937_v33 = vpop.eup %5936 }
 0x6e3   :  { %v1343_v30 = vmul.f32 %v5937_v33, %v1342_v24  ;;  %v7439_v24 = vld [vmem:[%s8704_s8 + $0xac] ss:$12 sps:$4 sm:$0xff]   ;;  %v7446_v33 = vld [vmem:[%s8704_s8 + $0xa8] ss:$12 sps:$4 sm:$0xff]  }
 0x6e5   :  { %v7246_v54 = vadd.f32 %v1344_v35, %v1343_v30  ;;  %v7451_v30 = vld [vmem:[%s8704_s8 + $0xb0] ss:$12 sps:$4 sm:$0xff]  }
 0x6e6   :  { %v7458_v35 = vld [vmem:[%s8706_s10 + $0x4] ss:$12 sps:$4 sm:$0xff]  }
 0x6e7   :  { %1347 = vst [vmem:[#allocation3 + $0x28] sm:$0xff] %v7246_v54  ;;  %v1354_v37 = vpack.c.bf16 %v7246_v54, %v7246_v54 }
 0x6e9   :  { %1388 = vmatmul.mubr.bf16.vlgmr.msra.gmra.mrb[24].mxu0 %v1354_v37  ;;  %5254 = vmatmul.mubr.bf16.vlgmr.msra.gmra.mrb[48].mxu1 %v1354_v37 }
 0x6ea   :  { %1468 = vmatpush1.bf16.msra.mxu0 %v6929_v2  ;;  %5258 = vmatpush3.bf16.msra.mxu1 %v7190_v60  ;;  %v6127_v2 = vld [vmem:[%s8702_s6 + $0x80] ss:$12 sps:$4 sm:$0xff]  }
 0x6eb   :  { %1469 = vmatprep.subr.bf16.mxu0 %v6986_v31  ;;  %5259 = vmatprep.subr.bf16.mxu1 %v8753_v46  ;;  %v6128_v31 = vld [vmem:[%s8702_s6 + $0x98] ss:$12 sps:$4 sm:$0xff]  }
 0x6ec   :  { %1499 = vmatprep.mubr.bf16.mxu0 %v8754_v58  ;;  %5273 = vmatprep.mubr.msk.bf16.mxu1 %vm6390_vm0, %v8753_v46 }
 0x6ee   :  { %1470 = vmatpush1.bf16.msra.mxu0 %v6996_v56  ;;  %5260 = vmatpush3.bf16.msra.mxu1 %v7202_v19  ;;  %v6129_v56 = vld [vmem:[%s8702_s6 + $0xb0] ss:$12 sps:$4 sm:$0xff]   ;;  %s7492_s6 = sld [smem:[#allocation6 + $0x101]] }
 0x6ef   :  { %1471 = vmatprep.subr.bf16.mxu0 %v7003_v5  ;;  %5261 = vmatprep.subr.bf16.mxu1 %v8753_v46 }
 0x6f2   :  { %1472 = vmatpush1.bf16.msra.mxu0 %v7010_v62  ;;  %5262 = vmatpush3.bf16.msra.mxu1 %v7211_v10 }
 0x6f3   :  { %1473 = vmatprep.subr.bf16.mxu0 %v7017_v0  ;;  %5263 = vmatprep.subr.bf16.mxu1 %v8753_v46 }
 0x6f4   :  { %s4751_s24 = sshll.u32 %s7492_s6, 3 }
 0x6f6   :  { %1474 = vmatpush1.bf16.msra.mxu0 %v7024_v8  ;;  %5264 = vmatpush3.bf16.msra.mxu1 %v7220_v27 }
 0x6f7   :  { %1475 = vmatprep.subr.bf16.mxu0 %v7031_v11  ;;  %5265 = vmatprep.subr.bf16.mxu1 %v8753_v46 }
 0x6fa   :  { %1476 = vmatpush1.bf16.msra.mxu0 %v7038_v13  ;;  %5266 = vmatpush3.bf16.msra.mxu1 %v6126_v42 }
 0x6fb   :  { %1477 = vmatprep.subr.bf16.mxu0 %v7045_v14  ;;  %5267 = vmatprep.subr.bf16.mxu1 %v8753_v46 }
 0x6fe   :  { %1478 = vmatpush1.bf16.msra.mxu0 %v7052_v17  ;;  %5268 = vmatpush3.bf16.msra.mxu1 %v6127_v2 }
 0x6ff   :  { %1479 = vmatprep.subr.bf16.mxu0 %v7059_v18  ;;  %5269 = vmatprep.subr.bf16.mxu1 %v8753_v46 }
 0x702   :  { %1480 = vmatpush1.bf16.msra.mxu0 %v7066_v21  ;;  %5270 = vmatpush3.bf16.msra.mxu1 %v6128_v31 }
 0x703   :  { %1481 = vmatprep.subr.bf16.mxu0 %v7073_v22  ;;  %5271 = vmatprep.subr.bf16.mxu1 %v8753_v46 }
 0x706   :  { %1482 = vmatpush1.bf16.msra.mxu0 %v7080_v25  ;;  %5272 = vmatpush3.bf16.msra.mxu1 %v6129_v56 }
 0x707   :  { %5277 = vmatprep.subr.bf16.mxu1 %v8753_v46 }
 0x7bc   :  { %v1389_v5 = vpop.f32.mrb[24].mxu0  ;;  %v1430_v62 = vpop.f32.mrb[48].mxu1 }
 0x7bd   :  { %v1436_v0 = vadd.f32 %v1389_v5, %v6892_v43  ;;  %v1391_v8 = vpop.f32.mrb[25].mxu0  ;;  %v5255_v11 = vpop.f32.mrb[49].mxu1  ;;  %v1450_v4 = vadd.f32 %v6918_v6, %v1430_v62  ;;  %v7314_v6 = vld [vmem:[%s8704_s8] ss:$12 sps:$4 sm:$0xff]  }
 0x7be   :  { %v1443_v13 = vadd.f32 %v1391_v8, %v6897_v61  ;;  %v1393_v14 = vpop.f32.mrb[26].mxu0  ;;  %v1433_v17 = vpop.f32.mrb[50].mxu1 }
 0x7bf   :  { %v4676_v18 = vmul.f32 -1.442695, %v1436_v0  ;;  %v1394_v21 = vpop.f32.mrb[27].mxu0  ;;  %v5256_v22 = vpop.f32.mrb[51].mxu1 }
 0x7c0   :  { %v4677_v25 = vmul.f32 -1.442695, %v1443_v13  ;;  %v6130_v22 = vld [vmem:[#allocation10] ss:$0 sm:$0xff] }
 0x7c1   :  { %5938 = vpow2.f32 %v4676_v18 }
 0x7c2   :  { %5940 = vpow2.f32 %v4677_v25 }
 0x7cb   :  { %v5939_v28 = vpop.eup %5938 }
 0x7cc   :  { %v1440_v15 = vadd.f32 1.0, %v5939_v28  ;;  %v5941_v32 = vpop.eup %5940 }
 0x7cd   :  { %v1447_v3 = vadd.f32 1.0, %v5941_v32 }
 0x7ce   :  { %5942 = vrcp.f32 %v1440_v15 }
 0x7cf   :  { %5944 = vrcp.f32 %v1447_v3 }
 0x7d8   :  { %v5943_v43 = vpop.eup %5942 }
 0x7d9   :  { %v1451_v9 = vmul.f32 %v5943_v43, %v1450_v4  ;;  %v5945_v29 = vpop.eup %5944 }
 0x7da   :  { %v1454_v60 = vsub.f32 1.0, %v5945_v29  ;;  %v1456_v27 = vmul.f32 %v5945_v29, %v7246_v54 }
 0x7db   :  { %v1452_v61 = vadd.f32 %v1451_v9, %v6910_v59  ;;  %v7309_v59 = vld [vmem:[%s8704_s8 + $0x4] ss:$12 sps:$4 sm:$0xff]   ;;  %s7466_s8 = sld [smem:[#allocation6]] }
 0x7dc   :  { %1840 = vmatprep.subr.bf16.mxu0 %v7309_v59 }
 0x7dd   :  { %5946 = vtanh.f32 %v1452_v61 }
 0x7e1   :  { %s8755_s7 = sshll.u32 %s7466_s8, 3  ;;  %s8757_s8 = sshll.u32 %s7471_s23, 3 }
 0x7e2   :  { %s1649_s21 = scalar_lea.vmem [#allocation3], %s8755_s7  ;;  %s8758_s7 = sshll.u32 %s7473_s1, 3 }
 0x7e3   :  { %s2159_s23 = scalar_lea.vmem [#allocation3], %s4749_s26  ;;  %s2164_s1 = scalar_lea.vmem [#allocation3], %s4751_s24 }
 0x7e4   :  { %s8760_s26 = sshll.u32 %s7479_s28, 3  ;;  %s8761_s24 = sshll.u32 %s7482_s11, 3 }
 0x7e5   :  { %s1685_s6 = scalar_lea.vmem [#allocation3], %s8761_s24  ;;  %s2174_s28 = scalar_lea.vmem [#allocation3], %s4755_s13 }
 0x7e6   :  { %s2179_s11 = scalar_lea.vmem [#allocation3], %s4757_s14 }
 0x7e7   :  { %v5947_v19 = vpop.eup %5946 }
 0x7e8   :  { %v1455_v10 = vmul.f32 %v5947_v19, %v1454_v60 }
 0x7ea   :  { %v7298_v50 = vadd.f32 %v1456_v27, %v1455_v10 }
 0x7ec   :  { %1459 = vst [vmem:[#allocation3 + $0x30] sm:$0xff] %v7298_v50  ;;  %v1466_v51 = vpack.c.bf16 %v7298_v50, %v7298_v50 }
 0x7ee   :  { %1500 = vmatmul.mubr.bf16.vlgmr.msra.gmra.mrb[28].mxu0 %v1466_v51  ;;  %5274 = vmatmul.mubr.bf16.vlgmr.msra.gmra.mrb[52].mxu1 %v1466_v51 }
 0x7ef   :  { %1872 = vmatprep.mubr.bf16.mxu0 %v8754_v58  ;;  %5293 = vmatprep.mubr.msk.bf16.mxu1 %vm6390_vm0, %v8753_v46 }
 0x7f0   :  { %1841 = vmatpush1.bf16.msra.mxu0 %v7314_v6  ;;  %5278 = vmatpush3.bf16.msra.mxu1 %v7319_v45 }
 0x7f1   :  { %5279 = vmatprep.subr.bf16.mxu1 %v8753_v46  ;;  %1842 = vmatprep.subr.bf16.mxu0 %v7327_v47 }
 0x7f4   :  { %1843 = vmatpush1.bf16.msra.mxu0 %v7333_v48  ;;  %5280 = vmatpush3.bf16.msra.mxu1 %v7338_v52 }
 0x7f5   :  { %5281 = vmatprep.subr.bf16.mxu1 %v8753_v46  ;;  %1844 = vmatprep.subr.bf16.mxu0 %v7346_v49 }
 0x7f8   :  { %1845 = vmatpush1.bf16.msra.mxu0 %v7352_v23  ;;  %5282 = vmatpush3.bf16.msra.mxu1 %v7357_v16 }
 0x7f9   :  { %5283 = vmatprep.subr.bf16.mxu1 %v8753_v46  ;;  %1846 = vmatprep.subr.bf16.mxu0 %v7365_v12 }
 0x7fc   :  { %1847 = vmatpush1.bf16.msra.mxu0 %v7371_v34  ;;  %5284 = vmatpush3.bf16.msra.mxu1 %v7376_v36 }
 0x7fd   :  { %5285 = vmatprep.subr.bf16.mxu1 %v8753_v46  ;;  %1848 = vmatprep.subr.bf16.mxu0 %v7384_v53 }
 0x800   :  { %1849 = vmatpush1.bf16.msra.mxu0 %v7390_v7  ;;  %5286 = vmatpush3.bf16.msra.mxu1 %v7395_v38 }
 0x801   :  { %1850 = vmatprep.subr.bf16.mxu0 %v7401_v40  ;;  %5287 = vmatprep.subr.bf16.mxu1 %v8753_v46 }
 0x804   :  { %1851 = vmatpush1.bf16.msra.mxu0 %v7408_v44  ;;  %5288 = vmatpush3.bf16.msra.mxu1 %v7413_v39 }
 0x805   :  { %1852 = vmatprep.subr.bf16.mxu0 %v7420_v20  ;;  %5289 = vmatprep.subr.bf16.mxu1 %v8753_v46 }
 0x808   :  { %1853 = vmatpush1.bf16.msra.mxu0 %v7427_v41  ;;  %5290 = vmatpush3.bf16.msra.mxu1 %v7432_v26 }
 0x809   :  { %1854 = vmatprep.subr.bf16.mxu0 %v7439_v24  ;;  %5291 = vmatprep.subr.bf16.mxu1 %v8753_v46 }
 0x80c   :  { %1855 = vmatpush1.bf16.msra.mxu0 %v7446_v33  ;;  %5292 = vmatpush3.bf16.msra.mxu1 %v7451_v30 }
 0x80d   :  { %2049 = vmatprep.subr.bf16.mxu0 %v7458_v35  ;;  %5297 = vmatprep.subr.bf16.mxu1 %v8753_v46 }
 0x8c1   :  { %v1501_v54 = vpop.f32.mrb[28].mxu0  ;;  %v1542_v37 = vpop.f32.mrb[52].mxu1 }
 0x8c2   :  { %v1548_v42 = vadd.f32 %v1501_v54, %v6899_v63  ;;  %v1503_v2 = vpop.f32.mrb[29].mxu0  ;;  %v5275_v31 = vpop.f32.mrb[53].mxu1  ;;  %v1562_v25 = vadd.f32 %v6130_v22, %v1542_v37 }
 0x8c3   :  { %v1555_v56 = vadd.f32 %v1503_v2, %v6901_v1  ;;  %v1505_v5 = vpop.f32.mrb[30].mxu0  ;;  %v1545_v62 = vpop.f32.mrb[54].mxu1 }
 0x8c4   :  { %v4678_v0 = vmul.f32 -1.442695, %v1548_v42  ;;  %v1506_v8 = vpop.f32.mrb[31].mxu0  ;;  %v5276_v11 = vpop.f32.mrb[55].mxu1 }
 0x8c5   :  { %v4679_v13 = vmul.f32 -1.442695, %v1555_v56 }
 0x8c6   :  { %5948 = vpow2.f32 %v4678_v0 }
 0x8c7   :  { %5950 = vpow2.f32 %v4679_v13 }
 0x8d0   :  { %v5949_v14 = vpop.eup %5948 }
 0x8d1   :  { %v1552_v17 = vadd.f32 1.0, %v5949_v14  ;;  %v5951_v18 = vpop.eup %5950 }
 0x8d2   :  { %v1559_v21 = vadd.f32 1.0, %v5951_v18 }
 0x8d3   :  { %5952 = vrcp.f32 %v1552_v17 }
 0x8d4   :  { %5954 = vrcp.f32 %v1559_v21 }
 0x8dd   :  { %v5953_v63 = vpop.eup %5952 }
 0x8de   :  { %v1563_v28 = vmul.f32 %v5953_v63, %v1562_v25  ;;  %v5955_v15 = vpop.eup %5954  ;;  %v7579_v25 = vld [vmem:[%s8706_s10] ss:$12 sps:$4 sm:$0xff]  }
 0x8df   :  { %v1566_v32 = vsub.f32 1.0, %v5955_v15  ;;  %v1568_v4 = vmul.f32 %v5955_v15, %v7298_v50 }
 0x8e0   :  { %v1564_v1 = vadd.f32 %v1563_v28, %v6914_v57  ;;  %v7586_v28 = vld [vmem:[%s8706_s10 + $0x8] ss:$12 sps:$4 sm:$0xff]  }
 0x8e2   :  { %5956 = vtanh.f32 %v1564_v1 }
 0x8ec   :  { %v5957_v57 = vpop.eup %5956 }
 0x8ed   :  { %v1567_v3 = vmul.f32 %v5957_v57, %v1566_v32  ;;  %v7595_v57 = vld [vmem:[%s8706_s10 + $0x1c] ss:$12 sps:$4 sm:$0xff]  }
 0x8ef   :  { %v7494_v43 = vadd.f32 %v1568_v4, %v1567_v3 }
 0x8f1   :  { %1571 = vst [vmem:[#allocation3 + $0x38] sm:$0xff] %v7494_v43  ;;  %1572 = vst [vmem:[#allocation20] sm:$0xff] %v7494_v43 }
 0x8f8   :  { %v1650_v9 = vld [vmem:[%s1649_s21] sm:$0xff]  ;;  %s1661_s21 = scalar_lea.vmem [#allocation3], %s8757_s8  ;;  %s4761_s8 = sshll.u32 %s7509_s4, 3 }
 0x8f9   :  { %v1656_v61 = vld [vmem:[%s1655_s5] sm:$0xff]  ;;  %v1652_v29 = vsel %vm1651_vm1, %v1650_v9, 0.0  ;;  %s1667_s5 = scalar_lea.vmem [#allocation3], %s8758_s7  ;;  %s2189_s14 = scalar_lea.vmem [#allocation3], %s4761_s8 }
 0x8fa   :  { %v1658_v60 = vsel %vm1657_vm2, %v1656_v61, %v1652_v29  ;;  %v1662_v19 = vld [vmem:[%s1661_s21] sm:$0xff]  ;;  %s1673_s21 = scalar_lea.vmem [#allocation3], %s8759_s27  ;;  %s8766_s7 = sld [smem:[#allocation40_spill]] }
 0x8fb   :  { %v2155_v10 = vld [vmem:[%s2154_s20] sm:$0xff]  ;;  %v1664_v27 = vsel %vm1663_vm3, %v1662_v19, %v1658_v60  ;;  %s1679_s20 = scalar_lea.vmem [#allocation3], %s8760_s26  ;;  %v7632_v60 = vld [vmem:[%s8706_s10 + $0x30] ss:$12 sps:$4 sm:$0xff]  }
 0x8fc   :  { %v1668_v50 = vld [vmem:[%s1667_s5] sm:$0xff]  ;;  %v2156_v51 = vsel %vm1651_vm1, %v2155_v10, 0.0  ;;  %v7644_v10 = vld [vmem:[%s8706_s10 + $0x4c] ss:$12 sps:$4 sm:$0xff]   ;;  %s8765_s5 = sld [smem:[#allocation41_spill]] }
 0x8fd   :  { %v2160_v54 = vld [vmem:[%s2159_s23] sm:$0xff]  ;;  %v1670_v37 = vsel %vm1669_vm4, %v1668_v50, %v1664_v27  ;;  %v7651_v27 = vld [vmem:[%s8706_s10 + $0x48] ss:$12 sps:$4 sm:$0xff]   ;;  %v7656_v50 = vld [vmem:[%s8706_s10 + $0x50] ss:$12 sps:$4 sm:$0xff]  }
 0x8fe   :  { %v1674_v42 = vld [vmem:[%s1673_s21] sm:$0xff]  ;;  %v2161_v2 = vsel %vm1657_vm2, %v2160_v54, %v2156_v51 }
 0x8ff   :  { %v2165_v31 = vld [vmem:[%s2164_s1] sm:$0xff]  ;;  %v1676_v56 = vsel %vm1675_vm5, %v1674_v42, %v1670_v37  ;;  %v7675_v37 = vld [vmem:[%s8706_s10 + $0x68] ss:$12 sps:$4 sm:$0xff]  }
 0x900   :  { %v1680_v5 = vld [vmem:[%s1679_s20] sm:$0xff]  ;;  %v2166_v62 = vsel %vm1663_vm3, %v2165_v31, %v2161_v2  ;;  %v7682_v42 = vld [vmem:[%s8706_s10 + $0x7c] ss:$12 sps:$4 sm:$0xff]  }
 0x901   :  { %v2170_v0 = vld [vmem:[%s2169_s3] sm:$0xff]  ;;  %v1682_v8 = vsel %vm1681_vm6, %v1680_v5, %v1676_v56  ;;  %v7708_v5 = vld [vmem:[%s8706_s10 + $0x90] ss:$12 sps:$4 sm:$0xff]  }
 0x902   :  { %v1686_v11 = vld [vmem:[%s1685_s6] sm:$0xff]  ;;  %v2171_v13 = vsel %vm1669_vm4, %v2170_v0, %v2166_v62  ;;  %v7720_v0 = vld [vmem:[%s8706_s10 + $0xac] ss:$12 sps:$4 sm:$0xff]  }
 0x903   :  { %v2175_v14 = vld [vmem:[%s2174_s28] sm:$0xff]  ;;  %v1688_v17 = vsel %vm1687_vm7, %v1686_v11, %v1682_v8  ;;  %v7727_v8 = vld [vmem:[%s8706_s10 + $0xa8] ss:$12 sps:$4 sm:$0xff]   ;;  %v7732_v11 = vld [vmem:[%s8706_s10 + $0xb0] ss:$12 sps:$4 sm:$0xff]  }
 0x904   :  { %v1692_v18 = vld [vmem:[%s1691_s18] sm:$0xff]  ;;  %v2176_v21 = vsel %vm1675_vm5, %v2175_v14, %v2171_v13 }
 0x905   :  { %v2180_v22 = vld [vmem:[%s2179_s11] sm:$0xff]  ;;  %v1694_v63 = vsel %vm1693_vm8, %v1692_v18, %v1688_v17  ;;  %v8764_v18 = vld [vmem:[#allocation32_spill] sm:$0xff] }
 0x906   :  { %v2181_v1 = vsel %vm1681_vm6, %v2180_v22, %v2176_v21  ;;  %v2185_v15 = vld [vmem:[%s2184_s2] sm:$0xff]  ;;  %v1695_v32 = vpack.c.bf16 %v1694_v63, %v1694_v63 }
 0x907   :  { %v2186_v3 = vsel %vm1687_vm7, %v2185_v15, %v2181_v1  ;;  %v2190_v4 = vld [vmem:[%s2189_s14] sm:$0xff] }
 0x908   :  { %v7603_v9 = vsel %vm1693_vm8, %v2190_v4, %v2186_v3  ;;  %1873 = vmatmul.mubr.bf16.vlgmr.msra.gmra.mrb[32].mxu0 %v1695_v32  ;;  %5294 = vmatmul.mubr.bf16.vlgmr.msra.gmra.mrb[56].mxu1 %v1695_v32  ;;  %v7610_v61 = vld [vmem:[%s8706_s10 + $0x18] ss:$12 sps:$4 sm:$0xff]   ;;  %v7615_v29 = vld [vmem:[%s8706_s10 + $0x20] ss:$12 sps:$4 sm:$0xff]  }
 0x909   :  { %2050 = vmatpush1.bf16.msra.mxu0 %v7579_v25  ;;  %5298 = vmatpush3.bf16.msra.mxu1 %v7586_v28  ;;  %v7637_v19 = vld [vmem:[%s8706_s10 + $0x38] ss:$12 sps:$4 sm:$0xff]   ;;  %v7670_v54 = vld [vmem:[%s8706_s10 + $0x60] ss:$12 sps:$4 sm:$0xff]  }
 0x90a   :  { %2051 = vmatprep.subr.bf16.mxu0 %v7595_v57  ;;  %5299 = vmatprep.subr.bf16.mxu1 %v8753_v46  ;;  %v7663_v51 = vld [vmem:[%s8706_s10 + $0x64] ss:$12 sps:$4 sm:$0xff]   ;;  %v7694_v31 = vld [vmem:[%s8706_s10 + $0x80] ss:$12 sps:$4 sm:$0xff]  }
 0x90b   :  { %2081 = vmatprep.mubr.bf16.mxu0 %v8754_v58  ;;  %5313 = vmatprep.mubr.msk.bf16.mxu1 %vm6390_vm0, %v8753_v46  ;;  %v7689_v2 = vld [vmem:[%s8706_s10 + $0x78] ss:$12 sps:$4 sm:$0xff]   ;;  %v7701_v56 = vld [vmem:[%s8706_s10 + $0x94] ss:$12 sps:$4 sm:$0xff]  }
 0x90c   :  { %v7713_v62 = vld [vmem:[%s8706_s10 + $0x98] ss:$12 sps:$4 sm:$0xff]   ;;  %v7829_v17 = vld [vmem:[#allocation11] ss:$0 sm:$0xff] }
 0x90d   :  { %2052 = vmatpush1.bf16.msra.mxu0 %v7610_v61  ;;  %5300 = vmatpush3.bf16.msra.mxu1 %v7615_v29 }
 0x90e   :  { %2053 = vmatprep.subr.bf16.mxu0 %v7622_v55  ;;  %5301 = vmatprep.subr.bf16.mxu1 %v8753_v46 }
 0x911   :  { %2054 = vmatpush1.bf16.msra.mxu0 %v7632_v60  ;;  %5302 = vmatpush3.bf16.msra.mxu1 %v7637_v19 }
 0x912   :  { %2055 = vmatprep.subr.bf16.mxu0 %v7644_v10  ;;  %5303 = vmatprep.subr.bf16.mxu1 %v8753_v46 }
 0x915   :  { %2056 = vmatpush1.bf16.msra.mxu0 %v7651_v27  ;;  %5304 = vmatpush3.bf16.msra.mxu1 %v7656_v50 }
 0x916   :  { %2057 = vmatprep.subr.bf16.mxu0 %v7663_v51  ;;  %5305 = vmatprep.subr.bf16.mxu1 %v8753_v46 }
 0x919   :  { %2058 = vmatpush1.bf16.msra.mxu0 %v7670_v54  ;;  %5306 = vmatpush3.bf16.msra.mxu1 %v7675_v37 }
 0x91a   :  { %2059 = vmatprep.subr.bf16.mxu0 %v7682_v42  ;;  %5307 = vmatprep.subr.bf16.mxu1 %v8753_v46 }
 0x91d   :  { %2060 = vmatpush1.bf16.msra.mxu0 %v7689_v2  ;;  %5308 = vmatpush3.bf16.msra.mxu1 %v7694_v31 }
 0x91e   :  { %2061 = vmatprep.subr.bf16.mxu0 %v7701_v56  ;;  %5309 = vmatprep.subr.bf16.mxu1 %v8753_v46 }
 0x921   :  { %2062 = vmatpush1.bf16.msra.mxu0 %v7708_v5  ;;  %5310 = vmatpush3.bf16.msra.mxu1 %v7713_v62 }
 0x922   :  { %2063 = vmatprep.subr.bf16.mxu0 %v7720_v0  ;;  %5311 = vmatprep.subr.bf16.mxu1 %v8753_v46 }
 0x925   :  { %2064 = vmatpush1.bf16.msra.mxu0 %v7727_v8  ;;  %5312 = vmatpush3.bf16.msra.mxu1 %v7732_v11 }
 0x926   :  { %2193 = vmatprep.subr.bf16.mxu0 %v7309_v59  ;;  %5317 = vmatprep.subr.bf16.mxu1 %v8753_v46  ;;  %v2192_v59 = vpack.c.bf16 %v7603_v9, %v7603_v9 }
 0x928   :  { %2082 = vmatmul.mubr.bf16.vlgmr.msra.gmra.mrb[32].mxu0 %v8754_v58  ;;  %5314 = vmatmul.mubr.bf16.vlgmr.msra.gmra.mrb[60].mxu1 %v8754_v58 }
 0x929   :  { %2194 = vmatpush1.bf16.msra.mxu0 %v7314_v6  ;;  %5318 = vmatpush3.bf16.msra.mxu1 %v7319_v45  ;;  %v5752_v6 = vld [vmem:[%s8708_s12 + $0xc4] ss:$12 sps:$4 sm:$0xff]   ;;  %v5753_v45 = vld [vmem:[%s8708_s12 + $0xc8] ss:$12 sps:$4 sm:$0xff]  }
 0x92a   :  { %2195 = vmatprep.subr.bf16.mxu0 %v7327_v47  ;;  %5319 = vmatprep.subr.bf16.mxu1 %v8753_v46 }
 0x92b   :  { %2225 = vmatprep.mubr.bf16.mxu0 %v8754_v58  ;;  %5333 = vmatprep.mubr.msk.bf16.mxu1 %vm6390_vm0, %v8753_v46 }
 0x92d   :  { %2196 = vmatpush1.bf16.msra.mxu0 %v7333_v48  ;;  %5320 = vmatpush3.bf16.msra.mxu1 %v7338_v52 }
 0x92e   :  { %2197 = vmatprep.subr.bf16.mxu0 %v7346_v49  ;;  %5321 = vmatprep.subr.bf16.mxu1 %v8753_v46 }
 0x931   :  { %2198 = vmatpush1.bf16.msra.mxu0 %v7352_v23  ;;  %5322 = vmatpush3.bf16.msra.mxu1 %v7357_v16  ;;  %v1605_v23 = vld [vmem:[%s8705_s9] sm:$0x7] }
 0x932   :  { %2199 = vmatprep.subr.bf16.mxu0 %v7365_v12  ;;  %5323 = vmatprep.subr.bf16.mxu1 %v8753_v46  ;;  %v8762_v16 = vld [vmem:[#allocation30_spill] sm:$0xff]  ;;  %v1708_v21 = vrot.slane %v1605_v23, %v8764_v18 }
 0x933   :  { %v7822_v12 = vrot.slane %v1605_v23, %v8762_v16 }
 0x935   :  { %2200 = vmatpush1.bf16.msra.mxu0 %v7371_v34  ;;  %5324 = vmatpush3.bf16.msra.mxu1 %v7376_v36  ;;  %v8763_v36 = vld [vmem:[#allocation31_spill] sm:$0xff] }
 0x936   :  { %2201 = vmatprep.subr.bf16.mxu0 %v7384_v53  ;;  %5325 = vmatprep.subr.bf16.mxu1 %v8753_v46  ;;  %v7825_v53 = vrot.slane %v1605_v23, %v8763_v36  ;;  %v5780_v23 = vld [vmem:[%s8708_s12 + $0x16c] ss:$12 sps:$4 sm:$0xff]  }
 0x939   :  { %2202 = vmatpush1.bf16.msra.mxu0 %v7390_v7  ;;  %5326 = vmatpush3.bf16.msra.mxu1 %v7395_v38 }
 0x93a   :  { %2203 = vmatprep.subr.bf16.mxu0 %v7401_v40  ;;  %5327 = vmatprep.subr.bf16.mxu1 %v8753_v46 }
 0x93d   :  { %2204 = vmatpush1.bf16.msra.mxu0 %v7408_v44  ;;  %5328 = vmatpush3.bf16.msra.mxu1 %v7413_v39 }
 0x93e   :  { %2205 = vmatprep.subr.bf16.mxu0 %v7420_v20  ;;  %5329 = vmatprep.subr.bf16.mxu1 %v8753_v46 }
 0x941   :  { %2206 = vmatpush1.bf16.msra.mxu0 %v7427_v41  ;;  %5330 = vmatpush3.bf16.msra.mxu1 %v7432_v26 }
 0x942   :  { %2207 = vmatprep.subr.bf16.mxu0 %v7439_v24  ;;  %5331 = vmatprep.subr.bf16.mxu1 %v8753_v46 }
 0x945   :  { %2208 = vmatpush1.bf16.msra.mxu0 %v7446_v33  ;;  %5332 = vmatpush3.bf16.msra.mxu1 %v7451_v30 }
 0x946   :  { %2275 = vmatprep.subr.bf16.mxu0 %v7458_v35  ;;  %5337 = vmatprep.subr.bf16.mxu1 %v8753_v46 }
 0x948   :  { %2226 = vmatmul.mubr.bf16.vlgmr.msra.gmra.mrb[36].mxu0 %v2192_v59  ;;  %5334 = vmatmul.mubr.bf16.vlgmr.msra.gmra.mrb[64].mxu1 %v2192_v59  ;;  %v5766_v59 = vld [vmem:[%s8708_s12 + $0x120] ss:$12 sps:$4 sm:$0xff]  }
 0x949   :  { %2276 = vmatpush1.bf16.msra.mxu0 %v7579_v25  ;;  %5338 = vmatpush3.bf16.msra.mxu1 %v7586_v28 }
 0x94a   :  { %2277 = vmatprep.subr.bf16.mxu0 %v7595_v57  ;;  %5339 = vmatprep.subr.bf16.mxu1 %v8753_v46 }
 0x94b   :  { %2307 = vmatprep.mubr.bf16.mxu0 %v8754_v58  ;;  %5353 = vmatprep.mubr.msk.bf16.mxu1 %vm6390_vm0, %v8753_v46 }
 0x94d   :  { %2278 = vmatpush1.bf16.msra.mxu0 %v7610_v61  ;;  %5340 = vmatpush3.bf16.msra.mxu1 %v7615_v29 }
 0x94e   :  { %2279 = vmatprep.subr.bf16.mxu0 %v7622_v55  ;;  %5341 = vmatprep.subr.bf16.mxu1 %v8753_v46 }
 0x951   :  { %2280 = vmatpush1.bf16.msra.mxu0 %v7632_v60  ;;  %5342 = vmatpush3.bf16.msra.mxu1 %v7637_v19 }
 0x952   :  { %2281 = vmatprep.subr.bf16.mxu0 %v7644_v10  ;;  %5343 = vmatprep.subr.bf16.mxu1 %v8753_v46 }
 0x955   :  { %2282 = vmatpush1.bf16.msra.mxu0 %v7651_v27  ;;  %5344 = vmatpush3.bf16.msra.mxu1 %v7656_v50  ;;  %v5750_v27 = vld [vmem:[%s8708_s12 + $0xc0] ss:$12 sps:$4 sm:$0xff]  }
 0x956   :  { %2283 = vmatprep.subr.bf16.mxu0 %v7663_v51  ;;  %5345 = vmatprep.subr.bf16.mxu1 %v8753_v46  ;;  %v5756_v51 = vld [vmem:[%s8708_s12 + $0xdc] ss:$12 sps:$4 sm:$0xff]  }
 0x959   :  { %2284 = vmatpush1.bf16.msra.mxu0 %v7670_v54  ;;  %5346 = vmatpush3.bf16.msra.mxu1 %v7675_v37  ;;  %v5757_v54 = vld [vmem:[%s8708_s12 + $0xe0] ss:$12 sps:$4 sm:$0xff]  }
 0x95a   :  { %2285 = vmatprep.subr.bf16.mxu0 %v7682_v42  ;;  %5347 = vmatprep.subr.bf16.mxu1 %v8753_v46  ;;  %v5782_v37 = vld [vmem:[%s8765_s5] sm:$0xff]  }
 0x95b   :  { %v5754_v42 = vld [vmem:[%s8708_s12 + $0xd8] ss:$12 sps:$4 sm:$0xff]  }
 0x95d   :  { %2286 = vmatpush1.bf16.msra.mxu0 %v7689_v2  ;;  %5348 = vmatpush3.bf16.msra.mxu1 %v7694_v31  ;;  %v5760_v2 = vld [vmem:[%s8708_s12 + $0xf4] ss:$12 sps:$4 sm:$0xff]   ;;  %v5761_v31 = vld [vmem:[%s8708_s12 + $0xf8] ss:$12 sps:$4 sm:$0xff]  }
 0x95e   :  { %2287 = vmatprep.subr.bf16.mxu0 %v7701_v56  ;;  %5349 = vmatprep.subr.bf16.mxu1 %v8753_v46  ;;  %v5758_v56 = vld [vmem:[%s8708_s12 + $0xf0] ss:$12 sps:$4 sm:$0xff]  }
 0x961   :  { %2288 = vmatpush1.bf16.msra.mxu0 %v7708_v5  ;;  %5350 = vmatpush3.bf16.msra.mxu1 %v7713_v62  ;;  %v5764_v5 = vld [vmem:[%s8708_s12 + $0x10c] ss:$12 sps:$4 sm:$0xff]   ;;  %v5765_v62 = vld [vmem:[%s8708_s12 + $0x110] ss:$12 sps:$4 sm:$0xff]  }
 0x962   :  { %2289 = vmatprep.subr.bf16.mxu0 %v7720_v0  ;;  %5351 = vmatprep.subr.bf16.mxu1 %v8753_v46  ;;  %v5762_v0 = vld [vmem:[%s8708_s12 + $0x108] ss:$12 sps:$4 sm:$0xff]  }
 0x965   :  { %2290 = vmatpush1.bf16.msra.mxu0 %v7727_v8  ;;  %5352 = vmatpush3.bf16.msra.mxu1 %v7732_v11  ;;  %v5768_v8 = vld [vmem:[%s8708_s12 + $0x124] ss:$12 sps:$4 sm:$0xff]   ;;  %v5769_v11 = vld [vmem:[%s8708_s12 + $0x128] ss:$12 sps:$4 sm:$0xff]  }
 0x966   :  { %2611 = vmatprep.subr.bf16.mxu0 %v5752_v6  ;;  %5357 = vmatprep.subr.bf16.mxu1 %v5753_v45  ;;  %v5772_v6 = vld [vmem:[%s8708_s12 + $0x13c] ss:$12 sps:$4 sm:$0xff]  }
 0x9db   :  { %v1915_v47 = vpop.f32.mrb[56].mxu1 }
 0x9dc   :  { %v5295_v48 = vpop.f32.mrb[57].mxu1  ;;  %v1916_v28 = vadd.f32 %v1915_v47, %v1708_v21  ;;  %v5770_v47 = vld [vmem:[%s8708_s12 + $0x138] ss:$12 sps:$4 sm:$0xff]  }
 0x9dd   :  { %v1918_v52 = vpop.f32.mrb[58].mxu1  ;;  %v5776_v48 = vld [vmem:[%s8708_s12 + $0x154] ss:$12 sps:$4 sm:$0xff]  }
 0x9de   :  { %v5296_v49 = vpop.f32.mrb[59].mxu1  ;;  %v5777_v52 = vld [vmem:[%s8708_s12 + $0x158] ss:$12 sps:$4 sm:$0xff]  }
 0x9df   :  { %v5774_v49 = vld [vmem:[%s8708_s12 + $0x150] ss:$12 sps:$4 sm:$0xff]  }
 0x9fb   :  { %v2083_v34 = vpop.f32.mrb[32].mxu0  ;;  %v2124_v7 = vpop.f32.mrb[60].mxu1 }
 0x9fc   :  { %v5565_v38 = vadd.f32 %v2083_v34, %v7822_v12  ;;  %v2085_v40 = vpop.f32.mrb[33].mxu0  ;;  %v5315_v44 = vpop.f32.mrb[61].mxu1  ;;  %v2144_v25 = vadd.f32 %v7829_v17, %v2124_v7  ;;  %v5781_v34 = vld [vmem:[%s8708_s12 + $0x170] ss:$12 sps:$4 sm:$0xff]   ;;  %v5778_v7 = vld [vmem:[%s8708_s12 + $0x168] ss:$12 sps:$4 sm:$0xff]  }
 0x9fd   :  { %v2087_v39 = vpop.f32.mrb[34].mxu0  ;;  %v2127_v20 = vpop.f32.mrb[62].mxu1  ;;  %v5566_v33 = vadd.f32 %v2085_v40, %v7825_v53  ;;  %v5786_v40 = vld [vmem:[%s8708_s12 + $0x8] ss:$12 sps:$4 sm:$0xff]  }
 0x9fe   :  { %v4744_v41 = vmul.f32 -1.442695, %v5565_v38  ;;  %v2088_v26 = vpop.f32.mrb[35].mxu0  ;;  %v5316_v24 = vpop.f32.mrb[63].mxu1  ;;  %v5785_v38 = vld [vmem:[%s8708_s12 + $0x4] ss:$12 sps:$4 sm:$0xff]  }
 0x9ff   :  { %v4745_v30 = vmul.f32 -1.442695, %v5566_v33  ;;  %v5787_v44 = vld [vmem:[%s8765_s5 + $0x8] sm:$0xff]   ;;  %v5788_v26 = vld [vmem:[%s8708_s12 + $0x18] ss:$12 sps:$4 sm:$0xff]   ;;  %v5800_v24 = vld [vmem:[%s8765_s5 + $0x10] sm:$0xff]  }
 0xa00   :  { %5958 = vpow2.f32 %v4744_v41  ;;  %v5783_v39 = vld [vmem:[%s8708_s12] ss:$12 sps:$4 sm:$0xff]   ;;  %v5790_v20 = vld [vmem:[%s8708_s12 + $0x1c] ss:$12 sps:$4 sm:$0xff]  }
 0xa01   :  { %5960 = vpow2.f32 %v4745_v30  ;;  %v5791_v41 = vld [vmem:[%s8708_s12 + $0x20] ss:$12 sps:$4 sm:$0xff]   ;;  %v5795_v30 = vld [vmem:[%s8708_s12 + $0x38] ss:$12 sps:$4 sm:$0xff]  }
 0xa02   :  { %v5794_v33 = vld [vmem:[%s8708_s12 + $0x34] ss:$12 sps:$4 sm:$0xff]  }
 0xa0a   :  { %v5959_v35 = vpop.eup %5958 }
 0xa0b   :  { %v2134_v13 = vadd.f32 1.0, %v5959_v35  ;;  %v5961_v14 = vpop.eup %5960  ;;  %v5809_v35 = vld [vmem:[%s8765_s5 + $0x18] sm:$0xff]  }
 0xa0c   :  { %v2141_v22 = vadd.f32 1.0, %v5961_v14  ;;  %v5798_v14 = vld [vmem:[%s8708_s12 + $0x4c] ss:$12 sps:$4 sm:$0xff]  }
 0xa0d   :  { %5962 = vrcp.f32 %v2134_v13  ;;  %v5792_v13 = vld [vmem:[%s8708_s12 + $0x30] ss:$12 sps:$4 sm:$0xff]  }
 0xa0e   :  { %5964 = vrcp.f32 %v2141_v22  ;;  %v5818_v22 = vld [vmem:[%s8766_s7] sm:$0xff]  }
 0xa17   :  { %v5963_v63 = vpop.eup %5962 }
 0xa18   :  { %v2145_v1 = vmul.f32 %v5963_v63, %v2144_v25  ;;  %v5965_v61 = vpop.eup %5964  ;;  %v5796_v25 = vld [vmem:[%s8708_s12 + $0x48] ss:$12 sps:$4 sm:$0xff]   ;;  %v5803_v63 = vld [vmem:[%s8708_s12 + $0x64] ss:$12 sps:$4 sm:$0xff]  }
 0xa19   :  { %v2148_v29 = vsub.f32 1.0, %v5965_v61  ;;  %v2150_v19 = vmul.f32 0.0, %v5965_v61  ;;  %v5810_v61 = vld [vmem:[%s8708_s12 + $0x90] ss:$12 sps:$4 sm:$0xff]  }
 0xa1a   :  { %v2146_v15 = vadd.f32 %v2145_v1, %v1916_v28  ;;  %v5804_v28 = vld [vmem:[%s8708_s12 + $0x68] ss:$12 sps:$4 sm:$0xff]   ;;  %v5801_v1 = vld [vmem:[%s8708_s12 + $0x60] ss:$12 sps:$4 sm:$0xff]  }
 0xa1b   :  { %v2268_v32 = vpop.f32.mrb[64].mxu1 }
 0xa1c   :  { %5966 = vtanh.f32 %v2146_v15  ;;  %v7833_v57 = vadd.f32 %v2268_v32, %v1708_v21  ;;  %v5335_v3 = vpop.f32.mrb[65].mxu1  ;;  %v5799_v21 = vld [vmem:[%s8708_s12 + $0x50] ss:$12 sps:$4 sm:$0xff]   ;;  %v5808_v32 = vld [vmem:[%s8708_s12 + $0x80] ss:$12 sps:$4 sm:$0xff]  }
 0xa1d   :  { %v2271_v4 = vpop.f32.mrb[66].mxu1  ;;  %v5807_v15 = vld [vmem:[%s8708_s12 + $0x7c] ss:$12 sps:$4 sm:$0xff]   ;;  %v5805_v3 = vld [vmem:[%s8708_s12 + $0x78] ss:$12 sps:$4 sm:$0xff]  }
 0xa1e   :  { %v5336_v9 = vpop.f32.mrb[67].mxu1  ;;  %v5812_v4 = vld [vmem:[%s8708_s12 + $0x94] ss:$12 sps:$4 sm:$0xff]  }
 0xa1f   :  { %v5813_v9 = vld [vmem:[%s8708_s12 + $0x98] ss:$12 sps:$4 sm:$0xff]  }
 0xa26   :  { %v5967_v55 = vpop.eup %5966 }
 0xa27   :  { %v2149_v60 = vmul.f32 %v5967_v55, %v2148_v29  ;;  %v5816_v29 = vld [vmem:[%s8708_s12 + $0xac] ss:$12 sps:$4 sm:$0xff]   ;;  %v5817_v55 = vld [vmem:[%s8708_s12 + $0xb0] ss:$12 sps:$4 sm:$0xff]  }
 0xa29   :  { %v7835_v10 = vadd.f32 %v2150_v19, %v2149_v60  ;;  %v5814_v60 = vld [vmem:[%s8708_s12 + $0xa8] ss:$12 sps:$4 sm:$0xff]   ;;  %v7996_v19 = vld [vmem:[#allocation14 + $0x4] ss:$12 sps:$4 sm:$0xff]  }
 0xa2b   :  { %v2274_v50 = vpack.c.bf16 %v7835_v10, %v7835_v10 }
 0xa2d   :  { %2308 = vmatmul.mubr.bf16.vlgmr.msra.gmra.mrb[36].mxu0 %v2274_v50  ;;  %5354 = vmatmul.mubr.bf16.vlgmr.msra.gmra.mrb[68].mxu1 %v2274_v50  ;;  %v8002_v50 = vld [vmem:[#allocation14] ss:$12 sps:$4 sm:$0xff]  }
 0xa2e   :  { %2612 = vmatpush1.bf16.msra.mxu0 %v5750_v27  ;;  %5358 = vmatpush3.bf16.msra.mxu1 %v5753_v45  ;;  %v5773_v45 = vld [vmem:[%s8708_s12 + $0x140] ss:$12 sps:$4 sm:$0xff]  }
 0xa2f   :  { %2613 = vmatprep.subr.bf16.mxu0 %v5756_v51  ;;  %5359 = vmatprep.subr.bf16.mxu1 %v5757_v54  ;;  %v5819_v27 = vld [vmem:[%s8766_s7 + $0x8] sm:$0xff]   ;;  %v8004_v51 = vld [vmem:[#allocation14 + $0x8] ss:$12 sps:$4 sm:$0xff]  }
 0xa30   :  { %2643 = vmatprep.mubr.bf16.mxu0 %v8754_v58  ;;  %5373 = vmatprep.mubr.bf16.mxu1 %v5782_v37 }
 0xa32   :  { %2614 = vmatpush1.bf16.msra.mxu0 %v5754_v42  ;;  %5360 = vmatpush3.bf16.msra.mxu1 %v5757_v54  ;;  %v8008_v54 = vld [vmem:[#allocation14 + $0x1c] ss:$12 sps:$4 sm:$0xff]   ;;  %v8015_v42 = vld [vmem:[#allocation14 + $0x18] ss:$12 sps:$4 sm:$0xff]  }
 0xa33   :  { %2615 = vmatprep.subr.bf16.mxu0 %v5760_v2  ;;  %5361 = vmatprep.subr.bf16.mxu1 %v5761_v31  ;;  %v8017_v2 = vld [vmem:[#allocation14 + $0x20] ss:$12 sps:$4 sm:$0xff]  }
 0xa36   :  { %2616 = vmatpush1.bf16.msra.mxu0 %v5758_v56  ;;  %5362 = vmatpush3.bf16.msra.mxu1 %v5761_v31  ;;  %v8021_v31 = vld [vmem:[#allocation14 + $0x34] ss:$12 sps:$4 sm:$0xff]  }
 0xa37   :  { %2617 = vmatprep.subr.bf16.mxu0 %v5764_v5  ;;  %5363 = vmatprep.subr.bf16.mxu1 %v5765_v62  ;;  %v5839_v56 = vld [vmem:[%s8766_s7 + $0x18] sm:$0xff]  }
 0xa38   :  { %v8029_v5 = vld [vmem:[#allocation14 + $0x30] ss:$12 sps:$4 sm:$0xff]  }
 0xa3a   :  { %2618 = vmatpush1.bf16.msra.mxu0 %v5762_v0  ;;  %5364 = vmatpush3.bf16.msra.mxu1 %v5765_v62  ;;  %v8031_v62 = vld [vmem:[#allocation14 + $0x38] ss:$12 sps:$4 sm:$0xff]  }
 0xa3b   :  { %2619 = vmatprep.subr.bf16.mxu0 %v5768_v8  ;;  %5365 = vmatprep.subr.bf16.mxu1 %v5769_v11  ;;  %v8035_v0 = vld [vmem:[#allocation14 + $0x4c] ss:$12 sps:$4 sm:$0xff]   ;;  %v8039_v8 = vld [vmem:[#allocation14 + $0x48] ss:$12 sps:$4 sm:$0xff]  }
 0xa3e   :  { %2620 = vmatpush1.bf16.msra.mxu0 %v5766_v59  ;;  %5366 = vmatpush3.bf16.msra.mxu1 %v5769_v11  ;;  %v8041_v11 = vld [vmem:[#allocation14 + $0x50] ss:$12 sps:$4 sm:$0xff]  }
 0xa3f   :  { %2621 = vmatprep.subr.bf16.mxu0 %v5772_v6  ;;  %5367 = vmatprep.subr.bf16.mxu1 %v5773_v45  ;;  %v8045_v59 = vld [vmem:[#allocation14 + $0x64] ss:$12 sps:$4 sm:$0xff]   ;;  %v8052_v6 = vld [vmem:[#allocation14 + $0x60] ss:$12 sps:$4 sm:$0xff]  }
 0xa42   :  { %2622 = vmatpush1.bf16.msra.mxu0 %v5770_v47  ;;  %5368 = vmatpush3.bf16.msra.mxu1 %v5773_v45  ;;  %v8054_v45 = vld [vmem:[#allocation14 + $0x68] ss:$12 sps:$4 sm:$0xff]  }
 0xa43   :  { %2623 = vmatprep.subr.bf16.mxu0 %v5776_v48  ;;  %5369 = vmatprep.subr.bf16.mxu1 %v5777_v52  ;;  %v8058_v47 = vld [vmem:[#allocation14 + $0x7c] ss:$12 sps:$4 sm:$0xff]   ;;  %v8062_v48 = vld [vmem:[#allocation14 + $0x78] ss:$12 sps:$4 sm:$0xff]  }
 0xa46   :  { %2624 = vmatpush1.bf16.msra.mxu0 %v5774_v49  ;;  %5370 = vmatpush3.bf16.msra.mxu1 %v5777_v52  ;;  %v8064_v52 = vld [vmem:[#allocation14 + $0x80] ss:$12 sps:$4 sm:$0xff]  }
 0xa47   :  { %2625 = vmatprep.subr.bf16.mxu0 %v5780_v23  ;;  %5371 = vmatprep.subr.bf16.mxu1 %v5781_v34  ;;  %v8068_v49 = vld [vmem:[#allocation14 + $0x94] ss:$12 sps:$4 sm:$0xff]   ;;  %v8073_v23 = vld [vmem:[#allocation14 + $0x90] ss:$12 sps:$4 sm:$0xff]  }
 0xa4a   :  { %2626 = vmatpush1.bf16.msra.mxu0 %v5778_v7  ;;  %5372 = vmatpush3.bf16.msra.mxu1 %v5781_v34  ;;  %v8075_v34 = vld [vmem:[#allocation14 + $0x98] ss:$12 sps:$4 sm:$0xff]  }
 0xa4b   :  { %2901 = vmatprep.subr.bf16.mxu0 %v5785_v38  ;;  %5381 = vmatprep.subr.bf16.mxu1 %v5786_v40  ;;  %v8079_v7 = vld [vmem:[#allocation14 + $0xac] ss:$12 sps:$4 sm:$0xff]   ;;  %v8083_v38 = vld [vmem:[#allocation14 + $0xa8] ss:$12 sps:$4 sm:$0xff]  }
 0xa4d   :  { %2644 = vmatmul.mubr.bf16.vlgmr.msra.gmra.mrb[40].mxu0 %v5782_v37  ;;  %5374 = vmatmul.mubr.bf16.vlgmr.msra.gmra.mrb[72].mxu1 %v5787_v44  ;;  %v5836_v37 = vld [vmem:[%s8766_s7 + $0x10] sm:$0xff]  }
 0xa4e   :  { %2902 = vmatpush1.bf16.msra.mxu0 %v5783_v39  ;;  %5382 = vmatpush3.bf16.msra.mxu1 %v5786_v40  ;;  %v8085_v40 = vld [vmem:[#allocation14 + $0xb0] ss:$12 sps:$4 sm:$0xff]  }
 0xa4f   :  { %2903 = vmatprep.subr.bf16.mxu0 %v5790_v20  ;;  %5383 = vmatprep.subr.bf16.mxu1 %v5791_v41 }
 0xa50   :  { %2653 = vmatprep.mubr.bf16.mxu0 %v8754_v58  ;;  %5377 = vmatprep.mubr.bf16.mxu1 %v5800_v24 }
 0xa52   :  { %2904 = vmatpush1.bf16.msra.mxu0 %v5788_v26  ;;  %5384 = vmatpush3.bf16.msra.mxu1 %v5791_v41 }
 0xa53   :  { %2905 = vmatprep.subr.bf16.mxu0 %v5794_v33  ;;  %5385 = vmatprep.subr.bf16.mxu1 %v5795_v30 }
 0xa55   :  { %2654 = vmatmul.mubr.bf16.gmra.mrb[44].mxu0 %v5787_v44  ;;  %5378 = vmatmul.mubr.bf16.gmra.mrb[76].mxu1 %v5809_v35  ;;  %v3148_v44 = vpack.c.bf16 %v7494_v43, %v7494_v43 }
 0xa56   :  { %2906 = vmatpush1.bf16.msra.mxu0 %v5792_v13  ;;  %5386 = vmatpush3.bf16.msra.mxu1 %v5795_v30 }
 0xa57   :  { %2907 = vmatprep.subr.bf16.mxu0 %v5798_v14  ;;  %5387 = vmatprep.subr.bf16.mxu1 %v5799_v21 }
 0xa58   :  { %2663 = vmatprep.mubr.bf16.mxu0 %v8754_v58  ;;  %5397 = vmatprep.mubr.bf16.mxu1 %v5818_v22 }
 0xa5a   :  { %2908 = vmatpush1.bf16.msra.mxu0 %v5796_v25  ;;  %5388 = vmatpush3.bf16.msra.mxu1 %v5799_v21 }
 0xa5b   :  { %2909 = vmatprep.subr.bf16.mxu0 %v5803_v63  ;;  %5389 = vmatprep.subr.bf16.mxu1 %v5804_v28 }
 0xa5d   :  { %2664 = vmatmul.mubr.bf16.gmra.mrb[48].mxu0 %v5800_v24 }
 0xa5e   :  { %2910 = vmatpush1.bf16.msra.mxu0 %v5801_v1  ;;  %5390 = vmatpush3.bf16.msra.mxu1 %v5804_v28 }
 0xa5f   :  { %2911 = vmatprep.subr.bf16.mxu0 %v5807_v15  ;;  %5391 = vmatprep.subr.bf16.mxu1 %v5808_v32 }
 0xa60   :  { %2673 = vmatprep.mubr.bf16.mxu0 %v8754_v58 }
 0xa62   :  { %2912 = vmatpush1.bf16.msra.mxu0 %v5805_v3  ;;  %5392 = vmatpush3.bf16.msra.mxu1 %v5808_v32 }
 0xa63   :  { %2913 = vmatprep.subr.bf16.mxu0 %v5812_v4  ;;  %5393 = vmatprep.subr.bf16.mxu1 %v5813_v9 }
 0xa65   :  { %2674 = vmatmul.mubr.bf16.gmra.mrb[52].mxu0 %v5809_v35 }
 0xa66   :  { %2914 = vmatpush1.bf16.msra.mxu0 %v5810_v61  ;;  %5394 = vmatpush3.bf16.msra.mxu1 %v5813_v9 }
 0xa67   :  { %2915 = vmatprep.subr.bf16.mxu0 %v5816_v29  ;;  %5395 = vmatprep.subr.bf16.mxu1 %v5817_v55 }
 0xa68   :  { %2933 = vmatprep.mubr.bf16.mxu0 %v8754_v58 }
 0xa6a   :  { %2916 = vmatpush1.bf16.msra.mxu0 %v5814_v60  ;;  %5396 = vmatpush3.bf16.msra.mxu1 %v5817_v55  ;;  %v3039_v55 = vld [vmem:[#allocation13] sm:$0x7] }
 0xa6b   :  { %3277 = vmatprep.subr.bf16.mxu0 %v7996_v19  ;;  %5405 = vmatprep.subr.bf16.mxu1 %v8753_v46  ;;  %v8137_v60 = vrot.slane %v3039_v55, %v8764_v18 }
 0xa6d   :  { %2934 = vmatmul.mubr.bf16.vlgmr.msra.gmra.mrb[40].mxu0 %v5818_v22  ;;  %5398 = vmatmul.mubr.bf16.vlgmr.msra.gmra.mrb[72].mxu1 %v5819_v27 }
 0xa6e   :  { %3278 = vmatpush1.bf16.msra.mxu0 %v8002_v50  ;;  %5406 = vmatpush3.bf16.msra.mxu1 %v8004_v51 }
 0xa6f   :  { %3279 = vmatprep.subr.bf16.mxu0 %v8008_v54  ;;  %5407 = vmatprep.subr.bf16.mxu1 %v8753_v46 }
 0xa70   :  { %2943 = vmatprep.mubr.bf16.mxu0 %v8754_v58  ;;  %5401 = vmatprep.mubr.bf16.mxu1 %v5836_v37 }
 0xa72   :  { %3280 = vmatpush1.bf16.msra.mxu0 %v8015_v42  ;;  %5408 = vmatpush3.bf16.msra.mxu1 %v8017_v2 }
 0xa73   :  { %3281 = vmatprep.subr.bf16.mxu0 %v8021_v31  ;;  %5409 = vmatprep.subr.bf16.mxu1 %v8753_v46 }
 0xa75   :  { %2944 = vmatmul.mubr.bf16.gmra.mrb[44].mxu0 %v5819_v27  ;;  %5402 = vmatmul.mubr.bf16.gmra.mrb[76].mxu1 %v5839_v56 }
 0xa76   :  { %3282 = vmatpush1.bf16.msra.mxu0 %v8029_v5  ;;  %5410 = vmatpush3.bf16.msra.mxu1 %v8031_v62 }
 0xa77   :  { %3283 = vmatprep.subr.bf16.mxu0 %v8035_v0  ;;  %5411 = vmatprep.subr.bf16.mxu1 %v8753_v46 }
 0xa78   :  { %2953 = vmatprep.mubr.bf16.mxu0 %v8754_v58  ;;  %5421 = vmatprep.mubr.msk.bf16.mxu1 %vm6390_vm0, %v8753_v46 }
 0xa7a   :  { %3284 = vmatpush1.bf16.msra.mxu0 %v8039_v8  ;;  %5412 = vmatpush3.bf16.msra.mxu1 %v8041_v11 }
 0xa7b   :  { %3285 = vmatprep.subr.bf16.mxu0 %v8045_v59  ;;  %5413 = vmatprep.subr.bf16.mxu1 %v8753_v46 }
 0xa7d   :  { %2954 = vmatmul.mubr.bf16.gmra.mrb[48].mxu0 %v5836_v37  ;;  %v3044_v37 = vrot.slane %v3039_v55, %v8762_v16 }
 0xa7e   :  { %3286 = vmatpush1.bf16.msra.mxu0 %v8052_v6  ;;  %5414 = vmatpush3.bf16.msra.mxu1 %v8054_v45 }
 0xa7f   :  { %3287 = vmatprep.subr.bf16.mxu0 %v8058_v47  ;;  %5415 = vmatprep.subr.bf16.mxu1 %v8753_v46 }
 0xa80   :  { %2963 = vmatprep.mubr.bf16.mxu0 %v8754_v58 }
 0xa82   :  { %3288 = vmatpush1.bf16.msra.mxu0 %v8062_v48  ;;  %5416 = vmatpush3.bf16.msra.mxu1 %v8064_v52 }
 0xa83   :  { %3289 = vmatprep.subr.bf16.mxu0 %v8068_v49  ;;  %5417 = vmatprep.subr.bf16.mxu1 %v8753_v46 }
 0xa85   :  { %2964 = vmatmul.mubr.bf16.gmra.mrb[52].mxu0 %v5839_v56 }
 0xa86   :  { %3290 = vmatpush1.bf16.msra.mxu0 %v8073_v23  ;;  %5418 = vmatpush3.bf16.msra.mxu1 %v8075_v34 }
 0xa87   :  { %3291 = vmatprep.subr.bf16.mxu0 %v8079_v7  ;;  %5419 = vmatprep.subr.bf16.mxu1 %v8753_v46 }
 0xa88   :  { %3309 = vmatprep.mubr.bf16.mxu0 %v8754_v58 }
 0xa8a   :  { %3292 = vmatpush1.bf16.msra.mxu0 %v8083_v38  ;;  %5420 = vmatpush3.bf16.msra.mxu1 %v8085_v40 }
 0xa8b   :  { %3387 = vmatprep.subr.bf16.mxu0 %v7996_v19  ;;  %5425 = vmatprep.subr.bf16.mxu1 %v8753_v46 }
 0xa8d   :  { %3310 = vmatmul.mubr.bf16.vlgmr.msra.gmra.mrb[56].mxu0 %v3148_v44  ;;  %5422 = vmatmul.mubr.bf16.vlgmr.msra.gmra.mrb[80].mxu1 %v3148_v44 }
 0xa8e   :  { %3388 = vmatpush1.bf16.msra.mxu0 %v8002_v50  ;;  %5426 = vmatpush3.bf16.msra.mxu1 %v8004_v51 }
 0xa8f   :  { %3389 = vmatprep.subr.bf16.mxu0 %v8008_v54  ;;  %5427 = vmatprep.subr.bf16.mxu1 %v8753_v46 }
 0xa90   :  { %3419 = vmatprep.mubr.bf16.mxu0 %v8754_v58  ;;  %5441 = vmatprep.mubr.msk.bf16.mxu1 %vm6390_vm0, %v8753_v46 }
 0xa92   :  { %3390 = vmatpush1.bf16.msra.mxu0 %v8015_v42  ;;  %5428 = vmatpush3.bf16.msra.mxu1 %v8017_v2 }
 0xa93   :  { %3391 = vmatprep.subr.bf16.mxu0 %v8021_v31  ;;  %5429 = vmatprep.subr.bf16.mxu1 %v8753_v46 }
 0xa96   :  { %3392 = vmatpush1.bf16.msra.mxu0 %v8029_v5  ;;  %5430 = vmatpush3.bf16.msra.mxu1 %v8031_v62 }
 0xa97   :  { %3393 = vmatprep.subr.bf16.mxu0 %v8035_v0  ;;  %5431 = vmatprep.subr.bf16.mxu1 %v8753_v46 }
 0xa9a   :  { %3394 = vmatpush1.bf16.msra.mxu0 %v8039_v8  ;;  %5432 = vmatpush3.bf16.msra.mxu1 %v8041_v11 }
 0xa9b   :  { %3395 = vmatprep.subr.bf16.mxu0 %v8045_v59  ;;  %5433 = vmatprep.subr.bf16.mxu1 %v8753_v46 }
 0xa9e   :  { %3396 = vmatpush1.bf16.msra.mxu0 %v8052_v6  ;;  %5434 = vmatpush3.bf16.msra.mxu1 %v8054_v45 }
 0xa9f   :  { %3397 = vmatprep.subr.bf16.mxu0 %v8058_v47  ;;  %5435 = vmatprep.subr.bf16.mxu1 %v8753_v46 }
 0xaa2   :  { %3398 = vmatpush1.bf16.msra.mxu0 %v8062_v48  ;;  %5436 = vmatpush3.bf16.msra.mxu1 %v8064_v52 }
 0xaa3   :  { %3399 = vmatprep.subr.bf16.mxu0 %v8068_v49  ;;  %5437 = vmatprep.subr.bf16.mxu1 %v8753_v46 }
 0xaa6   :  { %3400 = vmatpush1.bf16.msra.mxu0 %v8073_v23  ;;  %5438 = vmatpush3.bf16.msra.mxu1 %v8075_v34 }
 0xaa7   :  { %3401 = vmatprep.subr.bf16.mxu0 %v8079_v7  ;;  %5439 = vmatprep.subr.bf16.mxu1 %v8753_v46 }
 0xaaa   :  { %3402 = vmatpush1.bf16.msra.mxu0 %v8083_v38  ;;  %5440 = vmatpush3.bf16.msra.mxu1 %v8085_v40 }
 0xaab   :  { %3498 = vmatprep.subr.bf16.mxu0 %v7996_v19  ;;  %5445 = vmatprep.subr.bf16.mxu1 %v8753_v46 }
 0xb00   :  { %v2309_v43 = vpop.f32.mrb[36].mxu0  ;;  %v2350_v39 = vpop.f32.mrb[68].mxu1 }
 0xb01   :  { %v5567_v20 = vadd.f32 %v2309_v43, %v7822_v12  ;;  %v2311_v41 = vpop.f32.mrb[37].mxu0  ;;  %v5355_v26 = vpop.f32.mrb[69].mxu1  ;;  %v2370_v1 = vadd.f32 %v7829_v17, %v2350_v39  ;;  %v3048_v43 = vrot.slane %v3039_v55, %v8763_v36 }
 0xb02   :  { %v2313_v24 = vpop.f32.mrb[38].mxu0  ;;  %v2353_v33 = vpop.f32.mrb[70].mxu1  ;;  %v5568_v14 = vadd.f32 %v2311_v41, %v7825_v53 }
 0xb03   :  { %v4762_v30 = vmul.f32 -1.442695, %v5567_v20  ;;  %v2314_v35 = vpop.f32.mrb[39].mxu0  ;;  %v5356_v13 = vpop.f32.mrb[71].mxu1 }
 0xb04   :  { %v4763_v21 = vmul.f32 -1.442695, %v5568_v14 }
 0xb05   :  { %5968 = vpow2.f32 %v4762_v30 }
 0xb06   :  { %5970 = vpow2.f32 %v4763_v21 }
 0xb0f   :  { %v5969_v22 = vpop.eup %5968 }
 0xb10   :  { %v2360_v25 = vadd.f32 1.0, %v5969_v22  ;;  %v5971_v63 = vpop.eup %5970 }
 0xb11   :  { %v2367_v28 = vadd.f32 1.0, %v5971_v63 }
 0xb12   :  { %5972 = vrcp.f32 %v2360_v25 }
 0xb13   :  { %5974 = vrcp.f32 %v2367_v28 }
 0xb1c   :  { %v5973_v12 = vpop.eup %5972 }
 0xb1d   :  { %v2371_v15 = vmul.f32 %v5973_v12, %v2370_v1  ;;  %v5975_v3 = vpop.eup %5974 }
 0xb1e   :  { %v2374_v4 = vsub.f32 1.0, %v5975_v3  ;;  %v2376_v61 = vmul.f32 %v5975_v3, %v7835_v10 }
 0xb1f   :  { %v2372_v32 = vadd.f32 %v2371_v15, %v7833_v57 }
 0xb21   :  { %5976 = vtanh.f32 %v2372_v32 }
 0xb2b   :  { %v5977_v9 = vpop.eup %5976 }
 0xb2c   :  { %v2375_v53 = vmul.f32 %v5977_v9, %v2374_v4 }
 0xb2e   :  { %v2377_v29 = vadd.f32 %v2376_v61, %v2375_v53 }
 0xb30   :  { %2378 = vst [vmem:[#allocation21] sm:$0xff] %v2377_v29 }
 0xb40   :  { %v2935_v27 = vpop.f32.mrb[40].mxu0  ;;  %v5399_v17 = vpop.f32.mrb[72].mxu1 }
 0xb41   :  { %v8141_v56 = vadd.f32 %v5399_v17, %v8137_v60  ;;  %v2937_v57 = vpop.f32.mrb[41].mxu0  ;;  %v8143_v44 = vpop.f32.mrb[73].mxu1 }
 0xb42   :  { %v2939_v39 = vpop.f32.mrb[42].mxu0  ;;  %v5400_v10 = vpop.f32.mrb[74].mxu1 }
 0xb43   :  { %v8146_v20 = vadd.f32 %v3044_v37, %v2939_v39  ;;  %v8149_v41 = vadd.f32 %v5400_v10, %v8137_v60  ;;  %v2941_v18 = vpop.f32.mrb[43].mxu0  ;;  %v3011_v26 = vpop.f32.mrb[75].mxu1 }
 0xb44   :  { %v8151_v24 = vadd.f32 %v3048_v43, %v2941_v18  ;;  %v8154_v33 = vadd.f32 %v8137_v60, %v3011_v26 }
 0xb48   :  { %v2945_v30 = vpop.f32.mrb[44].mxu0  ;;  %v5403_v35 = vpop.f32.mrb[76].mxu1 }
 0xb49   :  { %v8156_v13 = vadd.f32 %v3044_v37, %v2945_v30  ;;  %v2947_v14 = vpop.f32.mrb[45].mxu0  ;;  %v8159_v21 = vadd.f32 %v5403_v35, %v8137_v60  ;;  %v3024_v22 = vpop.f32.mrb[77].mxu1 }
 0xb4a   :  { %v8161_v25 = vadd.f32 %v3048_v43, %v2947_v14  ;;  %v2949_v63 = vpop.f32.mrb[46].mxu0  ;;  %v8164_v28 = vadd.f32 %v8137_v60, %v3024_v22  ;;  %v5404_v1 = vpop.f32.mrb[78].mxu1 }
 0xb4b   :  { %8767 = vst [vmem:[#allocation32_spill] sm:$0xff] %v8159_v21  ;;  %v8166_v12 = vadd.f32 %v3044_v37, %v2949_v63  ;;  %v2951_v15 = vpop.f32.mrb[47].mxu0  ;;  %v8169_v32 = vadd.f32 %v5404_v1, %v8137_v60  ;;  %v3027_v3 = vpop.f32.mrb[79].mxu1 }
 0xb4c   :  { %v8171_v4 = vadd.f32 %v3048_v43, %v2951_v15  ;;  %v8174_v9 = vadd.f32 %v8137_v60, %v3027_v3  ;;  %v3056_v3 = vadd.f32 %v3044_v37, %v2935_v27  ;;  %v8192_v27 = vld [vmem:[#allocation16] ss:$0 sm:$0xff] }
 0xb4d   :  { %8768 = vst [vmem:[#allocation33_spill] sm:$0xff] %v8169_v32 }
 0xb4e   :  { %8769 = vst [vmem:[#allocation34_spill] sm:$0xff] %v8174_v9 }
 0xb50   :  { %v2955_v53 = vpop.f32.mrb[48].mxu0 }
 0xb51   :  { %v8176_v61 = vadd.f32 %v3044_v37, %v2955_v53  ;;  %v2957_v29 = vpop.f32.mrb[49].mxu0  ;;  %v3057_v53 = vadd.f32 %v3048_v43, %v2937_v57 }
 0xb52   :  { %v8178_v55 = vadd.f32 %v3048_v43, %v2957_v29  ;;  %v2959_v17 = vpop.f32.mrb[50].mxu0 }
 0xb53   :  { %v8180_v39 = vadd.f32 %v3044_v37, %v2959_v17  ;;  %v2961_v10 = vpop.f32.mrb[51].mxu0 }
 0xb54   :  { %v8182_v18 = vadd.f32 %v3048_v43, %v2961_v10 }
 0xb58   :  { %v2965_v26 = vpop.f32.mrb[52].mxu0 }
 0xb59   :  { %v8184_v30 = vadd.f32 %v3044_v37, %v2965_v26  ;;  %v2967_v35 = vpop.f32.mrb[53].mxu0 }
 0xb5a   :  { %v8186_v14 = vadd.f32 %v3048_v43, %v2967_v35  ;;  %v2969_v22 = vpop.f32.mrb[54].mxu0 }
 0xb5b   :  { %8770 = vst [vmem:[#allocation35_spill] sm:$0xff] %v8184_v30  ;;  %v8188_v63 = vadd.f32 %v3044_v37, %v2969_v22  ;;  %v2971_v1 = vpop.f32.mrb[55].mxu0 }
 0xb5c   :  { %8771 = vst [vmem:[#allocation36_spill] sm:$0xff] %v8186_v14  ;;  %v8190_v15 = vadd.f32 %v3048_v43, %v2971_v1 }
 0xb5d   :  { %8772 = vst [vmem:[#allocation37_spill] sm:$0xff] %v8188_v63 }
 0xb60   :  { %v3311_v29 = vpop.f32.mrb[56].mxu0  ;;  %v3352_v17 = vpop.f32.mrb[80].mxu1 }
 0xb61   :  { %v3358_v32 = vadd.f32 %v3311_v29, %v3056_v3  ;;  %v3313_v36 = vpop.f32.mrb[57].mxu0  ;;  %v5423_v10 = vpop.f32.mrb[81].mxu1  ;;  %v3372_v57 = vadd.f32 %v8192_v27, %v3352_v17  ;;  %v6131_v3 = vld [vmem:[#allocation3 + $0x38] sm:$0xff] }
 0xb62   :  { %v3365_v16 = vadd.f32 %v3313_v36, %v3057_v53  ;;  %v3315_v21 = vpop.f32.mrb[58].mxu0  ;;  %v3355_v26 = vpop.f32.mrb[82].mxu1  ;;  %v3058_v36 = vadd.f32 %v8137_v60, %v8143_v44 }
 0xb63   :  { %v4845_v30 = vmul.f32 -1.442695, %v3358_v32  ;;  %v3316_v9 = vpop.f32.mrb[59].mxu0  ;;  %v5424_v35 = vpop.f32.mrb[83].mxu1 }
 0xb64   :  { %v4846_v14 = vmul.f32 -1.442695, %v3365_v16 }
 0xb65   :  { %5978 = vpow2.f32 %v4845_v30 }
 0xb66   :  { %5980 = vpow2.f32 %v4846_v14 }
 0xb6f   :  { %v5979_v22 = vpop.eup %5978 }
 0xb70   :  { %v3362_v63 = vadd.f32 1.0, %v5979_v22  ;;  %v5981_v1 = vpop.eup %5980 }
 0xb71   :  { %v3369_v37 = vadd.f32 1.0, %v5981_v1 }
 0xb72   :  { %5982 = vrcp.f32 %v3362_v63 }
 0xb73   :  { %5984 = vrcp.f32 %v3369_v37 }
 0xb7c   :  { %v5983_v43 = vpop.eup %5982 }
 0xb7d   :  { %v3373_v21 = vmul.f32 %v5983_v43, %v3372_v57  ;;  %v5985_v9 = vpop.eup %5984 }
 0xb7e   :  { %v3376_v16 = vsub.f32 1.0, %v5985_v9  ;;  %v3378_v63 = vmul.f32 %v6131_v3, %v5985_v9 }
 0xb7f   :  { %v3374_v32 = vadd.f32 %v3373_v21, %v3058_v36 }
 0xb81   :  { %5986 = vtanh.f32 %v3374_v32 }
 0xb8b   :  { %v5987_v30 = vpop.eup %5986 }
 0xb8c   :  { %v3377_v14 = vmul.f32 %v5987_v30, %v3376_v16 }
 0xb8e   :  { %v8197_v53 = vadd.f32 %v3378_v63, %v3377_v14 }
 0xb90   :  { %v3386_v29 = vpack.c.bf16 %v8197_v53, %v8197_v53 }
 0xb92   :  { %3420 = vmatmul.mubr.bf16.vlgmr.msra.gmra.mrb[60].mxu0 %v3386_v29  ;;  %5442 = vmatmul.mubr.bf16.vlgmr.msra.gmra.mrb[84].mxu1 %v3386_v29 }
 0xb93   :  { %3499 = vmatpush1.bf16.msra.mxu0 %v8002_v50  ;;  %5446 = vmatpush3.bf16.msra.mxu1 %v8004_v51 }
 0xb94   :  { %3500 = vmatprep.subr.bf16.mxu0 %v8008_v54  ;;  %5447 = vmatprep.subr.bf16.mxu1 %v8753_v46 }
 0xb95   :  { %3530 = vmatprep.mubr.bf16.mxu0 %v8754_v58  ;;  %5461 = vmatprep.mubr.msk.bf16.mxu1 %vm6390_vm0, %v8753_v46 }
 0xb97   :  { %3501 = vmatpush1.bf16.msra.mxu0 %v8015_v42  ;;  %5448 = vmatpush3.bf16.msra.mxu1 %v8017_v2 }
 0xb98   :  { %3502 = vmatprep.subr.bf16.mxu0 %v8021_v31  ;;  %5449 = vmatprep.subr.bf16.mxu1 %v8753_v46 }
 0xb9b   :  { %3503 = vmatpush1.bf16.msra.mxu0 %v8029_v5  ;;  %5450 = vmatpush3.bf16.msra.mxu1 %v8031_v62 }
 0xb9c   :  { %3504 = vmatprep.subr.bf16.mxu0 %v8035_v0  ;;  %5451 = vmatprep.subr.bf16.mxu1 %v8753_v46 }
 0xb9f   :  { %3505 = vmatpush1.bf16.msra.mxu0 %v8039_v8  ;;  %5452 = vmatpush3.bf16.msra.mxu1 %v8041_v11 }
 0xba0   :  { %3506 = vmatprep.subr.bf16.mxu0 %v8045_v59  ;;  %5453 = vmatprep.subr.bf16.mxu1 %v8753_v46 }
 0xba3   :  { %3507 = vmatpush1.bf16.msra.mxu0 %v8052_v6  ;;  %5454 = vmatpush3.bf16.msra.mxu1 %v8054_v45 }
 0xba4   :  { %3508 = vmatprep.subr.bf16.mxu0 %v8058_v47  ;;  %5455 = vmatprep.subr.bf16.mxu1 %v8753_v46 }
 0xba7   :  { %3509 = vmatpush1.bf16.msra.mxu0 %v8062_v48  ;;  %5456 = vmatpush3.bf16.msra.mxu1 %v8064_v52 }
 0xba8   :  { %3510 = vmatprep.subr.bf16.mxu0 %v8068_v49  ;;  %5457 = vmatprep.subr.bf16.mxu1 %v8753_v46 }
 0xbab   :  { %3511 = vmatpush1.bf16.msra.mxu0 %v8073_v23  ;;  %5458 = vmatpush3.bf16.msra.mxu1 %v8075_v34 }
 0xbac   :  { %3512 = vmatprep.subr.bf16.mxu0 %v8079_v7  ;;  %5459 = vmatprep.subr.bf16.mxu1 %v8753_v46 }
 0xbaf   :  { %3513 = vmatpush1.bf16.msra.mxu0 %v8083_v38  ;;  %5460 = vmatpush3.bf16.msra.mxu1 %v8085_v40 }
 0xbb0   :  { %3609 = vmatprep.subr.bf16.mxu0 %v7996_v19  ;;  %5465 = vmatprep.subr.bf16.mxu1 %v8753_v46 }
 0xc65   :  { %v3421_v60 = vpop.f32.mrb[60].mxu0  ;;  %v3462_v44 = vpop.f32.mrb[84].mxu1 }
 0xc66   :  { %v3468_v17 = vadd.f32 %v3421_v60, %v8146_v20  ;;  %v3423_v10 = vpop.f32.mrb[61].mxu0  ;;  %v5443_v26 = vpop.f32.mrb[85].mxu1  ;;  %v3482_v30 = vadd.f32 %v8192_v27, %v3462_v44 }
 0xc67   :  { %v3475_v35 = vadd.f32 %v3423_v10, %v8151_v24  ;;  %v3425_v22 = vpop.f32.mrb[62].mxu0  ;;  %v3465_v1 = vpop.f32.mrb[86].mxu1 }
 0xc68   :  { %v4847_v37 = vmul.f32 -1.442695, %v3468_v17  ;;  %v3426_v57 = vpop.f32.mrb[63].mxu0  ;;  %v5444_v43 = vpop.f32.mrb[87].mxu1 }
 0xc69   :  { %v4848_v36 = vmul.f32 -1.442695, %v3475_v35 }
 0xc6a   :  { %5988 = vpow2.f32 %v4847_v37 }
 0xc6b   :  { %5990 = vpow2.f32 %v4848_v36 }
 0xc74   :  { %v5989_v21 = vpop.eup %5988 }
 0xc75   :  { %v3472_v32 = vadd.f32 1.0, %v5989_v21  ;;  %v5991_v9 = vpop.eup %5990 }
 0xc76   :  { %v3479_v16 = vadd.f32 1.0, %v5991_v9 }
 0xc77   :  { %5992 = vrcp.f32 %v3472_v32 }
 0xc78   :  { %5994 = vrcp.f32 %v3479_v16 }
 0xc81   :  { %v5993_v20 = vpop.eup %5992 }
 0xc82   :  { %v3483_v14 = vmul.f32 %v5993_v20, %v3482_v30  ;;  %v5995_v3 = vpop.eup %5994 }
 0xc83   :  { %v3486_v63 = vsub.f32 1.0, %v5995_v3  ;;  %v3488_v17 = vmul.f32 %v5995_v3, %v8197_v53 }
 0xc84   :  { %v3484_v24 = vadd.f32 %v3483_v14, %v8154_v33 }
 0xc86   :  { %5996 = vtanh.f32 %v3484_v24 }
 0xc90   :  { %v5997_v29 = vpop.eup %5996 }
 0xc91   :  { %v3487_v60 = vmul.f32 %v5997_v29, %v3486_v63 }
 0xc93   :  { %v8241_v10 = vadd.f32 %v3488_v17, %v3487_v60 }
 0xc95   :  { %v3497_v26 = vpack.c.bf16 %v8241_v10, %v8241_v10 }
 0xc97   :  { %3531 = vmatmul.mubr.bf16.vlgmr.msra.gmra.mrb[64].mxu0 %v3497_v26  ;;  %5462 = vmatmul.mubr.bf16.vlgmr.msra.gmra.mrb[88].mxu1 %v3497_v26 }
 0xc98   :  { %3610 = vmatpush1.bf16.msra.mxu0 %v8002_v50  ;;  %5466 = vmatpush3.bf16.msra.mxu1 %v8004_v51 }
 0xc99   :  { %3611 = vmatprep.subr.bf16.mxu0 %v8008_v54  ;;  %5467 = vmatprep.subr.bf16.mxu1 %v8753_v46 }
 0xc9a   :  { %3641 = vmatprep.mubr.bf16.mxu0 %v8754_v58  ;;  %5481 = vmatprep.mubr.msk.bf16.mxu1 %vm6390_vm0, %v8753_v46 }
 0xc9c   :  { %3612 = vmatpush1.bf16.msra.mxu0 %v8015_v42  ;;  %5468 = vmatpush3.bf16.msra.mxu1 %v8017_v2 }
 0xc9d   :  { %3613 = vmatprep.subr.bf16.mxu0 %v8021_v31  ;;  %5469 = vmatprep.subr.bf16.mxu1 %v8753_v46 }
 0xca0   :  { %3614 = vmatpush1.bf16.msra.mxu0 %v8029_v5  ;;  %5470 = vmatpush3.bf16.msra.mxu1 %v8031_v62 }
 0xca1   :  { %3615 = vmatprep.subr.bf16.mxu0 %v8035_v0  ;;  %5471 = vmatprep.subr.bf16.mxu1 %v8753_v46 }
 0xca4   :  { %3616 = vmatpush1.bf16.msra.mxu0 %v8039_v8  ;;  %5472 = vmatpush3.bf16.msra.mxu1 %v8041_v11 }
 0xca5   :  { %3617 = vmatprep.subr.bf16.mxu0 %v8045_v59  ;;  %5473 = vmatprep.subr.bf16.mxu1 %v8753_v46 }
 0xca8   :  { %3618 = vmatpush1.bf16.msra.mxu0 %v8052_v6  ;;  %5474 = vmatpush3.bf16.msra.mxu1 %v8054_v45 }
 0xca9   :  { %3619 = vmatprep.subr.bf16.mxu0 %v8058_v47  ;;  %5475 = vmatprep.subr.bf16.mxu1 %v8753_v46 }
 0xcac   :  { %3620 = vmatpush1.bf16.msra.mxu0 %v8062_v48  ;;  %5476 = vmatpush3.bf16.msra.mxu1 %v8064_v52 }
 0xcad   :  { %3621 = vmatprep.subr.bf16.mxu0 %v8068_v49  ;;  %5477 = vmatprep.subr.bf16.mxu1 %v8753_v46 }
 0xcb0   :  { %3622 = vmatpush1.bf16.msra.mxu0 %v8073_v23  ;;  %5478 = vmatpush3.bf16.msra.mxu1 %v8075_v34 }
 0xcb1   :  { %3623 = vmatprep.subr.bf16.mxu0 %v8079_v7  ;;  %5479 = vmatprep.subr.bf16.mxu1 %v8753_v46 }
 0xcb4   :  { %3624 = vmatpush1.bf16.msra.mxu0 %v8083_v38  ;;  %5480 = vmatpush3.bf16.msra.mxu1 %v8085_v40 }
 0xcb5   :  { %3720 = vmatprep.subr.bf16.mxu0 %v7996_v19  ;;  %5485 = vmatprep.subr.bf16.mxu1 %v8753_v46 }
 0xd6a   :  { %v3532_v33 = vpop.f32.mrb[64].mxu0  ;;  %v3573_v44 = vpop.f32.mrb[88].mxu1 }
 0xd6b   :  { %v3579_v35 = vadd.f32 %v3532_v33, %v8156_v13  ;;  %v3534_v22 = vpop.f32.mrb[65].mxu0  ;;  %v5463_v1 = vpop.f32.mrb[89].mxu1  ;;  %v3593_v24 = vadd.f32 %v8192_v27, %v3573_v44 }
 0xd6c   :  { %v3586_v37 = vadd.f32 %v3534_v22, %v8161_v25  ;;  %v3536_v57 = vpop.f32.mrb[66].mxu0  ;;  %v3576_v43 = vpop.f32.mrb[90].mxu1 }
 0xd6d   :  { %v4849_v36 = vmul.f32 -1.442695, %v3579_v35  ;;  %v3537_v21 = vpop.f32.mrb[67].mxu0  ;;  %v5464_v32 = vpop.f32.mrb[91].mxu1 }
 0xd6e   :  { %v4850_v9 = vmul.f32 -1.442695, %v3586_v37 }
 0xd6f   :  { %5998 = vpow2.f32 %v4849_v36 }
 0xd70   :  { %6000 = vpow2.f32 %v4850_v9 }
 0xd79   :  { %v5999_v16 = vpop.eup %5998 }
 0xd7a   :  { %v3583_v30 = vadd.f32 1.0, %v5999_v16  ;;  %v6001_v20 = vpop.eup %6000 }
 0xd7b   :  { %v3590_v14 = vadd.f32 1.0, %v6001_v20 }
 0xd7c   :  { %6002 = vrcp.f32 %v3583_v30 }
 0xd7d   :  { %6004 = vrcp.f32 %v3590_v14 }
 0xd86   :  { %v6003_v13 = vpop.eup %6002 }
 0xd87   :  { %v3594_v3 = vmul.f32 %v6003_v13, %v3593_v24  ;;  %v6005_v63 = vpop.eup %6004 }
 0xd88   :  { %v3597_v29 = vsub.f32 1.0, %v6005_v63  ;;  %v3599_v26 = vmul.f32 %v6005_v63, %v8241_v10 }
 0xd89   :  { %v3595_v25 = vadd.f32 %v3594_v3, %v8141_v56 }
 0xd8b   :  { %6006 = vtanh.f32 %v3595_v25 }
 0xd95   :  { %v6007_v60 = vpop.eup %6006 }
 0xd96   :  { %v3598_v17 = vmul.f32 %v6007_v60, %v3597_v29 }
 0xd98   :  { %v8285_v33 = vadd.f32 %v3599_v26, %v3598_v17 }
 0xd9a   :  { %v3608_v35 = vpack.c.bf16 %v8285_v33, %v8285_v33 }
 0xd9c   :  { %3642 = vmatmul.mubr.bf16.vlgmr.msra.gmra.mrb[68].mxu0 %v3608_v35  ;;  %5482 = vmatmul.mubr.bf16.vlgmr.msra.gmra.mrb[92].mxu1 %v3608_v35 }
 0xd9d   :  { %3721 = vmatpush1.bf16.msra.mxu0 %v8002_v50  ;;  %5486 = vmatpush3.bf16.msra.mxu1 %v8004_v51 }
 0xd9e   :  { %3722 = vmatprep.subr.bf16.mxu0 %v8008_v54  ;;  %5487 = vmatprep.subr.bf16.mxu1 %v8753_v46 }
 0xd9f   :  { %3752 = vmatprep.mubr.bf16.mxu0 %v8754_v58  ;;  %5501 = vmatprep.mubr.msk.bf16.mxu1 %vm6390_vm0, %v8753_v46 }
 0xda1   :  { %3723 = vmatpush1.bf16.msra.mxu0 %v8015_v42  ;;  %5488 = vmatpush3.bf16.msra.mxu1 %v8017_v2 }
 0xda2   :  { %3724 = vmatprep.subr.bf16.mxu0 %v8021_v31  ;;  %5489 = vmatprep.subr.bf16.mxu1 %v8753_v46 }
 0xda5   :  { %3725 = vmatpush1.bf16.msra.mxu0 %v8029_v5  ;;  %5490 = vmatpush3.bf16.msra.mxu1 %v8031_v62 }
 0xda6   :  { %3726 = vmatprep.subr.bf16.mxu0 %v8035_v0  ;;  %5491 = vmatprep.subr.bf16.mxu1 %v8753_v46 }
 0xda9   :  { %3727 = vmatpush1.bf16.msra.mxu0 %v8039_v8  ;;  %5492 = vmatpush3.bf16.msra.mxu1 %v8041_v11 }
 0xdaa   :  { %3728 = vmatprep.subr.bf16.mxu0 %v8045_v59  ;;  %5493 = vmatprep.subr.bf16.mxu1 %v8753_v46 }
 0xdad   :  { %3729 = vmatpush1.bf16.msra.mxu0 %v8052_v6  ;;  %5494 = vmatpush3.bf16.msra.mxu1 %v8054_v45 }
 0xdae   :  { %3730 = vmatprep.subr.bf16.mxu0 %v8058_v47  ;;  %5495 = vmatprep.subr.bf16.mxu1 %v8753_v46 }
 0xdb1   :  { %3731 = vmatpush1.bf16.msra.mxu0 %v8062_v48  ;;  %5496 = vmatpush3.bf16.msra.mxu1 %v8064_v52 }
 0xdb2   :  { %3732 = vmatprep.subr.bf16.mxu0 %v8068_v49  ;;  %5497 = vmatprep.subr.bf16.mxu1 %v8753_v46 }
 0xdb5   :  { %3733 = vmatpush1.bf16.msra.mxu0 %v8073_v23  ;;  %5498 = vmatpush3.bf16.msra.mxu1 %v8075_v34 }
 0xdb6   :  { %3734 = vmatprep.subr.bf16.mxu0 %v8079_v7  ;;  %5499 = vmatprep.subr.bf16.mxu1 %v8753_v46 }
 0xdb9   :  { %3735 = vmatpush1.bf16.msra.mxu0 %v8083_v38  ;;  %5500 = vmatpush3.bf16.msra.mxu1 %v8085_v40 }
 0xdba   :  { %3831 = vmatprep.subr.bf16.mxu0 %v7996_v19  ;;  %5505 = vmatprep.subr.bf16.mxu1 %v8753_v46 }
 0xe6f   :  { %v3643_v56 = vpop.f32.mrb[68].mxu0  ;;  %v3684_v44 = vpop.f32.mrb[92].mxu1 }
 0xe70   :  { %v3690_v22 = vadd.f32 %v3643_v56, %v8166_v12  ;;  %v3645_v1 = vpop.f32.mrb[69].mxu0  ;;  %v5483_v37 = vpop.f32.mrb[93].mxu1  ;;  %v3704_v13 = vadd.f32 %v8192_v27, %v3684_v44 }
 0xe71   :  { %v3697_v57 = vadd.f32 %v3645_v1, %v8171_v4  ;;  %v3647_v43 = vpop.f32.mrb[70].mxu0  ;;  %v3687_v36 = vpop.f32.mrb[94].mxu1 }
 0xe72   :  { %v4851_v21 = vmul.f32 -1.442695, %v3690_v22  ;;  %v3648_v32 = vpop.f32.mrb[71].mxu0  ;;  %v5484_v9 = vpop.f32.mrb[95].mxu1 }
 0xe73   :  { %v4852_v16 = vmul.f32 -1.442695, %v3697_v57 }
 0xe74   :  { %6008 = vpow2.f32 %v4851_v21 }
 0xe75   :  { %6010 = vpow2.f32 %v4852_v16 }
 0xe7e   :  { %v6009_v30 = vpop.eup %6008 }
 0xe7f   :  { %v3694_v20 = vadd.f32 1.0, %v6009_v30  ;;  %v6011_v14 = vpop.eup %6010 }
 0xe80   :  { %v3701_v24 = vadd.f32 1.0, %v6011_v14 }
 0xe81   :  { %6012 = vrcp.f32 %v3694_v20 }
 0xe82   :  { %6014 = vrcp.f32 %v3701_v24 }
 0xe8b   :  { %v6013_v12 = vpop.eup %6012 }
 0xe8c   :  { %v3705_v3 = vmul.f32 %v6013_v12, %v3704_v13  ;;  %v6015_v25 = vpop.eup %6014 }
 0xe8d   :  { %v3708_v63 = vsub.f32 1.0, %v6015_v25  ;;  %v3710_v17 = vmul.f32 %v6015_v25, %v8285_v33 }
 0xe8e   :  { %v3706_v4 = vadd.f32 %v3705_v3, %v8149_v41 }
 0xe90   :  { %6016 = vtanh.f32 %v3706_v4 }
 0xe9a   :  { %v6017_v29 = vpop.eup %6016 }
 0xe9b   :  { %v3709_v60 = vmul.f32 %v6017_v29, %v3708_v63 }
 0xe9d   :  { %v8329_v26 = vadd.f32 %v3710_v17, %v3709_v60 }
 0xe9f   :  { %v3719_v35 = vpack.c.bf16 %v8329_v26, %v8329_v26 }
 0xea1   :  { %3753 = vmatmul.mubr.bf16.vlgmr.msra.gmra.mrb[72].mxu0 %v3719_v35  ;;  %5502 = vmatmul.mubr.bf16.vlgmr.msra.gmra.mrb[96].mxu1 %v3719_v35 }
 0xea2   :  { %3832 = vmatpush1.bf16.msra.mxu0 %v8002_v50  ;;  %5506 = vmatpush3.bf16.msra.mxu1 %v8004_v51 }
 0xea3   :  { %3833 = vmatprep.subr.bf16.mxu0 %v8008_v54  ;;  %5507 = vmatprep.subr.bf16.mxu1 %v8753_v46 }
 0xea4   :  { %3863 = vmatprep.mubr.bf16.mxu0 %v8754_v58  ;;  %5521 = vmatprep.mubr.msk.bf16.mxu1 %vm6390_vm0, %v8753_v46 }
 0xea6   :  { %3834 = vmatpush1.bf16.msra.mxu0 %v8015_v42  ;;  %5508 = vmatpush3.bf16.msra.mxu1 %v8017_v2 }
 0xea7   :  { %3835 = vmatprep.subr.bf16.mxu0 %v8021_v31  ;;  %5509 = vmatprep.subr.bf16.mxu1 %v8753_v46 }
 0xeaa   :  { %3836 = vmatpush1.bf16.msra.mxu0 %v8029_v5  ;;  %5510 = vmatpush3.bf16.msra.mxu1 %v8031_v62 }
 0xeab   :  { %3837 = vmatprep.subr.bf16.mxu0 %v8035_v0  ;;  %5511 = vmatprep.subr.bf16.mxu1 %v8753_v46 }
 0xeae   :  { %3838 = vmatpush1.bf16.msra.mxu0 %v8039_v8  ;;  %5512 = vmatpush3.bf16.msra.mxu1 %v8041_v11 }
 0xeaf   :  { %3839 = vmatprep.subr.bf16.mxu0 %v8045_v59  ;;  %5513 = vmatprep.subr.bf16.mxu1 %v8753_v46 }
 0xeb2   :  { %3840 = vmatpush1.bf16.msra.mxu0 %v8052_v6  ;;  %5514 = vmatpush3.bf16.msra.mxu1 %v8054_v45 }
 0xeb3   :  { %3841 = vmatprep.subr.bf16.mxu0 %v8058_v47  ;;  %5515 = vmatprep.subr.bf16.mxu1 %v8753_v46 }
 0xeb6   :  { %3842 = vmatpush1.bf16.msra.mxu0 %v8062_v48  ;;  %5516 = vmatpush3.bf16.msra.mxu1 %v8064_v52 }
 0xeb7   :  { %3843 = vmatprep.subr.bf16.mxu0 %v8068_v49  ;;  %5517 = vmatprep.subr.bf16.mxu1 %v8753_v46 }
 0xeba   :  { %3844 = vmatpush1.bf16.msra.mxu0 %v8073_v23  ;;  %5518 = vmatpush3.bf16.msra.mxu1 %v8075_v34 }
 0xebb   :  { %3845 = vmatprep.subr.bf16.mxu0 %v8079_v7  ;;  %5519 = vmatprep.subr.bf16.mxu1 %v8753_v46 }
 0xebe   :  { %3846 = vmatpush1.bf16.msra.mxu0 %v8083_v38  ;;  %5520 = vmatpush3.bf16.msra.mxu1 %v8085_v40 }
 0xebf   :  { %3942 = vmatprep.subr.bf16.mxu0 %v7996_v19  ;;  %5525 = vmatprep.subr.bf16.mxu1 %v8753_v46 }
 0xf74   :  { %v3754_v41 = vpop.f32.mrb[72].mxu0  ;;  %v3795_v56 = vpop.f32.mrb[96].mxu1 }
 0xf75   :  { %v3801_v44 = vadd.f32 %v3754_v41, %v8176_v61  ;;  %v3756_v22 = vpop.f32.mrb[73].mxu0  ;;  %v5503_v1 = vpop.f32.mrb[97].mxu1  ;;  %v3815_v14 = vadd.f32 %v8192_v27, %v3795_v56  ;;  %v6133_v41 = vld [vmem:[#allocation14] ss:$12 sps:$4 sm:$0xff]   ;;  %v6134_v56 = vld [vmem:[#allocation14 + $0x8] ss:$12 sps:$4 sm:$0xff]  }
 0xf76   :  { %v3808_v37 = vadd.f32 %v3756_v22, %v8178_v55  ;;  %v3758_v57 = vpop.f32.mrb[74].mxu0  ;;  %v3798_v43 = vpop.f32.mrb[98].mxu1  ;;  %v6136_v22 = vld [vmem:[#allocation14 + $0x18] ss:$12 sps:$4 sm:$0xff]   ;;  %v6137_v1 = vld [vmem:[#allocation14 + $0x20] ss:$12 sps:$4 sm:$0xff]  }
 0xf77   :  { %v4853_v36 = vmul.f32 -1.442695, %v3801_v44  ;;  %v3759_v21 = vpop.f32.mrb[75].mxu0  ;;  %v5504_v32 = vpop.f32.mrb[99].mxu1  ;;  %v6135_v44 = vld [vmem:[#allocation14 + $0x1c] ss:$12 sps:$4 sm:$0xff]  }
 0xf78   :  { %v4854_v9 = vmul.f32 -1.442695, %v3808_v37  ;;  %v6138_v37 = vld [vmem:[#allocation14 + $0x34] ss:$12 sps:$4 sm:$0xff]   ;;  %v6139_v57 = vld [vmem:[#allocation14 + $0x30] ss:$12 sps:$4 sm:$0xff]  }
 0xf79   :  { %6018 = vpow2.f32 %v4853_v36  ;;  %v6140_v43 = vld [vmem:[#allocation14 + $0x38] ss:$12 sps:$4 sm:$0xff]   ;;  %v6142_v21 = vld [vmem:[#allocation14 + $0x48] ss:$12 sps:$4 sm:$0xff]   ;;  %v6143_v32 = vld [vmem:[#allocation14 + $0x50] ss:$12 sps:$4 sm:$0xff]  }
 0xf7a   :  { %6020 = vpow2.f32 %v4854_v9  ;;  %v6141_v36 = vld [vmem:[#allocation14 + $0x4c] ss:$12 sps:$4 sm:$0xff]   ;;  %v6144_v9 = vld [vmem:[#allocation14 + $0x64] ss:$12 sps:$4 sm:$0xff]  }
 0xf83   :  { %v6019_v16 = vpop.eup %6018 }
 0xf84   :  { %v3805_v19 = vadd.f32 1.0, %v6019_v16  ;;  %v6021_v30 = vpop.eup %6020  ;;  %v6145_v16 = vld [vmem:[#allocation14 + $0x60] ss:$12 sps:$4 sm:$0xff]  }
 0xf85   :  { %v3812_v20 = vadd.f32 1.0, %v6021_v30  ;;  %v6147_v30 = vld [vmem:[#allocation14 + $0x7c] ss:$12 sps:$4 sm:$0xff]  }
 0xf86   :  { %6022 = vrcp.f32 %v3805_v19  ;;  %v6146_v19 = vld [vmem:[#allocation14 + $0x68] ss:$12 sps:$4 sm:$0xff]  }
 0xf87   :  { %6024 = vrcp.f32 %v3812_v20  ;;  %v6148_v20 = vld [vmem:[#allocation14 + $0x78] ss:$12 sps:$4 sm:$0xff]  }
 0xf90   :  { %v6023_v61 = vpop.eup %6022 }
 0xf91   :  { %v3816_v24 = vmul.f32 %v6023_v61, %v3815_v14  ;;  %v6025_v13 = vpop.eup %6024  ;;  %v6149_v14 = vld [vmem:[#allocation14 + $0x80] ss:$12 sps:$4 sm:$0xff]  }
 0xf92   :  { %v3819_v12 = vsub.f32 1.0, %v6025_v13  ;;  %v3821_v25 = vmul.f32 %v6025_v13, %v8329_v26  ;;  %v6150_v61 = vld [vmem:[#allocation14 + $0x94] ss:$12 sps:$4 sm:$0xff]   ;;  %v6153_v13 = vld [vmem:[#allocation14 + $0xac] ss:$12 sps:$4 sm:$0xff]  }
 0xf93   :  { %v3817_v55 = vadd.f32 %v3816_v24, %v8164_v28  ;;  %v6151_v24 = vld [vmem:[#allocation14 + $0x90] ss:$12 sps:$4 sm:$0xff]  }
 0xf95   :  { %6026 = vtanh.f32 %v3817_v55  ;;  %v6152_v55 = vld [vmem:[#allocation14 + $0x98] ss:$12 sps:$4 sm:$0xff]  }
 0xf9f   :  { %v6027_v3 = vpop.eup %6026 }
 0xfa0   :  { %v3820_v4 = vmul.f32 %v6027_v3, %v3819_v12  ;;  %v6154_v12 = vld [vmem:[#allocation14 + $0xa8] ss:$12 sps:$4 sm:$0xff]   ;;  %v6155_v3 = vld [vmem:[#allocation14 + $0xb0] ss:$12 sps:$4 sm:$0xff]  }
 0xfa2   :  { %v8373_v63 = vadd.f32 %v3821_v25, %v3820_v4  ;;  %v5856_v4 = vld [vmem:[%s8712_s16 + $0x4] ss:$8 sps:$4 sm:$0xff]  }
 0xfa4   :  { %v3830_v29 = vpack.c.bf16 %v8373_v63, %v8373_v63 }
 0xfa6   :  { %3864 = vmatmul.mubr.bf16.vlgmr.msra.gmra.mrb[76].mxu0 %v3830_v29  ;;  %5522 = vmatmul.mubr.bf16.vlgmr.msra.gmra.mrb[100].mxu1 %v3830_v29 }
 0xfa7   :  { %3943 = vmatpush1.bf16.msra.mxu0 %v8002_v50  ;;  %5526 = vmatpush3.bf16.msra.mxu1 %v8004_v51  ;;  %v6132_v50 = vld [vmem:[#allocation14 + $0x4] ss:$12 sps:$4 sm:$0xff]  }
 0xfa8   :  { %3944 = vmatprep.subr.bf16.mxu0 %v8008_v54  ;;  %5527 = vmatprep.subr.bf16.mxu1 %v8753_v46 }
 0xfa9   :  { %3974 = vmatprep.mubr.bf16.mxu0 %v8754_v58  ;;  %5541 = vmatprep.mubr.msk.bf16.mxu1 %vm6390_vm0, %v8753_v46 }
 0xfab   :  { %3945 = vmatpush1.bf16.msra.mxu0 %v8015_v42  ;;  %5528 = vmatpush3.bf16.msra.mxu1 %v8017_v2 }
 0xfac   :  { %3946 = vmatprep.subr.bf16.mxu0 %v8021_v31  ;;  %5529 = vmatprep.subr.bf16.mxu1 %v8753_v46 }
 0xfaf   :  { %3947 = vmatpush1.bf16.msra.mxu0 %v8029_v5  ;;  %5530 = vmatpush3.bf16.msra.mxu1 %v8031_v62 }
 0xfb0   :  { %3948 = vmatprep.subr.bf16.mxu0 %v8035_v0  ;;  %5531 = vmatprep.subr.bf16.mxu1 %v8753_v46 }
 0xfb3   :  { %3949 = vmatpush1.bf16.msra.mxu0 %v8039_v8  ;;  %5532 = vmatpush3.bf16.msra.mxu1 %v8041_v11 }
 0xfb4   :  { %3950 = vmatprep.subr.bf16.mxu0 %v8045_v59  ;;  %5533 = vmatprep.subr.bf16.mxu1 %v8753_v46 }
 0xfb7   :  { %3951 = vmatpush1.bf16.msra.mxu0 %v8052_v6  ;;  %5534 = vmatpush3.bf16.msra.mxu1 %v8054_v45 }
 0xfb8   :  { %3952 = vmatprep.subr.bf16.mxu0 %v8058_v47  ;;  %5535 = vmatprep.subr.bf16.mxu1 %v8753_v46 }
 0xfbb   :  { %3953 = vmatpush1.bf16.msra.mxu0 %v8062_v48  ;;  %5536 = vmatpush3.bf16.msra.mxu1 %v8064_v52 }
 0xfbc   :  { %3954 = vmatprep.subr.bf16.mxu0 %v8068_v49  ;;  %5537 = vmatprep.subr.bf16.mxu1 %v8753_v46 }
 0xfbf   :  { %3955 = vmatpush1.bf16.msra.mxu0 %v8073_v23  ;;  %5538 = vmatpush3.bf16.msra.mxu1 %v8075_v34 }
 0xfc0   :  { %3956 = vmatprep.subr.bf16.mxu0 %v8079_v7  ;;  %5539 = vmatprep.subr.bf16.mxu1 %v8753_v46  ;;  %v8773_v7 = vld [vmem:[#allocation34_spill] sm:$0xff] }
 0xfc3   :  { %3957 = vmatpush1.bf16.msra.mxu0 %v8083_v38  ;;  %5540 = vmatpush3.bf16.msra.mxu1 %v8085_v40 }
 0xfc4   :  { %4053 = vmatprep.subr.bf16.mxu0 %v6132_v50  ;;  %5545 = vmatprep.subr.bf16.mxu1 %v8753_v46  ;;  %v8774_v50 = vld [vmem:[#allocation35_spill] sm:$0xff] }
0x1079   :  { %v3865_v51 = vpop.f32.mrb[76].mxu0  ;;  %v3906_v54 = vpop.f32.mrb[100].mxu1 }
0x107a   :  { %v3912_v42 = vadd.f32 %v3865_v51, %v8180_v39  ;;  %v3867_v2 = vpop.f32.mrb[77].mxu0  ;;  %v5523_v31 = vpop.f32.mrb[101].mxu1  ;;  %v3926_v49 = vadd.f32 %v8192_v27, %v3906_v54 }
0x107b   :  { %v3919_v5 = vadd.f32 %v3867_v2, %v8182_v18  ;;  %v3869_v62 = vpop.f32.mrb[78].mxu0  ;;  %v3909_v0 = vpop.f32.mrb[102].mxu1  ;;  %v8775_v2 = vld [vmem:[#allocation36_spill] sm:$0xff] }
0x107c   :  { %v4855_v8 = vmul.f32 -1.442695, %v3912_v42  ;;  %v3870_v11 = vpop.f32.mrb[79].mxu0  ;;  %v5524_v59 = vpop.f32.mrb[103].mxu1 }
0x107d   :  { %v4856_v6 = vmul.f32 -1.442695, %v3919_v5 }
0x107e   :  { %6028 = vpow2.f32 %v4855_v8 }
0x107f   :  { %6030 = vpow2.f32 %v4856_v6 }
0x1088   :  { %v6029_v45 = vpop.eup %6028 }
0x1089   :  { %v3916_v47 = vadd.f32 1.0, %v6029_v45  ;;  %v6031_v48 = vpop.eup %6030 }
0x108a   :  { %v3923_v52 = vadd.f32 1.0, %v6031_v48 }
0x108b   :  { %6032 = vrcp.f32 %v3916_v47 }
0x108c   :  { %6034 = vrcp.f32 %v3923_v52 }
0x1095   :  { %v6033_v23 = vpop.eup %6032 }
0x1096   :  { %v3927_v34 = vmul.f32 %v6033_v23, %v3926_v49  ;;  %v6035_v40 = vpop.eup %6034  ;;  %v8776_v23 = vld [vmem:[#allocation32_spill] sm:$0xff] }
0x1097   :  { %v3930_v28 = vsub.f32 1.0, %v6035_v40  ;;  %v3932_v60 = vmul.f32 %v6035_v40, %v8373_v63 }
0x1098   :  { %v3928_v38 = vadd.f32 %v3927_v34, %v8773_v7 }
0x109a   :  { %6036 = vtanh.f32 %v3928_v38 }
0x10a4   :  { %v6037_v39 = vpop.eup %6036 }
0x10a5   :  { %v3931_v18 = vmul.f32 %v6037_v39, %v3930_v28 }
0x10a7   :  { %v8416_v17 = vadd.f32 %v3932_v60, %v3931_v18  ;;  %v5854_v60 = vld [vmem:[%s8712_s16] ss:$8 sps:$4 sm:$0xff]  }
0x10a9   :  { %v3941_v35 = vpack.c.bf16 %v8416_v17, %v8416_v17 }
0x10ab   :  { %3975 = vmatmul.mubr.bf16.vlgmr.msra.gmra.mrb[80].mxu0 %v3941_v35  ;;  %5542 = vmatmul.mubr.bf16.vlgmr.msra.gmra.mrb[104].mxu1 %v3941_v35 }
0x10ac   :  { %4054 = vmatpush1.bf16.msra.mxu0 %v6133_v41  ;;  %5546 = vmatpush3.bf16.msra.mxu1 %v6134_v56  ;;  %v5859_v41 = vld [vmem:[%s8712_s16 + $0x14] ss:$8 sps:$4 sm:$0xff]   ;;  %v5857_v56 = vld [vmem:[%s8712_s16 + $0x10] ss:$8 sps:$4 sm:$0xff]  }
0x10ad   :  { %4055 = vmatprep.subr.bf16.mxu0 %v6135_v44  ;;  %5547 = vmatprep.subr.bf16.mxu1 %v8753_v46  ;;  %v5862_v44 = vld [vmem:[%s8712_s16 + $0x24] ss:$8 sps:$4 sm:$0xff]  }
0x10ae   :  { %4085 = vmatprep.mubr.bf16.mxu0 %v8754_v58  ;;  %5561 = vmatprep.mubr.msk.bf16.mxu1 %vm6390_vm0, %v8753_v46 }
0x10b0   :  { %4056 = vmatpush1.bf16.msra.mxu0 %v6136_v22  ;;  %5548 = vmatpush3.bf16.msra.mxu1 %v6137_v1  ;;  %v5860_v22 = vld [vmem:[%s8712_s16 + $0x20] ss:$8 sps:$4 sm:$0xff]   ;;  %v5865_v1 = vld [vmem:[%s8712_s16 + $0x34] ss:$8 sps:$4 sm:$0xff]  }
0x10b1   :  { %4057 = vmatprep.subr.bf16.mxu0 %v6138_v37  ;;  %5549 = vmatprep.subr.bf16.mxu1 %v8753_v46  ;;  %v5863_v37 = vld [vmem:[%s8712_s16 + $0x30] ss:$8 sps:$4 sm:$0xff]  }
0x10b4   :  { %4058 = vmatpush1.bf16.msra.mxu0 %v6139_v57  ;;  %5550 = vmatpush3.bf16.msra.mxu1 %v6140_v43  ;;  %v5868_v57 = vld [vmem:[%s8712_s16 + $0x44] ss:$8 sps:$4 sm:$0xff]   ;;  %v5866_v43 = vld [vmem:[%s8712_s16 + $0x40] ss:$8 sps:$4 sm:$0xff]  }
0x10b5   :  { %4059 = vmatprep.subr.bf16.mxu0 %v6141_v36  ;;  %5551 = vmatprep.subr.bf16.mxu1 %v8753_v46  ;;  %v5871_v36 = vld [vmem:[%s8712_s16 + $0x54] ss:$8 sps:$4 sm:$0xff]  }
0x10b8   :  { %4060 = vmatpush1.bf16.msra.mxu0 %v6142_v21  ;;  %5552 = vmatpush3.bf16.msra.mxu1 %v6143_v32  ;;  %v5869_v21 = vld [vmem:[%s8712_s16 + $0x50] ss:$8 sps:$4 sm:$0xff]   ;;  %v5874_v32 = vld [vmem:[%s8712_s16 + $0x64] ss:$8 sps:$4 sm:$0xff]  }
0x10b9   :  { %4061 = vmatprep.subr.bf16.mxu0 %v6144_v9  ;;  %5553 = vmatprep.subr.bf16.mxu1 %v8753_v46  ;;  %v5872_v9 = vld [vmem:[%s8712_s16 + $0x60] ss:$8 sps:$4 sm:$0xff]  }
0x10bc   :  { %4062 = vmatpush1.bf16.msra.mxu0 %v6145_v16  ;;  %5554 = vmatpush3.bf16.msra.mxu1 %v6146_v19  ;;  %v5877_v16 = vld [vmem:[%s8712_s16 + $0x74] ss:$8 sps:$4 sm:$0xff]   ;;  %v5875_v19 = vld [vmem:[%s8712_s16 + $0x70] ss:$8 sps:$4 sm:$0xff]  }
0x10bd   :  { %4063 = vmatprep.subr.bf16.mxu0 %v6147_v30  ;;  %5555 = vmatprep.subr.bf16.mxu1 %v8753_v46  ;;  %v4167_v30 = vpack.c.bf16 %v8241_v10, %v8197_v53 }
0x10c0   :  { %4064 = vmatpush1.bf16.msra.mxu0 %v6148_v20  ;;  %5556 = vmatpush3.bf16.msra.mxu1 %v6149_v14  ;;  %v4168_v20 = vpack.c.bf16 %v8329_v26, %v8285_v33  ;;  %v4169_v14 = vpack.c.bf16 %v8416_v17, %v8373_v63 }
0x10c1   :  { %4065 = vmatprep.subr.bf16.mxu0 %v6150_v61  ;;  %5557 = vmatprep.subr.bf16.mxu1 %v8753_v46 }
0x10c4   :  { %4066 = vmatpush1.bf16.msra.mxu0 %v6151_v24  ;;  %5558 = vmatpush3.bf16.msra.mxu1 %v6152_v55  ;;  %v8777_v55 = vld [vmem:[#allocation37_spill] sm:$0xff] }
0x10c5   :  { %4067 = vmatprep.subr.bf16.mxu0 %v6153_v13  ;;  %5559 = vmatprep.subr.bf16.mxu1 %v8753_v46 }
0x10c8   :  { %4068 = vmatpush1.bf16.msra.mxu0 %v6154_v12  ;;  %5560 = vmatpush3.bf16.msra.mxu1 %v6155_v3 }
0x10c9   :  { %4279 = vmatprep.subr.bf16.mxu0 %v5856_v4 }
0x117e   :  { %v3976_v25 = vpop.f32.mrb[80].mxu0  ;;  %v4017_v29 = vpop.f32.mrb[104].mxu1 }
0x117f   :  { %v4023_v51 = vadd.f32 %v3976_v25, %v8774_v50  ;;  %v3978_v54 = vpop.f32.mrb[81].mxu0  ;;  %v5543_v42 = vpop.f32.mrb[105].mxu1  ;;  %v4037_v48 = vadd.f32 %v8192_v27, %v4017_v29 }
0x1180   :  { %v4030_v31 = vadd.f32 %v3978_v54, %v8775_v2  ;;  %v3980_v5 = vpop.f32.mrb[82].mxu0  ;;  %v4020_v62 = vpop.f32.mrb[106].mxu1  ;;  %v8778_v2 = vld [vmem:[#allocation30_spill] sm:$0xff] }
0x1181   :  { %v4857_v46 = vmul.f32 -1.442695, %v4023_v51  ;;  %v3981_v0 = vpop.f32.mrb[83].mxu0  ;;  %v5544_v8 = vpop.f32.mrb[107].mxu1  ;;  %v4187_v51 = vld [vmem:[%s8713_s17] sm:$0x3] }
0x1182   :  { %v4858_v11 = vmul.f32 -1.442695, %v4030_v31  ;;  %v8504_v31 = vrot.slane %v4187_v51, %v8778_v2  ;;  %v8779_v5 = vld [vmem:[#allocation31_spill] sm:$0xff]  ;;  %s6391_s17 = smov [#allocation18]  }
0x1183   :  { %6038 = vpow2.f32 %v4857_v46  ;;  %v8507_v62 = vrot.slane %v4187_v51, %v8779_v5  ;;  %v8780_v46 = vld [vmem:[#allocation33_spill] sm:$0xff]  ;;  %s4522_s22 = sshll.u32 %s6391_s17, 4  ;;  %s4523_s22 = int_to_ptr.vmem [resolvable:$true] %s4522_s22 }
0x1184   :  { %6040 = vpow2.f32 %v4858_v11  ;;  %s6278_s23 = scalar_lea.vmem %s4523_s22, 128  ;;  %p6283_p4 = scmp.lt.s32.totalorder %s4523_s22, %s4523_s22 }
0x1185   :  { %p6279_p3 = scmp.ne.s32.totalorder %s4523_s22, %s6278_s23  ;;  %p6284_p5 = scmp.lt.s32.totalorder %s6278_s23, %s6278_s23 }
0x1187   :  { %p6285_p6 = por %p6284_p5, %p6283_p4 }
0x1189   :  { %p6286_p7 = pnand %p6285_p6, %p6279_p3 }
0x118d   :  { %v6039_v59 = vpop.eup %6038 }
0x118e   :  { %v4027_v6 = vadd.f32 1.0, %v6039_v59  ;;  %v6041_v45 = vpop.eup %6040 }
0x118f   :  { %v4034_v47 = vadd.f32 1.0, %v6041_v45 }
0x1190   :  { %6042 = vrcp.f32 %v4027_v6 }
0x1191   :  { %6044 = vrcp.f32 %v4034_v47 }
0x119a   :  { %v6043_v52 = vpop.eup %6042 }
0x119b   :  { %v4038_v49 = vmul.f32 %v6043_v52, %v4037_v48  ;;  %v6045_v7 = vpop.eup %6044 }
0x119c   :  { %v4041_v38 = vsub.f32 1.0, %v6045_v7  ;;  %v4043_v39 = vmul.f32 %v6045_v7, %v8416_v17 }
0x119d   :  { %v4039_v34 = vadd.f32 %v4038_v49, %v8776_v23 }
0x119f   :  { %6046 = vtanh.f32 %v4039_v34 }
0x11a9   :  { %v6047_v40 = vpop.eup %6046 }
0x11aa   :  { %v4042_v28 = vmul.f32 %v6047_v40, %v4041_v38 }
0x11ac   :  { %v8438_v18 = vadd.f32 %v4043_v39, %v4042_v28 }
0x11ae   :  { %v4052_v35 = vpack.c.bf16 %v8438_v18, %v8438_v18 }
0x11b0   :  { %4086 = vmatmul.mubr.bf16.vlgmr.msra.gmra.mrb[84].mxu0 %v4052_v35  ;;  %5562 = vmatmul.mubr.bf16.vlgmr.msra.gmra.mrb[108].mxu1 %v4052_v35 }
0x11b1   :  { %4280 = vmatpush1.bf16.msra.mxu0 %v5854_v60  ;;  %4311 = vmatprep.mubr.bf16.mxu0 %v8754_v58 }
0x11b2   :  { %4281 = vmatprep.subr.bf16.mxu0 %v5859_v41 }
0x11b5   :  { %4282 = vmatpush1.bf16.msra.mxu0 %v5857_v56 }
0x11b6   :  { %4283 = vmatprep.subr.bf16.mxu0 %v5862_v44 }
0x11b9   :  { %4284 = vmatpush1.bf16.msra.mxu0 %v5860_v22 }
0x11ba   :  { %4285 = vmatprep.subr.bf16.mxu0 %v5865_v1 }
0x11bd   :  { %4286 = vmatpush1.bf16.msra.mxu0 %v5863_v37 }
0x11be   :  { %4287 = vmatprep.subr.bf16.mxu0 %v5868_v57 }
0x11c1   :  { %4288 = vmatpush1.bf16.msra.mxu0 %v5866_v43 }
0x11c2   :  { %4289 = vmatprep.subr.bf16.mxu0 %v5871_v36 }
0x11c5   :  { %4290 = vmatpush1.bf16.msra.mxu0 %v5869_v21 }
0x11c6   :  { %4291 = vmatprep.subr.bf16.mxu0 %v5874_v32 }
0x11c9   :  { %4292 = vmatpush1.bf16.msra.mxu0 %v5872_v9 }
0x11ca   :  { %4293 = vmatprep.subr.bf16.mxu0 %v5877_v16 }
0x11cd   :  { %4294 = vmatpush1.bf16.msra.mxu0 %v5875_v19 }
0x11d0   :  { %4312 = vmatmul.mubr.bf16.vlgmr.msra.gmra.mrb[88].mxu0 %v4167_v30 }
0x11d1   :  { %4321 = vmatprep.mubr.bf16.mxu0 %v8754_v58 }
0x11d8   :  { %4322 = vmatmul.mubr.bf16.gmra.mrb[92].mxu0 %v4168_v20 }
0x11d9   :  { %4331 = vmatprep.mubr.bf16.mxu0 %v8754_v58 }
0x11e0   :  { %4332 = vmatmul.mubr.bf16.gmra.mrb[96].mxu0 %v4169_v14 }
0x11e1   :  { %4341 = vmatprep.mubr.bf16.mxu0 %v8754_v58 }
0x1283   :  { %v4087_v61 = vpop.f32.mrb[84].mxu0  ;;  %v4128_v24 = vpop.f32.mrb[108].mxu1 }
0x1284   :  { %v4134_v13 = vadd.f32 %v4087_v61, %v8777_v55  ;;  %v4089_v53 = vpop.f32.mrb[85].mxu0  ;;  %v5563_v10 = vpop.f32.mrb[109].mxu1  ;;  %v4148_v54 = vadd.f32 %v8192_v27, %v4128_v24 }
0x1285   :  { %v4141_v12 = vadd.f32 %v4089_v53, %v8190_v15  ;;  %v4091_v3 = vpop.f32.mrb[86].mxu0  ;;  %v4131_v4 = vpop.f32.mrb[110].mxu1 }
0x1286   :  { %v4859_v33 = vmul.f32 -1.442695, %v4134_v13  ;;  %v4092_v26 = vpop.f32.mrb[87].mxu0  ;;  %v5564_v25 = vpop.f32.mrb[111].mxu1 }
0x1287   :  { %v4860_v29 = vmul.f32 -1.442695, %v4141_v12 }
0x1288   :  { %6048 = vpow2.f32 %v4859_v33 }
0x1289   :  { %6050 = vpow2.f32 %v4860_v29 }
0x1292   :  { %v6049_v63 = vpop.eup %6048 }
0x1293   :  { %v4138_v17 = vadd.f32 1.0, %v6049_v63  ;;  %v6051_v58 = vpop.eup %6050 }
0x1294   :  { %v4145_v50 = vadd.f32 1.0, %v6051_v58 }
0x1295   :  { %6052 = vrcp.f32 %v4138_v17 }
0x1296   :  { %6054 = vrcp.f32 %v4145_v50 }
0x129f   :  { %v6053_v15 = vpop.eup %6052 }
0x12a0   :  { %v4149_v42 = vmul.f32 %v6053_v15, %v4148_v54  ;;  %v6055_v49 = vpop.eup %6054 }
0x12a1   :  { %v4152_v39 = vsub.f32 1.0, %v6055_v49  ;;  %v4154_v41 = vmul.f32 %v6055_v49, %v8438_v18 }
0x12a2   :  { %v4150_v0 = vadd.f32 %v4149_v42, %v8780_v46 }
0x12a3   :  { %v4313_v8 = vpop.f32.mrb[88].mxu0 }
0x12a4   :  { %6056 = vtanh.f32 %v4150_v0  ;;  %v8511_v11 = vadd.f32 %v4313_v8, %v8504_v31  ;;  %v4315_v59 = vpop.f32.mrb[89].mxu0 }
0x12a5   :  { %v8514_v6 = vadd.f32 %v4315_v59, %v8507_v62  ;;  %v4317_v27 = vpop.f32.mrb[90].mxu0 }
0x12a6   :  { %v4319_v45 = vpop.f32.mrb[91].mxu0  ;;  %v8517_v47 = vadd.f32 %v4317_v27, %v8504_v31 }
0x12a7   :  { %v8520_v48 = vadd.f32 %v4319_v45, %v8507_v62  ;;  %v4352_v52 = vmax.f32 %v8511_v11, %v8514_v6 }
0x12a9   :  { %4353 = vmax.xlane.f32.xlu0 %v4352_v52  ;;  %v4355_v34 = vmax.f32 %v8517_v47, %v8520_v48 }
0x12ab   :  { %v4323_v23 = vpop.f32.mrb[92].mxu0 }
0x12ac   :  { %v8527_v7 = vadd.f32 %v4323_v23, %v8504_v31  ;;  %v4325_v38 = vpop.f32.mrb[93].mxu0 }
0x12ad   :  { %v8530_v40 = vadd.f32 %v4325_v38, %v8507_v62  ;;  %v4327_v28 = vpop.f32.mrb[94].mxu0  ;;  %4356 = vmax.xlane.f32.xlu0 %v4355_v34 }
0x12ae   :  { %v6057_v60 = vpop.eup %6056  ;;  %v4329_v35 = vpop.f32.mrb[95].mxu0  ;;  %v8534_v56 = vadd.f32 %v4327_v28, %v8504_v31 }
0x12af   :  { %v8537_v44 = vadd.f32 %v4329_v35, %v8507_v62  ;;  %v4358_v22 = vmax.f32 %v8527_v7, %v8530_v40  ;;  %v4153_v1 = vmul.f32 %v6057_v60, %v4152_v39 }
0x12b1   :  { %4359 = vmax.xlane.f32.xlu1 %v4358_v22  ;;  %v4155_v37 = vadd.f32 %v4154_v41, %v4153_v1  ;;  %v4361_v43 = vmax.f32 %v8534_v56, %v8537_v44 }
0x12b3   :  { %v4333_v57 = vpop.f32.mrb[96].mxu0  ;;  %v4170_v36 = vpack.c.bf16 %v4155_v37, %v8438_v18  ;;  %4158 = vst [vmem:[#allocation18] sm:$0xff] %v4155_v37 }
0x12b4   :  { %v8545_v21 = vadd.f32 %v4333_v57, %v8504_v31  ;;  %v4335_v32 = vpop.f32.mrb[97].mxu0 }
0x12b5   :  { %v8548_v9 = vadd.f32 %v4335_v32, %v8507_v62  ;;  %v4337_v16 = vpop.f32.mrb[98].mxu0  ;;  %4362 = vmax.xlane.f32.xlu1 %v4361_v43  ;;  %4342 = vmatmul.mubr.bf16.gmra.mrb[100].mxu0 %v4170_v36 }
0x12b6   :  { %v8551_v19 = vadd.f32 %v4337_v16, %v8504_v31  ;;  %v4339_v30 = vpop.f32.mrb[99].mxu0 }
0x12b7   :  { %v8554_v20 = vadd.f32 %v4339_v30, %v8507_v62  ;;  %v4364_v18 = vmax.f32 %v8545_v21, %v8548_v9 }
0x12b9   :  { %4365 = vmax.xlane.f32.xlu0 %v4364_v18  ;;  %v4367_v14 = vmax.f32 %v8551_v19, %v8554_v20 }
0x12bb   :  { %4368 = vmax.xlane.f32.xlu1 %v4367_v14 }
0x1336   :  { %v8560_v61 = vpop.xlane.xlu0 %4353 }
0x1337   :  { %v4376_v13 = vsub.f32 %v8511_v11, %v8560_v61  ;;  %v4377_v53 = vsub.f32 %v8514_v6, %v8560_v61 }
0x1339   :  { %v4392_v4 = vmul.f32 1.442695, %v4376_v13  ;;  %v4394_v26 = vmul.f32 1.442695, %v4377_v53 }
0x133a   :  { %v8564_v55 = vpop.xlane.xlu0 %4356 }
0x133b   :  { %v4378_v10 = vsub.f32 %v8517_v47, %v8564_v55  ;;  %v4379_v12 = vsub.f32 %v8520_v48, %v8564_v55  ;;  %6058 = vpow2.f32 %v4392_v4 }
0x133c   :  { %6060 = vpow2.f32 %v4394_v26 }
0x133d   :  { %v4396_v63 = vmul.f32 1.442695, %v4378_v10  ;;  %v4398_v58 = vmul.f32 1.442695, %v4379_v12 }
0x133e   :  { %v8562_v24 = vpop.xlane.xlu1 %4359 }
0x133f   :  { %v4380_v33 = vsub.f32 %v8527_v7, %v8562_v24  ;;  %v4381_v25 = vsub.f32 %v8530_v40, %v8562_v24  ;;  %6062 = vpow2.f32 %v4396_v63 }
0x1340   :  { %6064 = vpow2.f32 %v4398_v58 }
0x1341   :  { %v4400_v54 = vmul.f32 1.442695, %v4380_v33  ;;  %v4402_v42 = vmul.f32 1.442695, %v4381_v25 }
0x1342   :  { %v8574_v3 = vpop.xlane.xlu1 %4362 }
0x1343   :  { %v4382_v17 = vsub.f32 %v8534_v56, %v8574_v3  ;;  %v4383_v50 = vsub.f32 %v8537_v44, %v8574_v3  ;;  %6066 = vpow2.f32 %v4400_v54 }
0x1344   :  { %6068 = vpow2.f32 %v4402_v42 }
0x1345   :  { %v4404_v5 = vmul.f32 1.442695, %v4382_v17  ;;  %v4406_v0 = vmul.f32 1.442695, %v4383_v50  ;;  %v6059_v35 = vpop.eup %6058 }
0x1346   :  { %v8580_v29 = vpop.xlane.xlu0 %4365  ;;  %v6061_v1 = vpop.eup %6060 }
0x1347   :  { %v4384_v15 = vsub.f32 %v8545_v21, %v8580_v29  ;;  %v4385_v2 = vsub.f32 %v8548_v9, %v8580_v29  ;;  %6070 = vpow2.f32 %v4404_v5 }
0x1348   :  { %v8586_v51 = vpop.xlane.xlu1 %4368  ;;  %6072 = vpow2.f32 %v4406_v0 }
0x1349   :  { %v4386_v46 = vsub.f32 %v8551_v19, %v8586_v51  ;;  %v4387_v8 = vsub.f32 %v8554_v20, %v8586_v51  ;;  %v4408_v59 = vmul.f32 1.442695, %v4384_v15  ;;  %v4410_v27 = vmul.f32 1.442695, %v4385_v2  ;;  %v6063_v37 = vpop.eup %6062 }
0x134a   :  { %v6065_v43 = vpop.eup %6064 }
0x134b   :  { %v4412_v45 = vmul.f32 1.442695, %v4386_v46  ;;  %v4414_v49 = vmul.f32 1.442695, %v4387_v8  ;;  %6074 = vpow2.f32 %v4408_v59  ;;  %v4427_v30 = vadd.f32 %v6065_v43, %v6063_v37 }
0x134c   :  { %6076 = vpow2.f32 %v4410_v27 }
0x134d   :  { %6078 = vpow2.f32 %v4412_v45  ;;  %v6067_v36 = vpop.eup %6066 }
0x134e   :  { %6080 = vpow2.f32 %v4414_v49  ;;  %v6069_v32 = vpop.eup %6068 }
0x134f   :  { %v4430_v14 = vadd.f32 %v6069_v32, %v6067_v36 }
0x1351   :  { %v6071_v16 = vpop.eup %6070 }
0x1388   :  { %v4343_v52 = vpop.f32.mrb[100].mxu0 }
0x1389   :  { %v8597_v23 = vadd.f32 %v4343_v52, %v8504_v31  ;;  %v4345_v34 = vpop.f32.mrb[101].mxu0 }
0x138a   :  { %v8600_v38 = vadd.f32 %v4345_v34, %v8507_v62  ;;  %v4347_v28 = vpop.f32.mrb[102].mxu0 }
0x138b   :  { %v8603_v39 = vadd.f32 %v4347_v28, %v8504_v31  ;;  %v4349_v60 = vpop.f32.mrb[103].mxu0  ;;  %v4424_v31 = vadd.f32 %v6061_v1, %v6059_v35 }
0x138c   :  { %v8606_v41 = vadd.f32 %v4349_v60, %v8507_v62  ;;  %v4370_v22 = vmax.f32 %v8597_v23, %v8600_v38  ;;  %v6073_v62 = vpop.eup %6072 }
0x138d   :  { %v6075_v18 = vpop.eup %6074  ;;  %v4433_v10 = vadd.f32 %v6073_v62, %v6071_v16 }
0x138e   :  { %4371 = vmax.xlane.f32.xlu0 %v4370_v22  ;;  %v4373_v57 = vmax.f32 %v8603_v39, %v8606_v41  ;;  %v6077_v13 = vpop.eup %6076 }
0x138f   :  { %v6079_v53 = vpop.eup %6078  ;;  %v4436_v4 = vadd.f32 %v6077_v13, %v6075_v18 }
0x1390   :  { %4374 = vmax.xlane.f32.xlu1 %v4373_v57  ;;  %v6081_v12 = vpop.eup %6080 }
0x1391   :  { %v4439_v33 = vadd.f32 %v6081_v12, %v6079_v53 }
0x1392   :  { %4425 = vadd.xlane.f32.xlu0 %v4424_v31 }
0x1394   :  { %4428 = vadd.xlane.f32.xlu1 %v4427_v30 }
0x1396   :  { %4431 = vadd.xlane.f32.xlu0 %v4430_v14 }
0x1398   :  { %4434 = vadd.xlane.f32.xlu1 %v4433_v10 }
0x139a   :  { %4437 = vadd.xlane.f32.xlu0 %v4436_v4 }
0x139c   :  { %4440 = vadd.xlane.f32.xlu1 %v4439_v33 }
0x141b   :  { %v8612_v26 = vpop.xlane.xlu0 %4371 }
0x141c   :  { %v4388_v25 = vsub.f32 %v8597_v23, %v8612_v26  ;;  %v4389_v63 = vsub.f32 %v8600_v38, %v8612_v26 }
0x141d   :  { %v8618_v17 = vpop.xlane.xlu1 %4374 }
0x141e   :  { %v4416_v58 = vmul.f32 1.442695, %v4388_v25  ;;  %v4418_v50 = vmul.f32 1.442695, %v4389_v63  ;;  %v4390_v54 = vsub.f32 %v8603_v39, %v8618_v17  ;;  %v4391_v15 = vsub.f32 %v8606_v41, %v8618_v17 }
0x141f   :  { %v4426_v42 = vpop.xlane.xlu0 %4425 }
0x1420   :  { %6082 = vpow2.f32 %v4416_v58  ;;  %v4420_v2 = vmul.f32 1.442695, %v4390_v54  ;;  %v4422_v5 = vmul.f32 1.442695, %v4391_v15 }
0x1421   :  { %6084 = vpow2.f32 %v4418_v50  ;;  %v4429_v46 = vpop.xlane.xlu1 %4428 }
0x1422   :  { %6086 = vpow2.f32 %v4420_v2 }
0x1423   :  { %6088 = vpow2.f32 %v4422_v5  ;;  %v4432_v0 = vpop.xlane.xlu0 %4431 }
0x1424   :  { %6090 = vlog2.f32 %v4426_v42 }
0x1425   :  { %6092 = vlog2.f32 %v4429_v46  ;;  %v4435_v8 = vpop.xlane.xlu1 %4434 }
0x1426   :  { %6094 = vlog2.f32 %v4432_v0 }
0x1427   :  { %6096 = vlog2.f32 %v4435_v8  ;;  %v4438_v59 = vpop.xlane.xlu0 %4437 }
0x1428   :  { %6098 = vlog2.f32 %v4438_v59 }
0x1429   :  { %v4441_v27 = vpop.xlane.xlu1 %4440 }
0x142a   :  { %v6083_v45 = vpop.eup %6082  ;;  %6100 = vlog2.f32 %v4441_v27 }
0x142b   :  { %v6085_v52 = vpop.eup %6084 }
0x142c   :  { %v6087_v49 = vpop.eup %6086  ;;  %v4442_v34 = vadd.f32 %v6085_v52, %v6083_v45 }
0x142d   :  { %v6089_v28 = vpop.eup %6088 }
0x142e   :  { %v6091_v60 = vpop.eup %6090  ;;  %4443 = vadd.xlane.f32.xlu0 %v4442_v34  ;;  %v4445_v35 = vadd.f32 %v6089_v28, %v6087_v49 }
0x142f   :  { %v6093_v22 = vpop.eup %6092  ;;  %v4449_v1 = vmul.f32 0.6931472, %v6091_v60 }
0x1430   :  { %v6095_v37 = vpop.eup %6094  ;;  %v4451_v57 = vmul.f32 0.6931472, %v6093_v22  ;;  %4446 = vadd.xlane.f32.xlu1 %v4445_v35 }
0x1431   :  { %v6097_v43 = vpop.eup %6096  ;;  %v4464_v36 = vadd.f32 %v4449_v1, %v8560_v61  ;;  %v4453_v31 = vmul.f32 0.6931472, %v6095_v37 }
0x1432   :  { %v6099_v32 = vpop.eup %6098  ;;  %v4465_v16 = vadd.f32 %v4451_v57, %v8564_v55  ;;  %v4455_v30 = vmul.f32 0.6931472, %v6097_v43 }
0x1433   :  { %v4472_v62 = vsub.f32 %v8511_v11, %v4464_v36  ;;  %v4473_v18 = vsub.f32 %v8514_v6, %v4464_v36  ;;  %v4466_v14 = vadd.f32 %v4453_v31, %v8562_v24  ;;  %v4457_v13 = vmul.f32 0.6931472, %v6099_v32 }
0x1434   :  { %v6101_v53 = vpop.eup %6100  ;;  %v4474_v10 = vsub.f32 %v8517_v47, %v4465_v16  ;;  %v4475_v12 = vsub.f32 %v8520_v48, %v4465_v16  ;;  %v4467_v4 = vadd.f32 %v4455_v30, %v8574_v3 }
0x1435   :  { %4488 = vst [vmem:[#allocation17] sm:$0xff] %v4472_v62  ;;  %4489 = vst [vmem:[#allocation17 + $0x8] sm:$0xff] %v4473_v18  ;;  %v4476_v61 = vsub.f32 %v8527_v7, %v4466_v14  ;;  %v4477_v55 = vsub.f32 %v8530_v40, %v4466_v14  ;;  %v4468_v11 = vadd.f32 %v4457_v13, %v8580_v29  ;;  %v4459_v33 = vmul.f32 0.6931472, %v6101_v53 }
0x1436   :  { %4490 = vst [vmem:[#allocation17 + $0x10] sm:$0xff] %v4474_v10  ;;  %4491 = vst [vmem:[#allocation17 + $0x18] sm:$0xff] %v4475_v12  ;;  %v4478_v6 = vsub.f32 %v8534_v56, %v4467_v4  ;;  %v4479_v24 = vsub.f32 %v8537_v44, %v4467_v4 }
0x1437   :  { %4492 = vst [vmem:[#allocation17 + $0x20] sm:$0xff] %v4476_v61  ;;  %4493 = vst [vmem:[#allocation17 + $0x28] sm:$0xff] %v4477_v55  ;;  %v4480_v47 = vsub.f32 %v8545_v21, %v4468_v11  ;;  %v4481_v48 = vsub.f32 %v8548_v9, %v4468_v11  ;;  %v4469_v3 = vadd.f32 %v4459_v33, %v8586_v51 }
0x1438   :  { %4494 = vst [vmem:[#allocation17 + $0x30] sm:$0xff] %v4478_v6  ;;  %4495 = vst [vmem:[#allocation17 + $0x38] sm:$0xff] %v4479_v24 }
0x1439   :  { %4496 = vst [vmem:[#allocation17 + $0x40] sm:$0xff] %v4480_v47  ;;  %4497 = vst [vmem:[#allocation17 + $0x48] sm:$0xff] %v4481_v48  ;;  %v4482_v7 = vsub.f32 %v8551_v19, %v4469_v3  ;;  %v4483_v40 = vsub.f32 %v8554_v20, %v4469_v3 }
0x143b   :  { %4498 = vst [vmem:[#allocation17 + $0x50] sm:$0xff] %v4482_v7  ;;  %4499 = vst [vmem:[#allocation17 + $0x58] sm:$0xff] %v4483_v40 }
0x143c   :  { %6289 = shalt.err (!%p6286_p7)
}
0x143d   :  { %s6290_s27 = scalar_lea.hbm %s8715_s19, 128 }
0x143e   :  { %p6291_p8 = scmp.ne.s32.totalorder %s8715_s19, %s6290_s27  ;;  %p6294_p9 = scmp.lt.u32.totalorder %s6290_s27, %s8715_s19 }
0x1440   :  { %p6296_p10 = pnand %p6294_p9, %p6291_p8 }
0x1442   :  { %6299 = shalt.err (!%p6296_p10)
}
0x1443   :  { %4525 = dma.vmem_to_hbm [thread:$0]  %s4523_s22, 128, %s8715_s19, [#allocation19]  }
0x1444   :  { %s6392_s6 = smov [#allocation20]   ;;  %s6393_s10 = smov [#allocation21]  }
0x1445   :  { %s4532_s28 = sshll.u32 %s6392_s6, 4  ;;  %s4542_s18 = sshll.u32 %s6393_s10, 4  ;;  %s4533_s28 = int_to_ptr.vmem [resolvable:$true] %s4532_s28  ;;  %s4543_s18 = int_to_ptr.vmem [resolvable:$true] %s4542_s18 }
0x1446   :  { %s6300_s11 = scalar_lea.vmem %s4533_s28, 128  ;;  %p6305_p12 = scmp.lt.s32.totalorder %s4533_s28, %s4533_s28 }
0x1447   :  { %p6301_p11 = scmp.ne.s32.totalorder %s4533_s28, %s6300_s11  ;;  %p6306_p13 = scmp.lt.s32.totalorder %s6300_s11, %s6300_s11 }
0x1449   :  { %p6307_p0 = por %p6306_p13, %p6305_p12 }
0x144b   :  { %p6308_p1 = pnand %p6307_p0, %p6301_p11 }
0x144d   :  { %6311 = shalt.err (!%p6308_p1)
}
0x144e   :  { %s8781_s25 = sld [smem:[#allocation45_spill]] }
0x1454   :  { %s6312_s12 = scalar_lea.hbm %s8781_s25, 128 }
0x1455   :  { %p6313_p2 = scmp.ne.s32.totalorder %s8781_s25, %s6312_s12  ;;  %p6316_p3 = scmp.lt.u32.totalorder %s6312_s12, %s8781_s25 }
0x1457   :  { %p6318_p4 = pnand %p6316_p3, %p6313_p2 }
0x1459   :  { %6321 = shalt.err (!%p6318_p4)
}
0x145a   :  { %4535 = dma.vmem_to_hbm [thread:$0]  %s4533_s28, 128, %s8781_s25, [#allocation19]  }
0x145b   :  { %s6322_s15 = scalar_lea.vmem %s4543_s18, 128  ;;  %p6327_p6 = scmp.lt.s32.totalorder %s4543_s18, %s4543_s18 }
0x145c   :  { %p6323_p5 = scmp.ne.s32.totalorder %s4543_s18, %s6322_s15  ;;  %p6328_p7 = scmp.lt.s32.totalorder %s6322_s15, %s6322_s15 }
0x145e   :  { %p6329_p8 = por %p6328_p7, %p6327_p6 }
0x1460   :  { %p6330_p9 = pnand %p6329_p8, %p6323_p5 }
0x1462   :  { %6333 = shalt.err (!%p6330_p9)
}
0x1463   :  { %s8782_s29 = sld [smem:[#allocation46_spill]] }
0x1469   :  { %s6334_s17 = scalar_lea.hbm %s8782_s29, 128 }
0x146a   :  { %p6335_p10 = scmp.ne.s32.totalorder %s8782_s29, %s6334_s17  ;;  %p6338_p11 = scmp.lt.u32.totalorder %s6334_s17, %s8782_s29 }
0x146c   :  { %p6340_p12 = pnand %p6338_p11, %p6335_p10 }
0x146e   :  { %6343 = shalt.err (!%p6340_p12)
}
0x146f   :  { %4545 = dma.vmem_to_hbm [thread:$0]  %s4543_s18, 128, %s8782_s29, [#allocation22]  }
0x1470   :  { %s6394_s1 = smov [#allocation17]  }
0x1471   :  { %s4509_s26 = sshll.u32 %s6394_s1, 4  ;;  %s4510_s26 = int_to_ptr.vmem [resolvable:$true] %s4509_s26 }
0x1472   :  { %s6344_s20 = scalar_lea.vmem %s4510_s26, 2048  ;;  %p6349_p0 = scmp.lt.s32.totalorder %s4510_s26, %s4510_s26 }
0x1473   :  { %p6345_p13 = scmp.ne.s32.totalorder %s4510_s26, %s6344_s20  ;;  %p6350_p1 = scmp.lt.s32.totalorder %s6344_s20, %s6344_s20 }
0x1475   :  { %p6351_p2 = por %p6350_p1, %p6349_p0 }
0x1477   :  { %p6352_p3 = pnand %p6351_p2, %p6345_p13 }
0x14bb   :  { %v4444_v56 = vpop.xlane.xlu0 %4443 }
0x14bc   :  { %6102 = vlog2.f32 %v4444_v56 }
0x14bd   :  { %v4447_v44 = vpop.xlane.xlu1 %4446 }
0x14be   :  { %6104 = vlog2.f32 %v4447_v44 }
0x14c6   :  { %v6103_v21 = vpop.eup %6102 }
0x14c7   :  { %v4461_v9 = vmul.f32 0.6931472, %v6103_v21 }
0x14c8   :  { %v6105_v19 = vpop.eup %6104 }
0x14c9   :  { %v4470_v20 = vadd.f32 %v4461_v9, %v8612_v26  ;;  %v4463_v29 = vmul.f32 0.6931472, %v6105_v19 }
0x14cb   :  { %v4484_v51 = vsub.f32 %v8597_v23, %v4470_v20  ;;  %v4485_v25 = vsub.f32 %v8600_v38, %v4470_v20  ;;  %v4471_v63 = vadd.f32 %v4463_v29, %v8618_v17 }
0x14cd   :  { %4500 = vst [vmem:[#allocation17 + $0x60] sm:$0xff] %v4484_v51  ;;  %4501 = vst [vmem:[#allocation17 + $0x68] sm:$0xff] %v4485_v25  ;;  %v4486_v58 = vsub.f32 %v8603_v39, %v4471_v63  ;;  %v4487_v50 = vsub.f32 %v8606_v41, %v4471_v63 }
0x14cf   :  { %4502 = vst [vmem:[#allocation17 + $0x70] sm:$0xff] %v4486_v58  ;;  %4503 = vst [vmem:[#allocation17 + $0x78] sm:$0xff] %v4487_v50 }
0x14d0   :  { %6355 = shalt.err (!%p6352_p3)
}
0x14d1   :  { %s8783_s6 = sld [smem:[#allocation44_spill]] }
0x14d7   :  { %s6356_s28 = scalar_lea.hbm %s8783_s6, 2048 }
0x14d8   :  { %p6357_p4 = scmp.ne.s32.totalorder %s8783_s6, %s6356_s28  ;;  %p6360_p5 = scmp.lt.u32.totalorder %s6356_s28, %s8783_s6 }
0x14da   :  { %p6362_p6 = pnand %p6360_p5, %p6357_p4 }
0x14dc   :  { %6365 = shalt.err (!%p6362_p6)
}
0x14dd   :  { %s6395_s5 = smov 256   ;;  %s6396_s25 = smov 16  }
0x14de   :  { %4515 = dma.vmem_to_hbm [thread:$0]  %s4510_s26, 2048, %s8783_s6, [#allocation8], %s6395_s5, %s6395_s5, %s6396_s25  }
0x14df   :  { %6374 = dma.done.wait [#allocation8], 2048  }
0x14e0   :  { %6375 = vsyncadd [#allocation8], 4294965248 }
0x14e1   :  { %6376 = dma.done.wait [#allocation19], 256  }
0x14e2   :  { %6377 = vsyncadd [#allocation19], 4294967040 }
0x14e3   :  { %6378 = dma.done.wait [#allocation22], 128  }
0x14e4   :  { %6379 = vsyncadd [#allocation22], 4294967168 }
0x14e5   :  { %4558 = vsyncpa [#allocation7], 1 }
0x14e6   :  { %4559 = vsyncpa [#allocation12], 1 }
0x14e7   :  { %4560 = vsyncpa [#allocation15], 1 }
0x14e8   :  { %4561 = vsyncpa [#allocation8], 1 }
0x14e9   :  { %4562 = vsyncpa [#allocation19], 1 }
0x14ea   :  { %4563 = vsyncpa [#allocation22], 1 }
0x14eb   :  { %4564 = vsyncpa [#allocation9], 1 }

</bundles_post_ra>
